<compile_context>
chip_gen: v7x
topology: tpu7x:2x2x1
jax: 0.10.0
libtpu: 0.0.40
codegen_flags: <defaults>
</compile_context>

<pallas_src>
import functools

import jax
import jax.numpy as jnp
import numpy as np
from jax.experimental import pallas as pl
from jax.experimental.pallas import tpu as pltpu


# ----------------------------- Pallas kernel --------------------------------
def shallow_lstm_kernel(x_ref, wih_ref, whh_ref, bl_ref, wsp_ref, bsp_ref,
                        bnsc_ref, bnsh_ref, wfc_ref, bfc_ref,
                        out_ref, xproj_ref, hs_ref, *, pool):
    # x_ref:    (T*Bp, C)   time-major, batch-minor LSTM input (batch padded to Bp)
    # wih_ref:  (C, 4H)     concatenated input weights, gate order [i, f, o, g]
    # whh_ref:  (H, 4H)     concatenated recurrent weights
    # bl_ref:   (1, 4H)     b_ih + b_hh
    # wsp_ref:  (H, K2)     Conv2d(1, K2, (n_chans, 1)) weight, flattened
    # bsp_ref:  (1, K2)     conv bias
    # bnsc_ref/bnsh_ref: (1, K2) folded BatchNorm2d scale / shift (eval mode)
    # wfc_ref:  (Tp*K2, n_out)  fc weight re-laid-out: wfc[p*K2+k, o] = W[o, k*Tp+p]
    # bfc_ref:  (1, n_out)
    # out_ref:  (Bp, n_out)
    # xproj_ref: scratch (T*Bp, 4H)  hoisted input projection
    # hs_ref:    scratch (T*Bp, H)   per-timestep hidden states
    Bp = out_ref.shape[0]
    H = whh_ref.shape[0]
    T = x_ref.shape[0] // Bp
    Tp = T // pool

    # ---- 1) hoisted input projection: one MXU matmul for all timesteps -------
    xproj_ref[...] = (jnp.dot(x_ref[...], wih_ref[...],
                              preferred_element_type=jnp.float32)
                      + bl_ref[...])

    whh = whh_ref[...]

    # ---- 2) recurrent loop, fully unrolled with static aligned slices: -------
    #         exactly one matmul per step on the serial critical path.
    h = jnp.zeros((Bp, H), jnp.float32)
    c = jnp.zeros((Bp, H), jnp.float32)
    for t in range(T):
        gates = (xproj_ref[t * Bp:(t + 1) * Bp, :]
                 + jnp.dot(h, whh, preferred_element_type=jnp.float32))
        sig = jax.nn.sigmoid(gates[:, :3 * H])          # contiguous [i, f, o]
        i_g = sig[:, 0 * H:1 * H]
        f_g = sig[:, 1 * H:2 * H]
        o_g = sig[:, 2 * H:3 * H]
        g_g = jnp.tanh(gates[:, 3 * H:])
        c = f_g * c + i_g * g_g
        h = o_g * jnp.tanh(c)
        hs_ref[t * Bp:(t + 1) * Bp, :] = h

    # ---- 3) conv (H->K2 matmul) + ELU + BatchNorm, vectorized over all (t,b) -
    s = (jnp.dot(hs_ref[...], wsp_ref[...], preferred_element_type=jnp.float32)
         + bsp_ref[...])                                           # (T*Bp, K2)
    e = jnp.where(s > 0, s, jnp.exp(jnp.minimum(s, 0.0)) - 1.0)    # ELU(alpha=1)
    bn = e * bnsc_ref[...] + bnsh_ref[...]                         # BatchNorm2d (eval)

    # ---- 4) AvgPool2d((1, pool)) via static slices (tail truncated, as torch)
    inv_pool = 1.0 / float(pool)
    pooled = []
    for p in range(Tp):
        acc = bn[(p * pool) * Bp:(p * pool + 1) * Bp, :]
        for j in range(1, pool):
            acc = acc + bn[(p * pool + j) * Bp:(p * pool + j + 1) * Bp, :]
        pooled.append(acc * inv_pool)                              # (Bp, K2)

    # ---- 5) fused final Linear: single lane-dense (Bp, Tp*K2) @ (Tp*K2, n_out)
    # TODO(synk): dropout is identity in eval mode; training-mode RNG dropout omitted.
    feat = pooled[0] if Tp == 1 else jnp.concatenate(pooled, axis=-1)
    out_ref[...] = (jnp.dot(feat, wfc_ref[...],
                            preferred_element_type=jnp.float32)
                    + bfc_ref[...]).astype(out_ref.dtype)


# ------------------------------- wrapper -------------------------------------
def shallow_lstm_forward(x, params, pool_size):
    """x: (B, n_chans, n_times) float32, PyTorch layout."""
    B, C, T = x.shape
    Bp = ((B + 7) // 8) * 8                       # pad batch to full sublane groups
    x_tbc = jnp.transpose(x, (2, 0, 1)).astype(jnp.float32)        # (T, B, C)
    if Bp != B:
        x_tbc = jnp.pad(x_tbc, ((0, 0), (0, Bp - B), (0, 0)))
    x2d = x_tbc.reshape(T * Bp, C)                # time-major, batch-minor rows

    H = params["w_hh"].shape[0]
    H4 = params["w_hh"].shape[1]
    n_out = params["b_fc"].shape[1]

    # TODO(synk): at production batch sizes, add a batch-tile grid with
    # dimension_semantics=("parallel",) (both v7x TensorCores) and stream x over
    # T with a tiled BlockSpec to stay under v7x's 64 MiB VMEM.
    vmem = lambda: pl.BlockSpec(memory_space=pltpu.MemorySpace.VMEM)
    kernel = functools.partial(shallow_lstm_kernel, pool=pool_size)
    out = pl.pallas_call(
        kernel,
        out_shape=jax.ShapeDtypeStruct((Bp, n_out), jnp.float32),
        in_specs=[vmem() for _ in range(10)],
        out_specs=vmem(),
        scratch_shapes=[pltpu.VMEM((T * Bp, H4), jnp.float32),
                        pltpu.VMEM((T * Bp, H), jnp.float32)],
    )(x2d, params["w_ih"], params["w_hh"], params["b_l"],
      params["w_sp"], params["b_sp"], params["bn_scale"], params["bn_shift"],
      params["w_fc_r"], params["b_fc"])
    return out[:B]


# --------------------------- parameter creation -------------------------------
def init_params(key, n_chans, n_outputs, n_times, num_kernels, pool_size, hidden_size):
    # The original module only type-checks when n_chans == hidden_size
    # (conv kernel height == feature-map height, so conv output height == 1).
    assert n_chans == hidden_size, "ShallowLSTMNet requires n_chans == hidden_size"
    H = hidden_size
    K2 = num_kernels * 2
    Tp = n_times // pool_size
    ks = jax.random.split(key, 12)
    u = lambda k, shape, s: jax.random.uniform(k, shape, jnp.float32, -s, s)
    stdv = 1.0 / np.sqrt(H)

    # LSTM weights, concatenated on the gate axis; gate order [i, f, o, g].
    w_ih = u(ks[0], (n_chans, 4 * H), stdv)
    w_hh = u(ks[1], (H, 4 * H), stdv)
    b_l = u(ks[2], (1, 4 * H), stdv) + u(ks[3], (1, 4 * H), stdv)   # b_ih + b_hh

    csc = 1.0 / np.sqrt(n_chans)
    w_sp = u(ks[4], (H, K2), csc)       # Conv2d weight (K2, 1, n_chans, 1) -> (H, K2)
    b_sp = u(ks[5], (1, K2), csc)

    gamma = 1.0 + 0.1 * u(ks[6], (K2,), 1.0)
    beta = 0.1 * u(ks[7], (K2,), 1.0)
    r_mean = 0.1 * u(ks[8], (K2,), 1.0)
    r_var = 1.0 + 0.1 * jnp.abs(u(ks[9], (K2,), 1.0))
    eps = 1e-5
    inv_std = gamma / jnp.sqrt(r_var + eps)
    bn_scale = inv_std.reshape(1, K2)
    bn_shift = (beta - r_mean * inv_std).reshape(1, K2)

    fc_in = K2 * Tp
    fsc = 1.0 / np.sqrt(fc_in)
    w_fc = u(ks[10], (n_outputs, fc_in), fsc)    # PyTorch Linear weight layout
    b_fc = u(ks[11], (1, n_outputs), fsc)
    # Re-layout to (Tp*K2, n_out): w_fc_r[p*K2 + k, o] = w_fc[o, k*Tp + p]
    w_fc_r = jnp.transpose(w_fc.reshape(n_outputs, K2, Tp),
                           (2, 1, 0)).reshape(Tp * K2, n_outputs)

    return dict(w_ih=w_ih, w_hh=w_hh, b_l=b_l, w_sp=w_sp, b_sp=b_sp,
                bn_scale=bn_scale, bn_shift=bn_shift,
                w_fc_r=w_fc_r, b_fc=b_fc, w_fc=w_fc)


# ----------------------- pure-JAX reference (for checking) --------------------
def reference_forward(x, params, pool_size):
    B, C, T = x.shape
    xs = jnp.transpose(x, (0, 2, 1))                              # (B, T, C)
    H = params["w_hh"].shape[0]
    h = jnp.zeros((B, H), jnp.float32)
    c = jnp.zeros((B, H), jnp.float32)
    hs = []
    for t in range(T):
        gates = xs[:, t, :] @ params["w_ih"] + h @ params["w_hh"] + params["b_l"]
        i_g = jax.nn.sigmoid(gates[:, 0 * H:1 * H])
        f_g = jax.nn.sigmoid(gates[:, 1 * H:2 * H])
        o_g = jax.nn.sigmoid(gates[:, 2 * H:3 * H])
        g_g = jnp.tanh(gates[:, 3 * H:])
        c = f_g * c + i_g * g_g
        h = o_g * jnp.tanh(c)
        hs.append(h)
    hs = jnp.stack(hs, axis=1)                                    # (B, T, H)
    s = hs @ params["w_sp"] + params["b_sp"]                      # (B, T, K2)
    e = jnp.where(s > 0, s, jnp.exp(jnp.minimum(s, 0.0)) - 1.0)
    bn = e * params["bn_scale"] + params["bn_shift"]
    K2 = bn.shape[-1]
    Tp = T // pool_size
    pooled = bn[:, :Tp * pool_size, :].reshape(B, Tp, pool_size, K2).mean(axis=2)
    feat = jnp.transpose(pooled, (0, 2, 1)).reshape(B, K2 * Tp)   # torch .view order
    return feat @ params["w_fc"].T + params["b_fc"]


# ---------------------------------- main --------------------------------------
if __name__ == "__main__":
    B = 2
    n_chans = 8
    n_outputs = 4
    n_times = 40
    num_kernels = 5       # -> 10 conv channels
    pool_size = 20        # -> Tp = 2
    hidden_size = 8       # must equal n_chans (see init_params)

    key = jax.random.PRNGKey(0)
    kx, kp = jax.random.split(key)
    x = jax.random.normal(kx, (B, n_chans, n_times), jnp.float32)
    params = init_params(kp, n_chans, n_outputs, n_times,
                         num_kernels, pool_size, hidden_size)

    out = shallow_lstm_forward(x, params, pool_size)
    out = jax.block_until_ready(out)

    ref = reference_forward(x, params, pool_size)
    np.testing.assert_allclose(np.asarray(out), np.asarray(ref), rtol=1e-3, atol=1e-3)

    print("KERNEL_OK")
</pallas_src>

<mosaic_0001>
module attributes {stable_mosaic.version = 11 : i64} {
  func.func @shallow_lstm_kernel(%arg0: memref<320x8xf32, #tpu.memory_space<vmem>>, %arg1: memref<8x32xf32, #tpu.memory_space<vmem>>, %arg2: memref<8x32xf32, #tpu.memory_space<vmem>>, %arg3: memref<1x32xf32, #tpu.memory_space<vmem>>, %arg4: memref<8x10xf32, #tpu.memory_space<vmem>>, %arg5: memref<1x10xf32, #tpu.memory_space<vmem>>, %arg6: memref<1x10xf32, #tpu.memory_space<vmem>>, %arg7: memref<1x10xf32, #tpu.memory_space<vmem>>, %arg8: memref<20x4xf32, #tpu.memory_space<vmem>>, %arg9: memref<1x4xf32, #tpu.memory_space<vmem>>, %arg10: memref<8x4xf32, #tpu.memory_space<vmem>>, %arg11: memref<320x32xf32, #tpu.memory_space<vmem>>, %arg12: memref<320x8xf32, #tpu.memory_space<vmem>>) attributes {dimension_semantics = [], scalar_prefetch = 0 : i64, scratch_operands = 2 : i64, tpu.core_type = #tpu.core_type<tc>} {
    %c0 = arith.constant 0 : index
    %c0_0 = arith.constant 0 : index
    %0 = vector.load %arg0[%c0, %c0_0] : memref<320x8xf32, #tpu.memory_space<vmem>>, vector<320x8xf32>
    %c0_1 = arith.constant 0 : index
    %c0_2 = arith.constant 0 : index
    %1 = vector.load %arg1[%c0_1, %c0_2] : memref<8x32xf32, #tpu.memory_space<vmem>>, vector<8x32xf32>
    %cst = arith.constant dense<0.000000e+00> : vector<320x32xf32>
    %2 = tpu.matmul %0, %1, %cst {dimension_numbers = #tpu.dot_dimension_numbers<[1], [0], [0], [1], [0, 0, 1, 1], [], []>} : vector<320x8xf32>, vector<8x32xf32>, vector<320x32xf32> -> vector<320x32xf32>
    %c0_3 = arith.constant 0 : index
    %c0_4 = arith.constant 0 : index
    %3 = vector.load %arg3[%c0_3, %c0_4] : memref<1x32xf32, #tpu.memory_space<vmem>>, vector<1x32xf32>
    %4 = vector.broadcast %3 : vector<1x32xf32> to vector<320x32xf32>
    %5 = arith.addf %2, %4 : vector<320x32xf32>
    %c0_5 = arith.constant 0 : index
    %c0_6 = arith.constant 0 : index
    %6 = vector.load %arg11[%c0_5, %c0_6] : memref<320x32xf32, #tpu.memory_space<vmem>>, vector<320x32xf32>
    tpu.vector_store %arg11[%c0_5, %c0_6], %5 {strides = array<i32>} : memref<320x32xf32, #tpu.memory_space<vmem>>, vector<320x32xf32>,
    %c0_7 = arith.constant 0 : index
    %c0_8 = arith.constant 0 : index
    %7 = vector.load %arg2[%c0_7, %c0_8] : memref<8x32xf32, #tpu.memory_space<vmem>>, vector<8x32xf32>
    %cst_9 = arith.constant 0.000000e+00 : f32
    %8 = vector.broadcast %cst_9 : f32 to vector<8x8xf32>
    %cst_10 = arith.constant 0.000000e+00 : f32
    %9 = vector.broadcast %cst_10 : f32 to vector<8x8xf32>
    %c0_11 = arith.constant 0 : index
    %c0_12 = arith.constant 0 : index
    %10 = vector.load %arg11[%c0_11, %c0_12] : memref<320x32xf32, #tpu.memory_space<vmem>>, vector<8x32xf32>
    %cst_13 = arith.constant dense<0.000000e+00> : vector<8x32xf32>
    %11 = tpu.matmul %8, %7, %cst_13 {dimension_numbers = #tpu.dot_dimension_numbers<[1], [0], [0], [1], [0, 0, 1, 1], [], []>} : vector<8x8xf32>, vector<8x32xf32>, vector<8x32xf32> -> vector<8x32xf32>
    %12 = arith.addf %10, %11 : vector<8x32xf32>
    %13 = vector.extract_strided_slice %12 {offsets = [0, 0], sizes = [8, 24], strides = [1, 1]} : vector<8x32xf32> to vector<8x24xf32>
    %14 = arith.negf %13 : vector<8x24xf32>
    %15 = math.exp %14 : vector<8x24xf32>
    %cst_14 = arith.constant 1.000000e+00 : f32
    %16 = vector.broadcast %cst_14 : f32 to vector<8x24xf32>
    %17 = arith.addf %16, %15 : vector<8x24xf32>
    %18 = arith.divf %16, %17 : vector<8x24xf32>
    %19 = vector.extract_strided_slice %18 {offsets = [0, 0], sizes = [8, 8], strides = [1, 1]} : vector<8x24xf32> to vector<8x8xf32>
    %20 = vector.extract_strided_slice %18 {offsets = [0, 8], sizes = [8, 8], strides = [1, 1]} : vector<8x24xf32> to vector<8x8xf32>
    %21 = vector.extract_strided_slice %18 {offsets = [0, 16], sizes = [8, 8], strides = [1, 1]} : vector<8x24xf32> to vector<8x8xf32>
    %22 = vector.extract_strided_slice %12 {offsets = [0, 24], sizes = [8, 8], strides = [1, 1]} : vector<8x32xf32> to vector<8x8xf32>
    %23 = math.tanh %22 : vector<8x8xf32>
    %24 = arith.mulf %20, %9 : vector<8x8xf32>
    %25 = arith.mulf %19, %23 : vector<8x8xf32>
    %26 = arith.addf %24, %25 : vector<8x8xf32>
    %27 = math.tanh %26 : vector<8x8xf32>
    %28 = arith.mulf %21, %27 : vector<8x8xf32>
    %c0_15 = arith.constant 0 : index
    %c0_16 = arith.constant 0 : index
    %29 = vector.load %arg12[%c0_15, %c0_16] : memref<320x8xf32, #tpu.memory_space<vmem>>, vector<8x8xf32>
    tpu.vector_store %arg12[%c0_15, %c0_16], %28 {strides = array<i32>} : memref<320x8xf32, #tpu.memory_space<vmem>>, vector<8x8xf32>,
    %c8 = arith.constant 8 : index
    %c0_17 = arith.constant 0 : index
    %30 = vector.load %arg11[%c8, %c0_17] : memref<320x32xf32, #tpu.memory_space<vmem>>, vector<8x32xf32>
    %cst_18 = arith.constant dense<0.000000e+00> : vector<8x32xf32>
    %31 = tpu.matmul %28, %7, %cst_18 {dimension_numbers = #tpu.dot_dimension_numbers<[1], [0], [0], [1], [0, 0, 1, 1], [], []>} : vector<8x8xf32>, vector<8x32xf32>, vector<8x32xf32> -> vector<8x32xf32>
    %32 = arith.addf %30, %31 : vector<8x32xf32>
    %33 = vector.extract_strided_slice %32 {offsets = [0, 0], sizes = [8, 24], strides = [1, 1]} : vector<8x32xf32> to vector<8x24xf32>
    %34 = arith.negf %33 : vector<8x24xf32>
    %35 = math.exp %34 : vector<8x24xf32>
    %cst_19 = arith.constant 1.000000e+00 : f32
    %36 = vector.broadcast %cst_19 : f32 to vector<8x24xf32>
    %37 = arith.addf %36, %35 : vector<8x24xf32>
    %38 = arith.divf %36, %37 : vector<8x24xf32>
    %39 = vector.extract_strided_slice %38 {offsets = [0, 0], sizes = [8, 8], strides = [1, 1]} : vector<8x24xf32> to vector<8x8xf32>
    %40 = vector.extract_strided_slice %38 {offsets = [0, 8], sizes = [8, 8], strides = [1, 1]} : vector<8x24xf32> to vector<8x8xf32>
    %41 = vector.extract_strided_slice %38 {offsets = [0, 16], sizes = [8, 8], strides = [1, 1]} : vector<8x24xf32> to vector<8x8xf32>
    %42 = vector.extract_strided_slice %32 {offsets = [0, 24], sizes = [8, 8], strides = [1, 1]} : vector<8x32xf32> to vector<8x8xf32>
    %43 = math.tanh %42 : vector<8x8xf32>
    %44 = arith.mulf %40, %26 : vector<8x8xf32>
    %45 = arith.mulf %39, %43 : vector<8x8xf32>
    %46 = arith.addf %44, %45 : vector<8x8xf32>
    %47 = math.tanh %46 : vector<8x8xf32>
    %48 = arith.mulf %41, %47 : vector<8x8xf32>
    %c8_20 = arith.constant 8 : index
    %c0_21 = arith.constant 0 : index
    %49 = vector.load %arg12[%c8_20, %c0_21] : memref<320x8xf32, #tpu.memory_space<vmem>>, vector<8x8xf32>
    tpu.vector_store %arg12[%c8_20, %c0_21], %48 {strides = array<i32>} : memref<320x8xf32, #tpu.memory_space<vmem>>, vector<8x8xf32>,
    %c16 = arith.constant 16 : index
    %c0_22 = arith.constant 0 : index
    %50 = vector.load %arg11[%c16, %c0_22] : memref<320x32xf32, #tpu.memory_space<vmem>>, vector<8x32xf32>
    %cst_23 = arith.constant dense<0.000000e+00> : vector<8x32xf32>
    %51 = tpu.matmul %48, %7, %cst_23 {dimension_numbers = #tpu.dot_dimension_numbers<[1], [0], [0], [1], [0, 0, 1, 1], [], []>} : vector<8x8xf32>, vector<8x32xf32>, vector<8x32xf32> -> vector<8x32xf32>
    %52 = arith.addf %50, %51 : vector<8x32xf32>
    %53 = vector.extract_strided_slice %52 {offsets = [0, 0], sizes = [8, 24], strides = [1, 1]} : vector<8x32xf32> to vector<8x24xf32>
    %54 = arith.negf %53 : vector<8x24xf32>
    %55 = math.exp %54 : vector<8x24xf32>
    %cst_24 = arith.constant 1.000000e+00 : f32
    %56 = vector.broadcast %cst_24 : f32 to vector<8x24xf32>
    %57 = arith.addf %56, %55 : vector<8x24xf32>
    %58 = arith.divf %56, %57 : vector<8x24xf32>
    %59 = vector.extract_strided_slice %58 {offsets = [0, 0], sizes = [8, 8], strides = [1, 1]} : vector<8x24xf32> to vector<8x8xf32>
    %60 = vector.extract_strided_slice %58 {offsets = [0, 8], sizes = [8, 8], strides = [1, 1]} : vector<8x24xf32> to vector<8x8xf32>
    %61 = vector.extract_strided_slice %58 {offsets = [0, 16], sizes = [8, 8], strides = [1, 1]} : vector<8x24xf32> to vector<8x8xf32>
    %62 = vector.extract_strided_slice %52 {offsets = [0, 24], sizes = [8, 8], strides = [1, 1]} : vector<8x32xf32> to vector<8x8xf32>
    %63 = math.tanh %62 : vector<8x8xf32>
    %64 = arith.mulf %60, %46 : vector<8x8xf32>
    %65 = arith.mulf %59, %63 : vector<8x8xf32>
    %66 = arith.addf %64, %65 : vector<8x8xf32>
    %67 = math.tanh %66 : vector<8x8xf32>
    %68 = arith.mulf %61, %67 : vector<8x8xf32>
    %c16_25 = arith.constant 16 : index
    %c0_26 = arith.constant 0 : index
    %69 = vector.load %arg12[%c16_25, %c0_26] : memref<320x8xf32, #tpu.memory_space<vmem>>, vector<8x8xf32>
    tpu.vector_store %arg12[%c16_25, %c0_26], %68 {strides = array<i32>} : memref<320x8xf32, #tpu.memory_space<vmem>>, vector<8x8xf32>,
    %c24 = arith.constant 24 : index
    %c0_27 = arith.constant 0 : index
    %70 = vector.load %arg11[%c24, %c0_27] : memref<320x32xf32, #tpu.memory_space<vmem>>, vector<8x32xf32>
    %cst_28 = arith.constant dense<0.000000e+00> : vector<8x32xf32>
    %71 = tpu.matmul %68, %7, %cst_28 {dimension_numbers = #tpu.dot_dimension_numbers<[1], [0], [0], [1], [0, 0, 1, 1], [], []>} : vector<8x8xf32>, vector<8x32xf32>, vector<8x32xf32> -> vector<8x32xf32>
    %72 = arith.addf %70, %71 : vector<8x32xf32>
    %73 = vector.extract_strided_slice %72 {offsets = [0, 0], sizes = [8, 24], strides = [1, 1]} : vector<8x32xf32> to vector<8x24xf32>
    %74 = arith.negf %73 : vector<8x24xf32>
    %75 = math.exp %74 : vector<8x24xf32>
    %cst_29 = arith.constant 1.000000e+00 : f32
    %76 = vector.broadcast %cst_29 : f32 to vector<8x24xf32>
    %77 = arith.addf %76, %75 : vector<8x24xf32>
    %78 = arith.divf %76, %77 : vector<8x24xf32>
    %79 = vector.extract_strided_slice %78 {offsets = [0, 0], sizes = [8, 8], strides = [1, 1]} : vector<8x24xf32> to vector<8x8xf32>
    %80 = vector.extract_strided_slice %78 {offsets = [0, 8], sizes = [8, 8], strides = [1, 1]} : vector<8x24xf32> to vector<8x8xf32>
    %81 = vector.extract_strided_slice %78 {offsets = [0, 16], sizes = [8, 8], strides = [1, 1]} : vector<8x24xf32> to vector<8x8xf32>
    %82 = vector.extract_strided_slice %72 {offsets = [0, 24], sizes = [8, 8], strides = [1, 1]} : vector<8x32xf32> to vector<8x8xf32>
    %83 = math.tanh %82 : vector<8x8xf32>
    %84 = arith.mulf %80, %66 : vector<8x8xf32>
    %85 = arith.mulf %79, %83 : vector<8x8xf32>
    %86 = arith.addf %84, %85 : vector<8x8xf32>
    %87 = math.tanh %86 : vector<8x8xf32>
    %88 = arith.mulf %81, %87 : vector<8x8xf32>
    %c24_30 = arith.constant 24 : index
    %c0_31 = arith.constant 0 : index
    %89 = vector.load %arg12[%c24_30, %c0_31] : memref<320x8xf32, #tpu.memory_space<vmem>>, vector<8x8xf32>
    tpu.vector_store %arg12[%c24_30, %c0_31], %88 {strides = array<i32>} : memref<320x8xf32, #tpu.memory_space<vmem>>, vector<8x8xf32>,
    %c32 = arith.constant 32 : index
    %c0_32 = arith.constant 0 : index
    %90 = vector.load %arg11[%c32, %c0_32] : memref<320x32xf32, #tpu.memory_space<vmem>>, vector<8x32xf32>
    %cst_33 = arith.constant dense<0.000000e+00> : vector<8x32xf32>
    %91 = tpu.matmul %88, %7, %cst_33 {dimension_numbers = #tpu.dot_dimension_numbers<[1], [0], [0], [1], [0, 0, 1, 1], [], []>} : vector<8x8xf32>, vector<8x32xf32>, vector<8x32xf32> -> vector<8x32xf32>
    %92 = arith.addf %90, %91 : vector<8x32xf32>
    %93 = vector.extract_strided_slice %92 {offsets = [0, 0], sizes = [8, 24], strides = [1, 1]} : vector<8x32xf32> to vector<8x24xf32>
    %94 = arith.negf %93 : vector<8x24xf32>
    %95 = math.exp %94 : vector<8x24xf32>
    %cst_34 = arith.constant 1.000000e+00 : f32
    %96 = vector.broadcast %cst_34 : f32 to vector<8x24xf32>
    %97 = arith.addf %96, %95 : vector<8x24xf32>
    %98 = arith.divf %96, %97 : vector<8x24xf32>
    %99 = vector.extract_strided_slice %98 {offsets = [0, 0], sizes = [8, 8], strides = [1, 1]} : vector<8x24xf32> to vector<8x8xf32>
    %100 = vector.extract_strided_slice %98 {offsets = [0, 8], sizes = [8, 8], strides = [1, 1]} : vector<8x24xf32> to vector<8x8xf32>
    %101 = vector.extract_strided_slice %98 {offsets = [0, 16], sizes = [8, 8], strides = [1, 1]} : vector<8x24xf32> to vector<8x8xf32>
    %102 = vector.extract_strided_slice %92 {offsets = [0, 24], sizes = [8, 8], strides = [1, 1]} : vector<8x32xf32> to vector<8x8xf32>
    %103 = math.tanh %102 : vector<8x8xf32>
    %104 = arith.mulf %100, %86 : vector<8x8xf32>
    %105 = arith.mulf %99, %103 : vector<8x8xf32>
    %106 = arith.addf %104, %105 : vector<8x8xf32>
    %107 = math.tanh %106 : vector<8x8xf32>
    %108 = arith.mulf %101, %107 : vector<8x8xf32>
    %c32_35 = arith.constant 32 : index
    %c0_36 = arith.constant 0 : index
    %109 = vector.load %arg12[%c32_35, %c0_36] : memref<320x8xf32, #tpu.memory_space<vmem>>, vector<8x8xf32>
    tpu.vector_store %arg12[%c32_35, %c0_36], %108 {strides = array<i32>} : memref<320x8xf32, #tpu.memory_space<vmem>>, vector<8x8xf32>,
    %c40 = arith.constant 40 : index
    %c0_37 = arith.constant 0 : index
    %110 = vector.load %arg11[%c40, %c0_37] : memref<320x32xf32, #tpu.memory_space<vmem>>, vector<8x32xf32>
    %cst_38 = arith.constant dense<0.000000e+00> : vector<8x32xf32>
    %111 = tpu.matmul %108, %7, %cst_38 {dimension_numbers = #tpu.dot_dimension_numbers<[1], [0], [0], [1], [0, 0, 1, 1], [], []>} : vector<8x8xf32>, vector<8x32xf32>, vector<8x32xf32> -> vector<8x32xf32>
    %112 = arith.addf %110, %111 : vector<8x32xf32>
    %113 = vector.extract_strided_slice %112 {offsets = [0, 0], sizes = [8, 24], strides = [1, 1]} : vector<8x32xf32> to vector<8x24xf32>
    %114 = arith.negf %113 : vector<8x24xf32>
    %115 = math.exp %114 : vector<8x24xf32>
    %cst_39 = arith.constant 1.000000e+00 : f32
    %116 = vector.broadcast %cst_39 : f32 to vector<8x24xf32>
    %117 = arith.addf %116, %115 : vector<8x24xf32>
    %118 = arith.divf %116, %117 : vector<8x24xf32>
    %119 = vector.extract_strided_slice %118 {offsets = [0, 0], sizes = [8, 8], strides = [1, 1]} : vector<8x24xf32> to vector<8x8xf32>
    %120 = vector.extract_strided_slice %118 {offsets = [0, 8], sizes = [8, 8], strides = [1, 1]} : vector<8x24xf32> to vector<8x8xf32>
    %121 = vector.extract_strided_slice %118 {offsets = [0, 16], sizes = [8, 8], strides = [1, 1]} : vector<8x24xf32> to vector<8x8xf32>
    %122 = vector.extract_strided_slice %112 {offsets = [0, 24], sizes = [8, 8], strides = [1, 1]} : vector<8x32xf32> to vector<8x8xf32>
    %123 = math.tanh %122 : vector<8x8xf32>
    %124 = arith.mulf %120, %106 : vector<8x8xf32>
    %125 = arith.mulf %119, %123 : vector<8x8xf32>
    %126 = arith.addf %124, %125 : vector<8x8xf32>
    %127 = math.tanh %126 : vector<8x8xf32>
    %128 = arith.mulf %121, %127 : vector<8x8xf32>
    %c40_40 = arith.constant 40 : index
    %c0_41 = arith.constant 0 : index
    %129 = vector.load %arg12[%c40_40, %c0_41] : memref<320x8xf32, #tpu.memory_space<vmem>>, vector<8x8xf32>
    tpu.vector_store %arg12[%c40_40, %c0_41], %128 {strides = array<i32>} : memref<320x8xf32, #tpu.memory_space<vmem>>, vector<8x8xf32>,
    %c48 = arith.constant 48 : index
    %c0_42 = arith.constant 0 : index
    %130 = vector.load %arg11[%c48, %c0_42] : memref<320x32xf32, #tpu.memory_space<vmem>>, vector<8x32xf32>
    %cst_43 = arith.constant dense<0.000000e+00> : vector<8x32xf32>
    %131 = tpu.matmul %128, %7, %cst_43 {dimension_numbers = #tpu.dot_dimension_numbers<[1], [0], [0], [1], [0, 0, 1, 1], [], []>} : vector<8x8xf32>, vector<8x32xf32>, vector<8x32xf32> -> vector<8x32xf32>
    %132 = arith.addf %130, %131 : vector<8x32xf32>
    %133 = vector.extract_strided_slice %132 {offsets = [0, 0], sizes = [8, 24], strides = [1, 1]} : vector<8x32xf32> to vector<8x24xf32>
    %134 = arith.negf %133 : vector<8x24xf32>
    %135 = math.exp %134 : vector<8x24xf32>
    %cst_44 = arith.constant 1.000000e+00 : f32
    %136 = vector.broadcast %cst_44 : f32 to vector<8x24xf32>
    %137 = arith.addf %136, %135 : vector<8x24xf32>
    %138 = arith.divf %136, %137 : vector<8x24xf32>
    %139 = vector.extract_strided_slice %138 {offsets = [0, 0], sizes = [8, 8], strides = [1, 1]} : vector<8x24xf32> to vector<8x8xf32>
    %140 = vector.extract_strided_slice %138 {offsets = [0, 8], sizes = [8, 8], strides = [1, 1]} : vector<8x24xf32> to vector<8x8xf32>
    %141 = vector.extract_strided_slice %138 {offsets = [0, 16], sizes = [8, 8], strides = [1, 1]} : vector<8x24xf32> to vector<8x8xf32>
    %142 = vector.extract_strided_slice %132 {offsets = [0, 24], sizes = [8, 8], strides = [1, 1]} : vector<8x32xf32> to vector<8x8xf32>
    %143 = math.tanh %142 : vector<8x8xf32>
    %144 = arith.mulf %140, %126 : vector<8x8xf32>
    %145 = arith.mulf %139, %143 : vector<8x8xf32>
    %146 = arith.addf %144, %145 : vector<8x8xf32>
    %147 = math.tanh %146 : vector<8x8xf32>
    %148 = arith.mulf %141, %147 : vector<8x8xf32>
    %c48_45 = arith.constant 48 : index
    %c0_46 = arith.constant 0 : index
    %149 = vector.load %arg12[%c48_45, %c0_46] : memref<320x8xf32, #tpu.memory_space<vmem>>, vector<8x8xf32>
    tpu.vector_store %arg12[%c48_45, %c0_46], %148 {strides = array<i32>} : memref<320x8xf32, #tpu.memory_space<vmem>>, vector<8x8xf32>,
    %c56 = arith.constant 56 : index
    %c0_47 = arith.constant 0 : index
    %150 = vector.load %arg11[%c56, %c0_47] : memref<320x32xf32, #tpu.memory_space<vmem>>, vector<8x32xf32>
    %cst_48 = arith.constant dense<0.000000e+00> : vector<8x32xf32>
    %151 = tpu.matmul %148, %7, %cst_48 {dimension_numbers = #tpu.dot_dimension_numbers<[1], [0], [0], [1], [0, 0, 1, 1], [], []>} : vector<8x8xf32>, vector<8x32xf32>, vector<8x32xf32> -> vector<8x32xf32>
    %152 = arith.addf %150, %151 : vector<8x32xf32>
    %153 = vector.extract_strided_slice %152 {offsets = [0, 0], sizes = [8, 24], strides = [1, 1]} : vector<8x32xf32> to vector<8x24xf32>
    %154 = arith.negf %153 : vector<8x24xf32>
    %155 = math.exp %154 : vector<8x24xf32>
    %cst_49 = arith.constant 1.000000e+00 : f32
    %156 = vector.broadcast %cst_49 : f32 to vector<8x24xf32>
    %157 = arith.addf %156, %155 : vector<8x24xf32>
    %158 = arith.divf %156, %157 : vector<8x24xf32>
    %159 = vector.extract_strided_slice %158 {offsets = [0, 0], sizes = [8, 8], strides = [1, 1]} : vector<8x24xf32> to vector<8x8xf32>
    %160 = vector.extract_strided_slice %158 {offsets = [0, 8], sizes = [8, 8], strides = [1, 1]} : vector<8x24xf32> to vector<8x8xf32>
    %161 = vector.extract_strided_slice %158 {offsets = [0, 16], sizes = [8, 8], strides = [1, 1]} : vector<8x24xf32> to vector<8x8xf32>
    %162 = vector.extract_strided_slice %152 {offsets = [0, 24], sizes = [8, 8], strides = [1, 1]} : vector<8x32xf32> to vector<8x8xf32>
    %163 = math.tanh %162 : vector<8x8xf32>
    %164 = arith.mulf %160, %146 : vector<8x8xf32>
    %165 = arith.mulf %159, %163 : vector<8x8xf32>
    %166 = arith.addf %164, %165 : vector<8x8xf32>
    %167 = math.tanh %166 : vector<8x8xf32>
    %168 = arith.mulf %161, %167 : vector<8x8xf32>
    %c56_50 = arith.constant 56 : index
    %c0_51 = arith.constant 0 : index
    %169 = vector.load %arg12[%c56_50, %c0_51] : memref<320x8xf32, #tpu.memory_space<vmem>>, vector<8x8xf32>
    tpu.vector_store %arg12[%c56_50, %c0_51], %168 {strides = array<i32>} : memref<320x8xf32, #tpu.memory_space<vmem>>, vector<8x8xf32>,
    %c64 = arith.constant 64 : index
    %c0_52 = arith.constant 0 : index
    %170 = vector.load %arg11[%c64, %c0_52] : memref<320x32xf32, #tpu.memory_space<vmem>>, vector<8x32xf32>
    %cst_53 = arith.constant dense<0.000000e+00> : vector<8x32xf32>
    %171 = tpu.matmul %168, %7, %cst_53 {dimension_numbers = #tpu.dot_dimension_numbers<[1], [0], [0], [1], [0, 0, 1, 1], [], []>} : vector<8x8xf32>, vector<8x32xf32>, vector<8x32xf32> -> vector<8x32xf32>
    %172 = arith.addf %170, %171 : vector<8x32xf32>
    %173 = vector.extract_strided_slice %172 {offsets = [0, 0], sizes = [8, 24], strides = [1, 1]} : vector<8x32xf32> to vector<8x24xf32>
    %174 = arith.negf %173 : vector<8x24xf32>
    %175 = math.exp %174 : vector<8x24xf32>
    %cst_54 = arith.constant 1.000000e+00 : f32
    %176 = vector.broadcast %cst_54 : f32 to vector<8x24xf32>
    %177 = arith.addf %176, %175 : vector<8x24xf32>
    %178 = arith.divf %176, %177 : vector<8x24xf32>
    %179 = vector.extract_strided_slice %178 {offsets = [0, 0], sizes = [8, 8], strides = [1, 1]} : vector<8x24xf32> to vector<8x8xf32>
    %180 = vector.extract_strided_slice %178 {offsets = [0, 8], sizes = [8, 8], strides = [1, 1]} : vector<8x24xf32> to vector<8x8xf32>
    %181 = vector.extract_strided_slice %178 {offsets = [0, 16], sizes = [8, 8], strides = [1, 1]} : vector<8x24xf32> to vector<8x8xf32>
    %182 = vector.extract_strided_slice %172 {offsets = [0, 24], sizes = [8, 8], strides = [1, 1]} : vector<8x32xf32> to vector<8x8xf32>
    %183 = math.tanh %182 : vector<8x8xf32>
    %184 = arith.mulf %180, %166 : vector<8x8xf32>
    %185 = arith.mulf %179, %183 : vector<8x8xf32>
    %186 = arith.addf %184, %185 : vector<8x8xf32>
    %187 = math.tanh %186 : vector<8x8xf32>
    %188 = arith.mulf %181, %187 : vector<8x8xf32>
    %c64_55 = arith.constant 64 : index
    %c0_56 = arith.constant 0 : index
    %189 = vector.load %arg12[%c64_55, %c0_56] : memref<320x8xf32, #tpu.memory_space<vmem>>, vector<8x8xf32>
    tpu.vector_store %arg12[%c64_55, %c0_56], %188 {strides = array<i32>} : memref<320x8xf32, #tpu.memory_space<vmem>>, vector<8x8xf32>,
    %c72 = arith.constant 72 : index
    %c0_57 = arith.constant 0 : index
    %190 = vector.load %arg11[%c72, %c0_57] : memref<320x32xf32, #tpu.memory_space<vmem>>, vector<8x32xf32>
    %cst_58 = arith.constant dense<0.000000e+00> : vector<8x32xf32>
    %191 = tpu.matmul %188, %7, %cst_58 {dimension_numbers = #tpu.dot_dimension_numbers<[1], [0], [0], [1], [0, 0, 1, 1], [], []>} : vector<8x8xf32>, vector<8x32xf32>, vector<8x32xf32> -> vector<8x32xf32>
    %192 = arith.addf %190, %191 : vector<8x32xf32>
    %193 = vector.extract_strided_slice %192 {offsets = [0, 0], sizes = [8, 24], strides = [1, 1]} : vector<8x32xf32> to vector<8x24xf32>
    %194 = arith.negf %193 : vector<8x24xf32>
    %195 = math.exp %194 : vector<8x24xf32>
    %cst_59 = arith.constant 1.000000e+00 : f32
    %196 = vector.broadcast %cst_59 : f32 to vector<8x24xf32>
    %197 = arith.addf %196, %195 : vector<8x24xf32>
    %198 = arith.divf %196, %197 : vector<8x24xf32>
    %199 = vector.extract_strided_slice %198 {offsets = [0, 0], sizes = [8, 8], strides = [1, 1]} : vector<8x24xf32> to vector<8x8xf32>
    %200 = vector.extract_strided_slice %198 {offsets = [0, 8], sizes = [8, 8], strides = [1, 1]} : vector<8x24xf32> to vector<8x8xf32>
    %201 = vector.extract_strided_slice %198 {offsets = [0, 16], sizes = [8, 8], strides = [1, 1]} : vector<8x24xf32> to vector<8x8xf32>
    %202 = vector.extract_strided_slice %192 {offsets = [0, 24], sizes = [8, 8], strides = [1, 1]} : vector<8x32xf32> to vector<8x8xf32>
    %203 = math.tanh %202 : vector<8x8xf32>
    %204 = arith.mulf %200, %186 : vector<8x8xf32>
    %205 = arith.mulf %199, %203 : vector<8x8xf32>
    %206 = arith.addf %204, %205 : vector<8x8xf32>
    %207 = math.tanh %206 : vector<8x8xf32>
    %208 = arith.mulf %201, %207 : vector<8x8xf32>
    %c72_60 = arith.constant 72 : index
    %c0_61 = arith.constant 0 : index
    %209 = vector.load %arg12[%c72_60, %c0_61] : memref<320x8xf32, #tpu.memory_space<vmem>>, vector<8x8xf32>
    tpu.vector_store %arg12[%c72_60, %c0_61], %208 {strides = array<i32>} : memref<320x8xf32, #tpu.memory_space<vmem>>, vector<8x8xf32>,
    %c80 = arith.constant 80 : index
    %c0_62 = arith.constant 0 : index
    %210 = vector.load %arg11[%c80, %c0_62] : memref<320x32xf32, #tpu.memory_space<vmem>>, vector<8x32xf32>
    %cst_63 = arith.constant dense<0.000000e+00> : vector<8x32xf32>
    %211 = tpu.matmul %208, %7, %cst_63 {dimension_numbers = #tpu.dot_dimension_numbers<[1], [0], [0], [1], [0, 0, 1, 1], [], []>} : vector<8x8xf32>, vector<8x32xf32>, vector<8x32xf32> -> vector<8x32xf32>
    %212 = arith.addf %210, %211 : vector<8x32xf32>
    %213 = vector.extract_strided_slice %212 {offsets = [0, 0], sizes = [8, 24], strides = [1, 1]} : vector<8x32xf32> to vector<8x24xf32>
    %214 = arith.negf %213 : vector<8x24xf32>
    %215 = math.exp %214 : vector<8x24xf32>
    %cst_64 = arith.constant 1.000000e+00 : f32
    %216 = vector.broadcast %cst_64 : f32 to vector<8x24xf32>
    %217 = arith.addf %216, %215 : vector<8x24xf32>
    %218 = arith.divf %216, %217 : vector<8x24xf32>
    %219 = vector.extract_strided_slice %218 {offsets = [0, 0], sizes = [8, 8], strides = [1, 1]} : vector<8x24xf32> to vector<8x8xf32>
    %220 = vector.extract_strided_slice %218 {offsets = [0, 8], sizes = [8, 8], strides = [1, 1]} : vector<8x24xf32> to vector<8x8xf32>
    %221 = vector.extract_strided_slice %218 {offsets = [0, 16], sizes = [8, 8], strides = [1, 1]} : vector<8x24xf32> to vector<8x8xf32>
    %222 = vector.extract_strided_slice %212 {offsets = [0, 24], sizes = [8, 8], strides = [1, 1]} : vector<8x32xf32> to vector<8x8xf32>
    %223 = math.tanh %222 : vector<8x8xf32>
    %224 = arith.mulf %220, %206 : vector<8x8xf32>
    %225 = arith.mulf %219, %223 : vector<8x8xf32>
    %226 = arith.addf %224, %225 : vector<8x8xf32>
    %227 = math.tanh %226 : vector<8x8xf32>
    %228 = arith.mulf %221, %227 : vector<8x8xf32>
    %c80_65 = arith.constant 80 : index
    %c0_66 = arith.constant 0 : index
    %229 = vector.load %arg12[%c80_65, %c0_66] : memref<320x8xf32, #tpu.memory_space<vmem>>, vector<8x8xf32>
    tpu.vector_store %arg12[%c80_65, %c0_66], %228 {strides = array<i32>} : memref<320x8xf32, #tpu.memory_space<vmem>>, vector<8x8xf32>,
    %c88 = arith.constant 88 : index
    %c0_67 = arith.constant 0 : index
    %230 = vector.load %arg11[%c88, %c0_67] : memref<320x32xf32, #tpu.memory_space<vmem>>, vector<8x32xf32>
    %cst_68 = arith.constant dense<0.000000e+00> : vector<8x32xf32>
    %231 = tpu.matmul %228, %7, %cst_68 {dimension_numbers = #tpu.dot_dimension_numbers<[1], [0], [0], [1], [0, 0, 1, 1], [], []>} : vector<8x8xf32>, vector<8x32xf32>, vector<8x32xf32> -> vector<8x32xf32>
    %232 = arith.addf %230, %231 : vector<8x32xf32>
    %233 = vector.extract_strided_slice %232 {offsets = [0, 0], sizes = [8, 24], strides = [1, 1]} : vector<8x32xf32> to vector<8x24xf32>
    %234 = arith.negf %233 : vector<8x24xf32>
    %235 = math.exp %234 : vector<8x24xf32>
    %cst_69 = arith.constant 1.000000e+00 : f32
    %236 = vector.broadcast %cst_69 : f32 to vector<8x24xf32>
    %237 = arith.addf %236, %235 : vector<8x24xf32>
    %238 = arith.divf %236, %237 : vector<8x24xf32>
    %239 = vector.extract_strided_slice %238 {offsets = [0, 0], sizes = [8, 8], strides = [1, 1]} : vector<8x24xf32> to vector<8x8xf32>
    %240 = vector.extract_strided_slice %238 {offsets = [0, 8], sizes = [8, 8], strides = [1, 1]} : vector<8x24xf32> to vector<8x8xf32>
    %241 = vector.extract_strided_slice %238 {offsets = [0, 16], sizes = [8, 8], strides = [1, 1]} : vector<8x24xf32> to vector<8x8xf32>
    %242 = vector.extract_strided_slice %232 {offsets = [0, 24], sizes = [8, 8], strides = [1, 1]} : vector<8x32xf32> to vector<8x8xf32>
    %243 = math.tanh %242 : vector<8x8xf32>
    %244 = arith.mulf %240, %226 : vector<8x8xf32>
    %245 = arith.mulf %239, %243 : vector<8x8xf32>
    %246 = arith.addf %244, %245 : vector<8x8xf32>
    %247 = math.tanh %246 : vector<8x8xf32>
    %248 = arith.mulf %241, %247 : vector<8x8xf32>
    %c88_70 = arith.constant 88 : index
    %c0_71 = arith.constant 0 : index
    %249 = vector.load %arg12[%c88_70, %c0_71] : memref<320x8xf32, #tpu.memory_space<vmem>>, vector<8x8xf32>
    tpu.vector_store %arg12[%c88_70, %c0_71], %248 {strides = array<i32>} : memref<320x8xf32, #tpu.memory_space<vmem>>, vector<8x8xf32>,
    %c96 = arith.constant 96 : index
    %c0_72 = arith.constant 0 : index
    %250 = vector.load %arg11[%c96, %c0_72] : memref<320x32xf32, #tpu.memory_space<vmem>>, vector<8x32xf32>
    %cst_73 = arith.constant dense<0.000000e+00> : vector<8x32xf32>
    %251 = tpu.matmul %248, %7, %cst_73 {dimension_numbers = #tpu.dot_dimension_numbers<[1], [0], [0], [1], [0, 0, 1, 1], [], []>} : vector<8x8xf32>, vector<8x32xf32>, vector<8x32xf32> -> vector<8x32xf32>
    %252 = arith.addf %250, %251 : vector<8x32xf32>
    %253 = vector.extract_strided_slice %252 {offsets = [0, 0], sizes = [8, 24], strides = [1, 1]} : vector<8x32xf32> to vector<8x24xf32>
    %254 = arith.negf %253 : vector<8x24xf32>
    %255 = math.exp %254 : vector<8x24xf32>
    %cst_74 = arith.constant 1.000000e+00 : f32
    %256 = vector.broadcast %cst_74 : f32 to vector<8x24xf32>
    %257 = arith.addf %256, %255 : vector<8x24xf32>
    %258 = arith.divf %256, %257 : vector<8x24xf32>
    %259 = vector.extract_strided_slice %258 {offsets = [0, 0], sizes = [8, 8], strides = [1, 1]} : vector<8x24xf32> to vector<8x8xf32>
    %260 = vector.extract_strided_slice %258 {offsets = [0, 8], sizes = [8, 8], strides = [1, 1]} : vector<8x24xf32> to vector<8x8xf32>
    %261 = vector.extract_strided_slice %258 {offsets = [0, 16], sizes = [8, 8], strides = [1, 1]} : vector<8x24xf32> to vector<8x8xf32>
    %262 = vector.extract_strided_slice %252 {offsets = [0, 24], sizes = [8, 8], strides = [1, 1]} : vector<8x32xf32> to vector<8x8xf32>
    %263 = math.tanh %262 : vector<8x8xf32>
    %264 = arith.mulf %260, %246 : vector<8x8xf32>
    %265 = arith.mulf %259, %263 : vector<8x8xf32>
    %266 = arith.addf %264, %265 : vector<8x8xf32>
    %267 = math.tanh %266 : vector<8x8xf32>
    %268 = arith.mulf %261, %267 : vector<8x8xf32>
    %c96_75 = arith.constant 96 : index
    %c0_76 = arith.constant 0 : index
    %269 = vector.load %arg12[%c96_75, %c0_76] : memref<320x8xf32, #tpu.memory_space<vmem>>, vector<8x8xf32>
    tpu.vector_store %arg12[%c96_75, %c0_76], %268 {strides = array<i32>} : memref<320x8xf32, #tpu.memory_space<vmem>>, vector<8x8xf32>,
    %c104 = arith.constant 104 : index
    %c0_77 = arith.constant 0 : index
    %270 = vector.load %arg11[%c104, %c0_77] : memref<320x32xf32, #tpu.memory_space<vmem>>, vector<8x32xf32>
    %cst_78 = arith.constant dense<0.000000e+00> : vector<8x32xf32>
    %271 = tpu.matmul %268, %7, %cst_78 {dimension_numbers = #tpu.dot_dimension_numbers<[1], [0], [0], [1], [0, 0, 1, 1], [], []>} : vector<8x8xf32>, vector<8x32xf32>, vector<8x32xf32> -> vector<8x32xf32>
    %272 = arith.addf %270, %271 : vector<8x32xf32>
    %273 = vector.extract_strided_slice %272 {offsets = [0, 0], sizes = [8, 24], strides = [1, 1]} : vector<8x32xf32> to vector<8x24xf32>
    %274 = arith.negf %273 : vector<8x24xf32>
    %275 = math.exp %274 : vector<8x24xf32>
    %cst_79 = arith.constant 1.000000e+00 : f32
    %276 = vector.broadcast %cst_79 : f32 to vector<8x24xf32>
    %277 = arith.addf %276, %275 : vector<8x24xf32>
    %278 = arith.divf %276, %277 : vector<8x24xf32>
    %279 = vector.extract_strided_slice %278 {offsets = [0, 0], sizes = [8, 8], strides = [1, 1]} : vector<8x24xf32> to vector<8x8xf32>
    %280 = vector.extract_strided_slice %278 {offsets = [0, 8], sizes = [8, 8], strides = [1, 1]} : vector<8x24xf32> to vector<8x8xf32>
    %281 = vector.extract_strided_slice %278 {offsets = [0, 16], sizes = [8, 8], strides = [1, 1]} : vector<8x24xf32> to vector<8x8xf32>
    %282 = vector.extract_strided_slice %272 {offsets = [0, 24], sizes = [8, 8], strides = [1, 1]} : vector<8x32xf32> to vector<8x8xf32>
    %283 = math.tanh %282 : vector<8x8xf32>
    %284 = arith.mulf %280, %266 : vector<8x8xf32>
    %285 = arith.mulf %279, %283 : vector<8x8xf32>
    %286 = arith.addf %284, %285 : vector<8x8xf32>
    %287 = math.tanh %286 : vector<8x8xf32>
    %288 = arith.mulf %281, %287 : vector<8x8xf32>
    %c104_80 = arith.constant 104 : index
    %c0_81 = arith.constant 0 : index
    %289 = vector.load %arg12[%c104_80, %c0_81] : memref<320x8xf32, #tpu.memory_space<vmem>>, vector<8x8xf32>
    tpu.vector_store %arg12[%c104_80, %c0_81], %288 {strides = array<i32>} : memref<320x8xf32, #tpu.memory_space<vmem>>, vector<8x8xf32>,
    %c112 = arith.constant 112 : index
    %c0_82 = arith.constant 0 : index
    %290 = vector.load %arg11[%c112, %c0_82] : memref<320x32xf32, #tpu.memory_space<vmem>>, vector<8x32xf32>
    %cst_83 = arith.constant dense<0.000000e+00> : vector<8x32xf32>
    %291 = tpu.matmul %288, %7, %cst_83 {dimension_numbers = #tpu.dot_dimension_numbers<[1], [0], [0], [1], [0, 0, 1, 1], [], []>} : vector<8x8xf32>, vector<8x32xf32>, vector<8x32xf32> -> vector<8x32xf32>
    %292 = arith.addf %290, %291 : vector<8x32xf32>
    %293 = vector.extract_strided_slice %292 {offsets = [0, 0], sizes = [8, 24], strides = [1, 1]} : vector<8x32xf32> to vector<8x24xf32>
    %294 = arith.negf %293 : vector<8x24xf32>
    %295 = math.exp %294 : vector<8x24xf32>
    %cst_84 = arith.constant 1.000000e+00 : f32
    %296 = vector.broadcast %cst_84 : f32 to vector<8x24xf32>
    %297 = arith.addf %296, %295 : vector<8x24xf32>
    %298 = arith.divf %296, %297 : vector<8x24xf32>
    %299 = vector.extract_strided_slice %298 {offsets = [0, 0], sizes = [8, 8], strides = [1, 1]} : vector<8x24xf32> to vector<8x8xf32>
    %300 = vector.extract_strided_slice %298 {offsets = [0, 8], sizes = [8, 8], strides = [1, 1]} : vector<8x24xf32> to vector<8x8xf32>
    %301 = vector.extract_strided_slice %298 {offsets = [0, 16], sizes = [8, 8], strides = [1, 1]} : vector<8x24xf32> to vector<8x8xf32>
    %302 = vector.extract_strided_slice %292 {offsets = [0, 24], sizes = [8, 8], strides = [1, 1]} : vector<8x32xf32> to vector<8x8xf32>
    %303 = math.tanh %302 : vector<8x8xf32>
    %304 = arith.mulf %300, %286 : vector<8x8xf32>
    %305 = arith.mulf %299, %303 : vector<8x8xf32>
    %306 = arith.addf %304, %305 : vector<8x8xf32>
    %307 = math.tanh %306 : vector<8x8xf32>
    %308 = arith.mulf %301, %307 : vector<8x8xf32>
    %c112_85 = arith.constant 112 : index
    %c0_86 = arith.constant 0 : index
    %309 = vector.load %arg12[%c112_85, %c0_86] : memref<320x8xf32, #tpu.memory_space<vmem>>, vector<8x8xf32>
    tpu.vector_store %arg12[%c112_85, %c0_86], %308 {strides = array<i32>} : memref<320x8xf32, #tpu.memory_space<vmem>>, vector<8x8xf32>,
    %c120 = arith.constant 120 : index
    %c0_87 = arith.constant 0 : index
    %310 = vector.load %arg11[%c120, %c0_87] : memref<320x32xf32, #tpu.memory_space<vmem>>, vector<8x32xf32>
    %cst_88 = arith.constant dense<0.000000e+00> : vector<8x32xf32>
    %311 = tpu.matmul %308, %7, %cst_88 {dimension_numbers = #tpu.dot_dimension_numbers<[1], [0], [0], [1], [0, 0, 1, 1], [], []>} : vector<8x8xf32>, vector<8x32xf32>, vector<8x32xf32> -> vector<8x32xf32>
    %312 = arith.addf %310, %311 : vector<8x32xf32>
    %313 = vector.extract_strided_slice %312 {offsets = [0, 0], sizes = [8, 24], strides = [1, 1]} : vector<8x32xf32> to vector<8x24xf32>
    %314 = arith.negf %313 : vector<8x24xf32>
    %315 = math.exp %314 : vector<8x24xf32>
    %cst_89 = arith.constant 1.000000e+00 : f32
    %316 = vector.broadcast %cst_89 : f32 to vector<8x24xf32>
    %317 = arith.addf %316, %315 : vector<8x24xf32>
    %318 = arith.divf %316, %317 : vector<8x24xf32>
    %319 = vector.extract_strided_slice %318 {offsets = [0, 0], sizes = [8, 8], strides = [1, 1]} : vector<8x24xf32> to vector<8x8xf32>
    %320 = vector.extract_strided_slice %318 {offsets = [0, 8], sizes = [8, 8], strides = [1, 1]} : vector<8x24xf32> to vector<8x8xf32>
    %321 = vector.extract_strided_slice %318 {offsets = [0, 16], sizes = [8, 8], strides = [1, 1]} : vector<8x24xf32> to vector<8x8xf32>
    %322 = vector.extract_strided_slice %312 {offsets = [0, 24], sizes = [8, 8], strides = [1, 1]} : vector<8x32xf32> to vector<8x8xf32>
    %323 = math.tanh %322 : vector<8x8xf32>
    %324 = arith.mulf %320, %306 : vector<8x8xf32>
    %325 = arith.mulf %319, %323 : vector<8x8xf32>
    %326 = arith.addf %324, %325 : vector<8x8xf32>
    %327 = math.tanh %326 : vector<8x8xf32>
    %328 = arith.mulf %321, %327 : vector<8x8xf32>
    %c120_90 = arith.constant 120 : index
    %c0_91 = arith.constant 0 : index
    %329 = vector.load %arg12[%c120_90, %c0_91] : memref<320x8xf32, #tpu.memory_space<vmem>>, vector<8x8xf32>
    tpu.vector_store %arg12[%c120_90, %c0_91], %328 {strides = array<i32>} : memref<320x8xf32, #tpu.memory_space<vmem>>, vector<8x8xf32>,
    %c128 = arith.constant 128 : index
    %c0_92 = arith.constant 0 : index
    %330 = vector.load %arg11[%c128, %c0_92] : memref<320x32xf32, #tpu.memory_space<vmem>>, vector<8x32xf32>
    %cst_93 = arith.constant dense<0.000000e+00> : vector<8x32xf32>
    %331 = tpu.matmul %328, %7, %cst_93 {dimension_numbers = #tpu.dot_dimension_numbers<[1], [0], [0], [1], [0, 0, 1, 1], [], []>} : vector<8x8xf32>, vector<8x32xf32>, vector<8x32xf32> -> vector<8x32xf32>
    %332 = arith.addf %330, %331 : vector<8x32xf32>
    %333 = vector.extract_strided_slice %332 {offsets = [0, 0], sizes = [8, 24], strides = [1, 1]} : vector<8x32xf32> to vector<8x24xf32>
    %334 = arith.negf %333 : vector<8x24xf32>
    %335 = math.exp %334 : vector<8x24xf32>
    %cst_94 = arith.constant 1.000000e+00 : f32
    %336 = vector.broadcast %cst_94 : f32 to vector<8x24xf32>
    %337 = arith.addf %336, %335 : vector<8x24xf32>
    %338 = arith.divf %336, %337 : vector<8x24xf32>
    %339 = vector.extract_strided_slice %338 {offsets = [0, 0], sizes = [8, 8], strides = [1, 1]} : vector<8x24xf32> to vector<8x8xf32>
    %340 = vector.extract_strided_slice %338 {offsets = [0, 8], sizes = [8, 8], strides = [1, 1]} : vector<8x24xf32> to vector<8x8xf32>
    %341 = vector.extract_strided_slice %338 {offsets = [0, 16], sizes = [8, 8], strides = [1, 1]} : vector<8x24xf32> to vector<8x8xf32>
    %342 = vector.extract_strided_slice %332 {offsets = [0, 24], sizes = [8, 8], strides = [1, 1]} : vector<8x32xf32> to vector<8x8xf32>
    %343 = math.tanh %342 : vector<8x8xf32>
    %344 = arith.mulf %340, %326 : vector<8x8xf32>
    %345 = arith.mulf %339, %343 : vector<8x8xf32>
    %346 = arith.addf %344, %345 : vector<8x8xf32>
    %347 = math.tanh %346 : vector<8x8xf32>
    %348 = arith.mulf %341, %347 : vector<8x8xf32>
    %c128_95 = arith.constant 128 : index
    %c0_96 = arith.constant 0 : index
    %349 = vector.load %arg12[%c128_95, %c0_96] : memref<320x8xf32, #tpu.memory_space<vmem>>, vector<8x8xf32>
    tpu.vector_store %arg12[%c128_95, %c0_96], %348 {strides = array<i32>} : memref<320x8xf32, #tpu.memory_space<vmem>>, vector<8x8xf32>,
    %c136 = arith.constant 136 : index
    %c0_97 = arith.constant 0 : index
    %350 = vector.load %arg11[%c136, %c0_97] : memref<320x32xf32, #tpu.memory_space<vmem>>, vector<8x32xf32>
    %cst_98 = arith.constant dense<0.000000e+00> : vector<8x32xf32>
    %351 = tpu.matmul %348, %7, %cst_98 {dimension_numbers = #tpu.dot_dimension_numbers<[1], [0], [0], [1], [0, 0, 1, 1], [], []>} : vector<8x8xf32>, vector<8x32xf32>, vector<8x32xf32> -> vector<8x32xf32>
    %352 = arith.addf %350, %351 : vector<8x32xf32>
    %353 = vector.extract_strided_slice %352 {offsets = [0, 0], sizes = [8, 24], strides = [1, 1]} : vector<8x32xf32> to vector<8x24xf32>
    %354 = arith.negf %353 : vector<8x24xf32>
    %355 = math.exp %354 : vector<8x24xf32>
    %cst_99 = arith.constant 1.000000e+00 : f32
    %356 = vector.broadcast %cst_99 : f32 to vector<8x24xf32>
    %357 = arith.addf %356, %355 : vector<8x24xf32>
    %358 = arith.divf %356, %357 : vector<8x24xf32>
    %359 = vector.extract_strided_slice %358 {offsets = [0, 0], sizes = [8, 8], strides = [1, 1]} : vector<8x24xf32> to vector<8x8xf32>
    %360 = vector.extract_strided_slice %358 {offsets = [0, 8], sizes = [8, 8], strides = [1, 1]} : vector<8x24xf32> to vector<8x8xf32>
    %361 = vector.extract_strided_slice %358 {offsets = [0, 16], sizes = [8, 8], strides = [1, 1]} : vector<8x24xf32> to vector<8x8xf32>
    %362 = vector.extract_strided_slice %352 {offsets = [0, 24], sizes = [8, 8], strides = [1, 1]} : vector<8x32xf32> to vector<8x8xf32>
    %363 = math.tanh %362 : vector<8x8xf32>
    %364 = arith.mulf %360, %346 : vector<8x8xf32>
    %365 = arith.mulf %359, %363 : vector<8x8xf32>
    %366 = arith.addf %364, %365 : vector<8x8xf32>
    %367 = math.tanh %366 : vector<8x8xf32>
    %368 = arith.mulf %361, %367 : vector<8x8xf32>
    %c136_100 = arith.constant 136 : index
    %c0_101 = arith.constant 0 : index
    %369 = vector.load %arg12[%c136_100, %c0_101] : memref<320x8xf32, #tpu.memory_space<vmem>>, vector<8x8xf32>
    tpu.vector_store %arg12[%c136_100, %c0_101], %368 {strides = array<i32>} : memref<320x8xf32, #tpu.memory_space<vmem>>, vector<8x8xf32>,
    %c144 = arith.constant 144 : index
    %c0_102 = arith.constant 0 : index
    %370 = vector.load %arg11[%c144, %c0_102] : memref<320x32xf32, #tpu.memory_space<vmem>>, vector<8x32xf32>
    %cst_103 = arith.constant dense<0.000000e+00> : vector<8x32xf32>
    %371 = tpu.matmul %368, %7, %cst_103 {dimension_numbers = #tpu.dot_dimension_numbers<[1], [0], [0], [1], [0, 0, 1, 1], [], []>} : vector<8x8xf32>, vector<8x32xf32>, vector<8x32xf32> -> vector<8x32xf32>
    %372 = arith.addf %370, %371 : vector<8x32xf32>
    %373 = vector.extract_strided_slice %372 {offsets = [0, 0], sizes = [8, 24], strides = [1, 1]} : vector<8x32xf32> to vector<8x24xf32>
    %374 = arith.negf %373 : vector<8x24xf32>
    %375 = math.exp %374 : vector<8x24xf32>
    %cst_104 = arith.constant 1.000000e+00 : f32
    %376 = vector.broadcast %cst_104 : f32 to vector<8x24xf32>
    %377 = arith.addf %376, %375 : vector<8x24xf32>
    %378 = arith.divf %376, %377 : vector<8x24xf32>
    %379 = vector.extract_strided_slice %378 {offsets = [0, 0], sizes = [8, 8], strides = [1, 1]} : vector<8x24xf32> to vector<8x8xf32>
    %380 = vector.extract_strided_slice %378 {offsets = [0, 8], sizes = [8, 8], strides = [1, 1]} : vector<8x24xf32> to vector<8x8xf32>
    %381 = vector.extract_strided_slice %378 {offsets = [0, 16], sizes = [8, 8], strides = [1, 1]} : vector<8x24xf32> to vector<8x8xf32>
    %382 = vector.extract_strided_slice %372 {offsets = [0, 24], sizes = [8, 8], strides = [1, 1]} : vector<8x32xf32> to vector<8x8xf32>
    %383 = math.tanh %382 : vector<8x8xf32>
    %384 = arith.mulf %380, %366 : vector<8x8xf32>
    %385 = arith.mulf %379, %383 : vector<8x8xf32>
    %386 = arith.addf %384, %385 : vector<8x8xf32>
    %387 = math.tanh %386 : vector<8x8xf32>
    %388 = arith.mulf %381, %387 : vector<8x8xf32>
    %c144_105 = arith.constant 144 : index
    %c0_106 = arith.constant 0 : index
    %389 = vector.load %arg12[%c144_105, %c0_106] : memref<320x8xf32, #tpu.memory_space<vmem>>, vector<8x8xf32>
    tpu.vector_store %arg12[%c144_105, %c0_106], %388 {strides = array<i32>} : memref<320x8xf32, #tpu.memory_space<vmem>>, vector<8x8xf32>,
    %c152 = arith.constant 152 : index
    %c0_107 = arith.constant 0 : index
    %390 = vector.load %arg11[%c152, %c0_107] : memref<320x32xf32, #tpu.memory_space<vmem>>, vector<8x32xf32>
    %cst_108 = arith.constant dense<0.000000e+00> : vector<8x32xf32>
    %391 = tpu.matmul %388, %7, %cst_108 {dimension_numbers = #tpu.dot_dimension_numbers<[1], [0], [0], [1], [0, 0, 1, 1], [], []>} : vector<8x8xf32>, vector<8x32xf32>, vector<8x32xf32> -> vector<8x32xf32>
    %392 = arith.addf %390, %391 : vector<8x32xf32>
    %393 = vector.extract_strided_slice %392 {offsets = [0, 0], sizes = [8, 24], strides = [1, 1]} : vector<8x32xf32> to vector<8x24xf32>
    %394 = arith.negf %393 : vector<8x24xf32>
    %395 = math.exp %394 : vector<8x24xf32>
    %cst_109 = arith.constant 1.000000e+00 : f32
    %396 = vector.broadcast %cst_109 : f32 to vector<8x24xf32>
    %397 = arith.addf %396, %395 : vector<8x24xf32>
    %398 = arith.divf %396, %397 : vector<8x24xf32>
    %399 = vector.extract_strided_slice %398 {offsets = [0, 0], sizes = [8, 8], strides = [1, 1]} : vector<8x24xf32> to vector<8x8xf32>
    %400 = vector.extract_strided_slice %398 {offsets = [0, 8], sizes = [8, 8], strides = [1, 1]} : vector<8x24xf32> to vector<8x8xf32>
    %401 = vector.extract_strided_slice %398 {offsets = [0, 16], sizes = [8, 8], strides = [1, 1]} : vector<8x24xf32> to vector<8x8xf32>
    %402 = vector.extract_strided_slice %392 {offsets = [0, 24], sizes = [8, 8], strides = [1, 1]} : vector<8x32xf32> to vector<8x8xf32>
    %403 = math.tanh %402 : vector<8x8xf32>
    %404 = arith.mulf %400, %386 : vector<8x8xf32>
    %405 = arith.mulf %399, %403 : vector<8x8xf32>
    %406 = arith.addf %404, %405 : vector<8x8xf32>
    %407 = math.tanh %406 : vector<8x8xf32>
    %408 = arith.mulf %401, %407 : vector<8x8xf32>
    %c152_110 = arith.constant 152 : index
    %c0_111 = arith.constant 0 : index
    %409 = vector.load %arg12[%c152_110, %c0_111] : memref<320x8xf32, #tpu.memory_space<vmem>>, vector<8x8xf32>
    tpu.vector_store %arg12[%c152_110, %c0_111], %408 {strides = array<i32>} : memref<320x8xf32, #tpu.memory_space<vmem>>, vector<8x8xf32>,
    %c160 = arith.constant 160 : index
    %c0_112 = arith.constant 0 : index
    %410 = vector.load %arg11[%c160, %c0_112] : memref<320x32xf32, #tpu.memory_space<vmem>>, vector<8x32xf32>
    %cst_113 = arith.constant dense<0.000000e+00> : vector<8x32xf32>
    %411 = tpu.matmul %408, %7, %cst_113 {dimension_numbers = #tpu.dot_dimension_numbers<[1], [0], [0], [1], [0, 0, 1, 1], [], []>} : vector<8x8xf32>, vector<8x32xf32>, vector<8x32xf32> -> vector<8x32xf32>
    %412 = arith.addf %410, %411 : vector<8x32xf32>
    %413 = vector.extract_strided_slice %412 {offsets = [0, 0], sizes = [8, 24], strides = [1, 1]} : vector<8x32xf32> to vector<8x24xf32>
    %414 = arith.negf %413 : vector<8x24xf32>
    %415 = math.exp %414 : vector<8x24xf32>
    %cst_114 = arith.constant 1.000000e+00 : f32
    %416 = vector.broadcast %cst_114 : f32 to vector<8x24xf32>
    %417 = arith.addf %416, %415 : vector<8x24xf32>
    %418 = arith.divf %416, %417 : vector<8x24xf32>
    %419 = vector.extract_strided_slice %418 {offsets = [0, 0], sizes = [8, 8], strides = [1, 1]} : vector<8x24xf32> to vector<8x8xf32>
    %420 = vector.extract_strided_slice %418 {offsets = [0, 8], sizes = [8, 8], strides = [1, 1]} : vector<8x24xf32> to vector<8x8xf32>
    %421 = vector.extract_strided_slice %418 {offsets = [0, 16], sizes = [8, 8], strides = [1, 1]} : vector<8x24xf32> to vector<8x8xf32>
    %422 = vector.extract_strided_slice %412 {offsets = [0, 24], sizes = [8, 8], strides = [1, 1]} : vector<8x32xf32> to vector<8x8xf32>
    %423 = math.tanh %422 : vector<8x8xf32>
    %424 = arith.mulf %420, %406 : vector<8x8xf32>
    %425 = arith.mulf %419, %423 : vector<8x8xf32>
    %426 = arith.addf %424, %425 : vector<8x8xf32>
    %427 = math.tanh %426 : vector<8x8xf32>
    %428 = arith.mulf %421, %427 : vector<8x8xf32>
    %c160_115 = arith.constant 160 : index
    %c0_116 = arith.constant 0 : index
    %429 = vector.load %arg12[%c160_115, %c0_116] : memref<320x8xf32, #tpu.memory_space<vmem>>, vector<8x8xf32>
    tpu.vector_store %arg12[%c160_115, %c0_116], %428 {strides = array<i32>} : memref<320x8xf32, #tpu.memory_space<vmem>>, vector<8x8xf32>,
    %c168 = arith.constant 168 : index
    %c0_117 = arith.constant 0 : index
    %430 = vector.load %arg11[%c168, %c0_117] : memref<320x32xf32, #tpu.memory_space<vmem>>, vector<8x32xf32>
    %cst_118 = arith.constant dense<0.000000e+00> : vector<8x32xf32>
    %431 = tpu.matmul %428, %7, %cst_118 {dimension_numbers = #tpu.dot_dimension_numbers<[1], [0], [0], [1], [0, 0, 1, 1], [], []>} : vector<8x8xf32>, vector<8x32xf32>, vector<8x32xf32> -> vector<8x32xf32>
    %432 = arith.addf %430, %431 : vector<8x32xf32>
    %433 = vector.extract_strided_slice %432 {offsets = [0, 0], sizes = [8, 24], strides = [1, 1]} : vector<8x32xf32> to vector<8x24xf32>
    %434 = arith.negf %433 : vector<8x24xf32>
    %435 = math.exp %434 : vector<8x24xf32>
    %cst_119 = arith.constant 1.000000e+00 : f32
    %436 = vector.broadcast %cst_119 : f32 to vector<8x24xf32>
    %437 = arith.addf %436, %435 : vector<8x24xf32>
    %438 = arith.divf %436, %437 : vector<8x24xf32>
    %439 = vector.extract_strided_slice %438 {offsets = [0, 0], sizes = [8, 8], strides = [1, 1]} : vector<8x24xf32> to vector<8x8xf32>
    %440 = vector.extract_strided_slice %438 {offsets = [0, 8], sizes = [8, 8], strides = [1, 1]} : vector<8x24xf32> to vector<8x8xf32>
    %441 = vector.extract_strided_slice %438 {offsets = [0, 16], sizes = [8, 8], strides = [1, 1]} : vector<8x24xf32> to vector<8x8xf32>
    %442 = vector.extract_strided_slice %432 {offsets = [0, 24], sizes = [8, 8], strides = [1, 1]} : vector<8x32xf32> to vector<8x8xf32>
    %443 = math.tanh %442 : vector<8x8xf32>
    %444 = arith.mulf %440, %426 : vector<8x8xf32>
    %445 = arith.mulf %439, %443 : vector<8x8xf32>
    %446 = arith.addf %444, %445 : vector<8x8xf32>
    %447 = math.tanh %446 : vector<8x8xf32>
    %448 = arith.mulf %441, %447 : vector<8x8xf32>
    %c168_120 = arith.constant 168 : index
    %c0_121 = arith.constant 0 : index
    %449 = vector.load %arg12[%c168_120, %c0_121] : memref<320x8xf32, #tpu.memory_space<vmem>>, vector<8x8xf32>
    tpu.vector_store %arg12[%c168_120, %c0_121], %448 {strides = array<i32>} : memref<320x8xf32, #tpu.memory_space<vmem>>, vector<8x8xf32>,
    %c176 = arith.constant 176 : index
    %c0_122 = arith.constant 0 : index
    %450 = vector.load %arg11[%c176, %c0_122] : memref<320x32xf32, #tpu.memory_space<vmem>>, vector<8x32xf32>
    %cst_123 = arith.constant dense<0.000000e+00> : vector<8x32xf32>
    %451 = tpu.matmul %448, %7, %cst_123 {dimension_numbers = #tpu.dot_dimension_numbers<[1], [0], [0], [1], [0, 0, 1, 1], [], []>} : vector<8x8xf32>, vector<8x32xf32>, vector<8x32xf32> -> vector<8x32xf32>
    %452 = arith.addf %450, %451 : vector<8x32xf32>
    %453 = vector.extract_strided_slice %452 {offsets = [0, 0], sizes = [8, 24], strides = [1, 1]} : vector<8x32xf32> to vector<8x24xf32>
    %454 = arith.negf %453 : vector<8x24xf32>
    %455 = math.exp %454 : vector<8x24xf32>
    %cst_124 = arith.constant 1.000000e+00 : f32
    %456 = vector.broadcast %cst_124 : f32 to vector<8x24xf32>
    %457 = arith.addf %456, %455 : vector<8x24xf32>
    %458 = arith.divf %456, %457 : vector<8x24xf32>
    %459 = vector.extract_strided_slice %458 {offsets = [0, 0], sizes = [8, 8], strides = [1, 1]} : vector<8x24xf32> to vector<8x8xf32>
    %460 = vector.extract_strided_slice %458 {offsets = [0, 8], sizes = [8, 8], strides = [1, 1]} : vector<8x24xf32> to vector<8x8xf32>
    %461 = vector.extract_strided_slice %458 {offsets = [0, 16], sizes = [8, 8], strides = [1, 1]} : vector<8x24xf32> to vector<8x8xf32>
    %462 = vector.extract_strided_slice %452 {offsets = [0, 24], sizes = [8, 8], strides = [1, 1]} : vector<8x32xf32> to vector<8x8xf32>
    %463 = math.tanh %462 : vector<8x8xf32>
    %464 = arith.mulf %460, %446 : vector<8x8xf32>
    %465 = arith.mulf %459, %463 : vector<8x8xf32>
    %466 = arith.addf %464, %465 : vector<8x8xf32>
    %467 = math.tanh %466 : vector<8x8xf32>
    %468 = arith.mulf %461, %467 : vector<8x8xf32>
    %c176_125 = arith.constant 176 : index
    %c0_126 = arith.constant 0 : index
    %469 = vector.load %arg12[%c176_125, %c0_126] : memref<320x8xf32, #tpu.memory_space<vmem>>, vector<8x8xf32>
    tpu.vector_store %arg12[%c176_125, %c0_126], %468 {strides = array<i32>} : memref<320x8xf32, #tpu.memory_space<vmem>>, vector<8x8xf32>,
    %c184 = arith.constant 184 : index
    %c0_127 = arith.constant 0 : index
    %470 = vector.load %arg11[%c184, %c0_127] : memref<320x32xf32, #tpu.memory_space<vmem>>, vector<8x32xf32>
    %cst_128 = arith.constant dense<0.000000e+00> : vector<8x32xf32>
    %471 = tpu.matmul %468, %7, %cst_128 {dimension_numbers = #tpu.dot_dimension_numbers<[1], [0], [0], [1], [0, 0, 1, 1], [], []>} : vector<8x8xf32>, vector<8x32xf32>, vector<8x32xf32> -> vector<8x32xf32>
    %472 = arith.addf %470, %471 : vector<8x32xf32>
    %473 = vector.extract_strided_slice %472 {offsets = [0, 0], sizes = [8, 24], strides = [1, 1]} : vector<8x32xf32> to vector<8x24xf32>
    %474 = arith.negf %473 : vector<8x24xf32>
    %475 = math.exp %474 : vector<8x24xf32>
    %cst_129 = arith.constant 1.000000e+00 : f32
    %476 = vector.broadcast %cst_129 : f32 to vector<8x24xf32>
    %477 = arith.addf %476, %475 : vector<8x24xf32>
    %478 = arith.divf %476, %477 : vector<8x24xf32>
    %479 = vector.extract_strided_slice %478 {offsets = [0, 0], sizes = [8, 8], strides = [1, 1]} : vector<8x24xf32> to vector<8x8xf32>
    %480 = vector.extract_strided_slice %478 {offsets = [0, 8], sizes = [8, 8], strides = [1, 1]} : vector<8x24xf32> to vector<8x8xf32>
    %481 = vector.extract_strided_slice %478 {offsets = [0, 16], sizes = [8, 8], strides = [1, 1]} : vector<8x24xf32> to vector<8x8xf32>
    %482 = vector.extract_strided_slice %472 {offsets = [0, 24], sizes = [8, 8], strides = [1, 1]} : vector<8x32xf32> to vector<8x8xf32>
    %483 = math.tanh %482 : vector<8x8xf32>
    %484 = arith.mulf %480, %466 : vector<8x8xf32>
    %485 = arith.mulf %479, %483 : vector<8x8xf32>
    %486 = arith.addf %484, %485 : vector<8x8xf32>
    %487 = math.tanh %486 : vector<8x8xf32>
    %488 = arith.mulf %481, %487 : vector<8x8xf32>
    %c184_130 = arith.constant 184 : index
    %c0_131 = arith.constant 0 : index
    %489 = vector.load %arg12[%c184_130, %c0_131] : memref<320x8xf32, #tpu.memory_space<vmem>>, vector<8x8xf32>
    tpu.vector_store %arg12[%c184_130, %c0_131], %488 {strides = array<i32>} : memref<320x8xf32, #tpu.memory_space<vmem>>, vector<8x8xf32>,
    %c192 = arith.constant 192 : index
    %c0_132 = arith.constant 0 : index
    %490 = vector.load %arg11[%c192, %c0_132] : memref<320x32xf32, #tpu.memory_space<vmem>>, vector<8x32xf32>
    %cst_133 = arith.constant dense<0.000000e+00> : vector<8x32xf32>
    %491 = tpu.matmul %488, %7, %cst_133 {dimension_numbers = #tpu.dot_dimension_numbers<[1], [0], [0], [1], [0, 0, 1, 1], [], []>} : vector<8x8xf32>, vector<8x32xf32>, vector<8x32xf32> -> vector<8x32xf32>
    %492 = arith.addf %490, %491 : vector<8x32xf32>
    %493 = vector.extract_strided_slice %492 {offsets = [0, 0], sizes = [8, 24], strides = [1, 1]} : vector<8x32xf32> to vector<8x24xf32>
    %494 = arith.negf %493 : vector<8x24xf32>
    %495 = math.exp %494 : vector<8x24xf32>
    %cst_134 = arith.constant 1.000000e+00 : f32
    %496 = vector.broadcast %cst_134 : f32 to vector<8x24xf32>
    %497 = arith.addf %496, %495 : vector<8x24xf32>
    %498 = arith.divf %496, %497 : vector<8x24xf32>
    %499 = vector.extract_strided_slice %498 {offsets = [0, 0], sizes = [8, 8], strides = [1, 1]} : vector<8x24xf32> to vector<8x8xf32>
    %500 = vector.extract_strided_slice %498 {offsets = [0, 8], sizes = [8, 8], strides = [1, 1]} : vector<8x24xf32> to vector<8x8xf32>
    %501 = vector.extract_strided_slice %498 {offsets = [0, 16], sizes = [8, 8], strides = [1, 1]} : vector<8x24xf32> to vector<8x8xf32>
    %502 = vector.extract_strided_slice %492 {offsets = [0, 24], sizes = [8, 8], strides = [1, 1]} : vector<8x32xf32> to vector<8x8xf32>
    %503 = math.tanh %502 : vector<8x8xf32>
    %504 = arith.mulf %500, %486 : vector<8x8xf32>
    %505 = arith.mulf %499, %503 : vector<8x8xf32>
    %506 = arith.addf %504, %505 : vector<8x8xf32>
    %507 = math.tanh %506 : vector<8x8xf32>
    %508 = arith.mulf %501, %507 : vector<8x8xf32>
    %c192_135 = arith.constant 192 : index
    %c0_136 = arith.constant 0 : index
    %509 = vector.load %arg12[%c192_135, %c0_136] : memref<320x8xf32, #tpu.memory_space<vmem>>, vector<8x8xf32>
    tpu.vector_store %arg12[%c192_135, %c0_136], %508 {strides = array<i32>} : memref<320x8xf32, #tpu.memory_space<vmem>>, vector<8x8xf32>,
    %c200 = arith.constant 200 : index
    %c0_137 = arith.constant 0 : index
    %510 = vector.load %arg11[%c200, %c0_137] : memref<320x32xf32, #tpu.memory_space<vmem>>, vector<8x32xf32>
    %cst_138 = arith.constant dense<0.000000e+00> : vector<8x32xf32>
    %511 = tpu.matmul %508, %7, %cst_138 {dimension_numbers = #tpu.dot_dimension_numbers<[1], [0], [0], [1], [0, 0, 1, 1], [], []>} : vector<8x8xf32>, vector<8x32xf32>, vector<8x32xf32> -> vector<8x32xf32>
    %512 = arith.addf %510, %511 : vector<8x32xf32>
    %513 = vector.extract_strided_slice %512 {offsets = [0, 0], sizes = [8, 24], strides = [1, 1]} : vector<8x32xf32> to vector<8x24xf32>
    %514 = arith.negf %513 : vector<8x24xf32>
    %515 = math.exp %514 : vector<8x24xf32>
    %cst_139 = arith.constant 1.000000e+00 : f32
    %516 = vector.broadcast %cst_139 : f32 to vector<8x24xf32>
    %517 = arith.addf %516, %515 : vector<8x24xf32>
    %518 = arith.divf %516, %517 : vector<8x24xf32>
    %519 = vector.extract_strided_slice %518 {offsets = [0, 0], sizes = [8, 8], strides = [1, 1]} : vector<8x24xf32> to vector<8x8xf32>
    %520 = vector.extract_strided_slice %518 {offsets = [0, 8], sizes = [8, 8], strides = [1, 1]} : vector<8x24xf32> to vector<8x8xf32>
    %521 = vector.extract_strided_slice %518 {offsets = [0, 16], sizes = [8, 8], strides = [1, 1]} : vector<8x24xf32> to vector<8x8xf32>
    %522 = vector.extract_strided_slice %512 {offsets = [0, 24], sizes = [8, 8], strides = [1, 1]} : vector<8x32xf32> to vector<8x8xf32>
    %523 = math.tanh %522 : vector<8x8xf32>
    %524 = arith.mulf %520, %506 : vector<8x8xf32>
    %525 = arith.mulf %519, %523 : vector<8x8xf32>
    %526 = arith.addf %524, %525 : vector<8x8xf32>
    %527 = math.tanh %526 : vector<8x8xf32>
    %528 = arith.mulf %521, %527 : vector<8x8xf32>
    %c200_140 = arith.constant 200 : index
    %c0_141 = arith.constant 0 : index
    %529 = vector.load %arg12[%c200_140, %c0_141] : memref<320x8xf32, #tpu.memory_space<vmem>>, vector<8x8xf32>
    tpu.vector_store %arg12[%c200_140, %c0_141], %528 {strides = array<i32>} : memref<320x8xf32, #tpu.memory_space<vmem>>, vector<8x8xf32>,
    %c208 = arith.constant 208 : index
    %c0_142 = arith.constant 0 : index
    %530 = vector.load %arg11[%c208, %c0_142] : memref<320x32xf32, #tpu.memory_space<vmem>>, vector<8x32xf32>
    %cst_143 = arith.constant dense<0.000000e+00> : vector<8x32xf32>
    %531 = tpu.matmul %528, %7, %cst_143 {dimension_numbers = #tpu.dot_dimension_numbers<[1], [0], [0], [1], [0, 0, 1, 1], [], []>} : vector<8x8xf32>, vector<8x32xf32>, vector<8x32xf32> -> vector<8x32xf32>
    %532 = arith.addf %530, %531 : vector<8x32xf32>
    %533 = vector.extract_strided_slice %532 {offsets = [0, 0], sizes = [8, 24], strides = [1, 1]} : vector<8x32xf32> to vector<8x24xf32>
    %534 = arith.negf %533 : vector<8x24xf32>
    %535 = math.exp %534 : vector<8x24xf32>
    %cst_144 = arith.constant 1.000000e+00 : f32
    %536 = vector.broadcast %cst_144 : f32 to vector<8x24xf32>
    %537 = arith.addf %536, %535 : vector<8x24xf32>
    %538 = arith.divf %536, %537 : vector<8x24xf32>
    %539 = vector.extract_strided_slice %538 {offsets = [0, 0], sizes = [8, 8], strides = [1, 1]} : vector<8x24xf32> to vector<8x8xf32>
    %540 = vector.extract_strided_slice %538 {offsets = [0, 8], sizes = [8, 8], strides = [1, 1]} : vector<8x24xf32> to vector<8x8xf32>
    %541 = vector.extract_strided_slice %538 {offsets = [0, 16], sizes = [8, 8], strides = [1, 1]} : vector<8x24xf32> to vector<8x8xf32>
    %542 = vector.extract_strided_slice %532 {offsets = [0, 24], sizes = [8, 8], strides = [1, 1]} : vector<8x32xf32> to vector<8x8xf32>
    %543 = math.tanh %542 : vector<8x8xf32>
    %544 = arith.mulf %540, %526 : vector<8x8xf32>
    %545 = arith.mulf %539, %543 : vector<8x8xf32>
    %546 = arith.addf %544, %545 : vector<8x8xf32>
    %547 = math.tanh %546 : vector<8x8xf32>
    %548 = arith.mulf %541, %547 : vector<8x8xf32>
    %c208_145 = arith.constant 208 : index
    %c0_146 = arith.constant 0 : index
    %549 = vector.load %arg12[%c208_145, %c0_146] : memref<320x8xf32, #tpu.memory_space<vmem>>, vector<8x8xf32>
    tpu.vector_store %arg12[%c208_145, %c0_146], %548 {strides = array<i32>} : memref<320x8xf32, #tpu.memory_space<vmem>>, vector<8x8xf32>,
    %c216 = arith.constant 216 : index
    %c0_147 = arith.constant 0 : index
    %550 = vector.load %arg11[%c216, %c0_147] : memref<320x32xf32, #tpu.memory_space<vmem>>, vector<8x32xf32>
    %cst_148 = arith.constant dense<0.000000e+00> : vector<8x32xf32>
    %551 = tpu.matmul %548, %7, %cst_148 {dimension_numbers = #tpu.dot_dimension_numbers<[1], [0], [0], [1], [0, 0, 1, 1], [], []>} : vector<8x8xf32>, vector<8x32xf32>, vector<8x32xf32> -> vector<8x32xf32>
    %552 = arith.addf %550, %551 : vector<8x32xf32>
    %553 = vector.extract_strided_slice %552 {offsets = [0, 0], sizes = [8, 24], strides = [1, 1]} : vector<8x32xf32> to vector<8x24xf32>
    %554 = arith.negf %553 : vector<8x24xf32>
    %555 = math.exp %554 : vector<8x24xf32>
    %cst_149 = arith.constant 1.000000e+00 : f32
    %556 = vector.broadcast %cst_149 : f32 to vector<8x24xf32>
    %557 = arith.addf %556, %555 : vector<8x24xf32>
    %558 = arith.divf %556, %557 : vector<8x24xf32>
    %559 = vector.extract_strided_slice %558 {offsets = [0, 0], sizes = [8, 8], strides = [1, 1]} : vector<8x24xf32> to vector<8x8xf32>
    %560 = vector.extract_strided_slice %558 {offsets = [0, 8], sizes = [8, 8], strides = [1, 1]} : vector<8x24xf32> to vector<8x8xf32>
    %561 = vector.extract_strided_slice %558 {offsets = [0, 16], sizes = [8, 8], strides = [1, 1]} : vector<8x24xf32> to vector<8x8xf32>
    %562 = vector.extract_strided_slice %552 {offsets = [0, 24], sizes = [8, 8], strides = [1, 1]} : vector<8x32xf32> to vector<8x8xf32>
    %563 = math.tanh %562 : vector<8x8xf32>
    %564 = arith.mulf %560, %546 : vector<8x8xf32>
    %565 = arith.mulf %559, %563 : vector<8x8xf32>
    %566 = arith.addf %564, %565 : vector<8x8xf32>
    %567 = math.tanh %566 : vector<8x8xf32>
    %568 = arith.mulf %561, %567 : vector<8x8xf32>
    %c216_150 = arith.constant 216 : index
    %c0_151 = arith.constant 0 : index
    %569 = vector.load %arg12[%c216_150, %c0_151] : memref<320x8xf32, #tpu.memory_space<vmem>>, vector<8x8xf32>
    tpu.vector_store %arg12[%c216_150, %c0_151], %568 {strides = array<i32>} : memref<320x8xf32, #tpu.memory_space<vmem>>, vector<8x8xf32>,
    %c224 = arith.constant 224 : index
    %c0_152 = arith.constant 0 : index
    %570 = vector.load %arg11[%c224, %c0_152] : memref<320x32xf32, #tpu.memory_space<vmem>>, vector<8x32xf32>
    %cst_153 = arith.constant dense<0.000000e+00> : vector<8x32xf32>
    %571 = tpu.matmul %568, %7, %cst_153 {dimension_numbers = #tpu.dot_dimension_numbers<[1], [0], [0], [1], [0, 0, 1, 1], [], []>} : vector<8x8xf32>, vector<8x32xf32>, vector<8x32xf32> -> vector<8x32xf32>
    %572 = arith.addf %570, %571 : vector<8x32xf32>
    %573 = vector.extract_strided_slice %572 {offsets = [0, 0], sizes = [8, 24], strides = [1, 1]} : vector<8x32xf32> to vector<8x24xf32>
    %574 = arith.negf %573 : vector<8x24xf32>
    %575 = math.exp %574 : vector<8x24xf32>
    %cst_154 = arith.constant 1.000000e+00 : f32
    %576 = vector.broadcast %cst_154 : f32 to vector<8x24xf32>
    %577 = arith.addf %576, %575 : vector<8x24xf32>
    %578 = arith.divf %576, %577 : vector<8x24xf32>
    %579 = vector.extract_strided_slice %578 {offsets = [0, 0], sizes = [8, 8], strides = [1, 1]} : vector<8x24xf32> to vector<8x8xf32>
    %580 = vector.extract_strided_slice %578 {offsets = [0, 8], sizes = [8, 8], strides = [1, 1]} : vector<8x24xf32> to vector<8x8xf32>
    %581 = vector.extract_strided_slice %578 {offsets = [0, 16], sizes = [8, 8], strides = [1, 1]} : vector<8x24xf32> to vector<8x8xf32>
    %582 = vector.extract_strided_slice %572 {offsets = [0, 24], sizes = [8, 8], strides = [1, 1]} : vector<8x32xf32> to vector<8x8xf32>
    %583 = math.tanh %582 : vector<8x8xf32>
    %584 = arith.mulf %580, %566 : vector<8x8xf32>
    %585 = arith.mulf %579, %583 : vector<8x8xf32>
    %586 = arith.addf %584, %585 : vector<8x8xf32>
    %587 = math.tanh %586 : vector<8x8xf32>
    %588 = arith.mulf %581, %587 : vector<8x8xf32>
    %c224_155 = arith.constant 224 : index
    %c0_156 = arith.constant 0 : index
    %589 = vector.load %arg12[%c224_155, %c0_156] : memref<320x8xf32, #tpu.memory_space<vmem>>, vector<8x8xf32>
    tpu.vector_store %arg12[%c224_155, %c0_156], %588 {strides = array<i32>} : memref<320x8xf32, #tpu.memory_space<vmem>>, vector<8x8xf32>,
    %c232 = arith.constant 232 : index
    %c0_157 = arith.constant 0 : index
    %590 = vector.load %arg11[%c232, %c0_157] : memref<320x32xf32, #tpu.memory_space<vmem>>, vector<8x32xf32>
    %cst_158 = arith.constant dense<0.000000e+00> : vector<8x32xf32>
    %591 = tpu.matmul %588, %7, %cst_158 {dimension_numbers = #tpu.dot_dimension_numbers<[1], [0], [0], [1], [0, 0, 1, 1], [], []>} : vector<8x8xf32>, vector<8x32xf32>, vector<8x32xf32> -> vector<8x32xf32>
    %592 = arith.addf %590, %591 : vector<8x32xf32>
    %593 = vector.extract_strided_slice %592 {offsets = [0, 0], sizes = [8, 24], strides = [1, 1]} : vector<8x32xf32> to vector<8x24xf32>
    %594 = arith.negf %593 : vector<8x24xf32>
    %595 = math.exp %594 : vector<8x24xf32>
    %cst_159 = arith.constant 1.000000e+00 : f32
    %596 = vector.broadcast %cst_159 : f32 to vector<8x24xf32>
    %597 = arith.addf %596, %595 : vector<8x24xf32>
    %598 = arith.divf %596, %597 : vector<8x24xf32>
    %599 = vector.extract_strided_slice %598 {offsets = [0, 0], sizes = [8, 8], strides = [1, 1]} : vector<8x24xf32> to vector<8x8xf32>
    %600 = vector.extract_strided_slice %598 {offsets = [0, 8], sizes = [8, 8], strides = [1, 1]} : vector<8x24xf32> to vector<8x8xf32>
    %601 = vector.extract_strided_slice %598 {offsets = [0, 16], sizes = [8, 8], strides = [1, 1]} : vector<8x24xf32> to vector<8x8xf32>
    %602 = vector.extract_strided_slice %592 {offsets = [0, 24], sizes = [8, 8], strides = [1, 1]} : vector<8x32xf32> to vector<8x8xf32>
    %603 = math.tanh %602 : vector<8x8xf32>
    %604 = arith.mulf %600, %586 : vector<8x8xf32>
    %605 = arith.mulf %599, %603 : vector<8x8xf32>
    %606 = arith.addf %604, %605 : vector<8x8xf32>
    %607 = math.tanh %606 : vector<8x8xf32>
    %608 = arith.mulf %601, %607 : vector<8x8xf32>
    %c232_160 = arith.constant 232 : index
    %c0_161 = arith.constant 0 : index
    %609 = vector.load %arg12[%c232_160, %c0_161] : memref<320x8xf32, #tpu.memory_space<vmem>>, vector<8x8xf32>
    tpu.vector_store %arg12[%c232_160, %c0_161], %608 {strides = array<i32>} : memref<320x8xf32, #tpu.memory_space<vmem>>, vector<8x8xf32>,
    %c240 = arith.constant 240 : index
    %c0_162 = arith.constant 0 : index
    %610 = vector.load %arg11[%c240, %c0_162] : memref<320x32xf32, #tpu.memory_space<vmem>>, vector<8x32xf32>
    %cst_163 = arith.constant dense<0.000000e+00> : vector<8x32xf32>
    %611 = tpu.matmul %608, %7, %cst_163 {dimension_numbers = #tpu.dot_dimension_numbers<[1], [0], [0], [1], [0, 0, 1, 1], [], []>} : vector<8x8xf32>, vector<8x32xf32>, vector<8x32xf32> -> vector<8x32xf32>
    %612 = arith.addf %610, %611 : vector<8x32xf32>
    %613 = vector.extract_strided_slice %612 {offsets = [0, 0], sizes = [8, 24], strides = [1, 1]} : vector<8x32xf32> to vector<8x24xf32>
    %614 = arith.negf %613 : vector<8x24xf32>
    %615 = math.exp %614 : vector<8x24xf32>
    %cst_164 = arith.constant 1.000000e+00 : f32
    %616 = vector.broadcast %cst_164 : f32 to vector<8x24xf32>
    %617 = arith.addf %616, %615 : vector<8x24xf32>
    %618 = arith.divf %616, %617 : vector<8x24xf32>
    %619 = vector.extract_strided_slice %618 {offsets = [0, 0], sizes = [8, 8], strides = [1, 1]} : vector<8x24xf32> to vector<8x8xf32>
    %620 = vector.extract_strided_slice %618 {offsets = [0, 8], sizes = [8, 8], strides = [1, 1]} : vector<8x24xf32> to vector<8x8xf32>
    %621 = vector.extract_strided_slice %618 {offsets = [0, 16], sizes = [8, 8], strides = [1, 1]} : vector<8x24xf32> to vector<8x8xf32>
    %622 = vector.extract_strided_slice %612 {offsets = [0, 24], sizes = [8, 8], strides = [1, 1]} : vector<8x32xf32> to vector<8x8xf32>
    %623 = math.tanh %622 : vector<8x8xf32>
    %624 = arith.mulf %620, %606 : vector<8x8xf32>
    %625 = arith.mulf %619, %623 : vector<8x8xf32>
    %626 = arith.addf %624, %625 : vector<8x8xf32>
    %627 = math.tanh %626 : vector<8x8xf32>
    %628 = arith.mulf %621, %627 : vector<8x8xf32>
    %c240_165 = arith.constant 240 : index
    %c0_166 = arith.constant 0 : index
    %629 = vector.load %arg12[%c240_165, %c0_166] : memref<320x8xf32, #tpu.memory_space<vmem>>, vector<8x8xf32>
    tpu.vector_store %arg12[%c240_165, %c0_166], %628 {strides = array<i32>} : memref<320x8xf32, #tpu.memory_space<vmem>>, vector<8x8xf32>,
    %c248 = arith.constant 248 : index
    %c0_167 = arith.constant 0 : index
    %630 = vector.load %arg11[%c248, %c0_167] : memref<320x32xf32, #tpu.memory_space<vmem>>, vector<8x32xf32>
    %cst_168 = arith.constant dense<0.000000e+00> : vector<8x32xf32>
    %631 = tpu.matmul %628, %7, %cst_168 {dimension_numbers = #tpu.dot_dimension_numbers<[1], [0], [0], [1], [0, 0, 1, 1], [], []>} : vector<8x8xf32>, vector<8x32xf32>, vector<8x32xf32> -> vector<8x32xf32>
    %632 = arith.addf %630, %631 : vector<8x32xf32>
    %633 = vector.extract_strided_slice %632 {offsets = [0, 0], sizes = [8, 24], strides = [1, 1]} : vector<8x32xf32> to vector<8x24xf32>
    %634 = arith.negf %633 : vector<8x24xf32>
    %635 = math.exp %634 : vector<8x24xf32>
    %cst_169 = arith.constant 1.000000e+00 : f32
    %636 = vector.broadcast %cst_169 : f32 to vector<8x24xf32>
    %637 = arith.addf %636, %635 : vector<8x24xf32>
    %638 = arith.divf %636, %637 : vector<8x24xf32>
    %639 = vector.extract_strided_slice %638 {offsets = [0, 0], sizes = [8, 8], strides = [1, 1]} : vector<8x24xf32> to vector<8x8xf32>
    %640 = vector.extract_strided_slice %638 {offsets = [0, 8], sizes = [8, 8], strides = [1, 1]} : vector<8x24xf32> to vector<8x8xf32>
    %641 = vector.extract_strided_slice %638 {offsets = [0, 16], sizes = [8, 8], strides = [1, 1]} : vector<8x24xf32> to vector<8x8xf32>
    %642 = vector.extract_strided_slice %632 {offsets = [0, 24], sizes = [8, 8], strides = [1, 1]} : vector<8x32xf32> to vector<8x8xf32>
    %643 = math.tanh %642 : vector<8x8xf32>
    %644 = arith.mulf %640, %626 : vector<8x8xf32>
    %645 = arith.mulf %639, %643 : vector<8x8xf32>
    %646 = arith.addf %644, %645 : vector<8x8xf32>
    %647 = math.tanh %646 : vector<8x8xf32>
    %648 = arith.mulf %641, %647 : vector<8x8xf32>
    %c248_170 = arith.constant 248 : index
    %c0_171 = arith.constant 0 : index
    %649 = vector.load %arg12[%c248_170, %c0_171] : memref<320x8xf32, #tpu.memory_space<vmem>>, vector<8x8xf32>
    tpu.vector_store %arg12[%c248_170, %c0_171], %648 {strides = array<i32>} : memref<320x8xf32, #tpu.memory_space<vmem>>, vector<8x8xf32>,
    %c256 = arith.constant 256 : index
    %c0_172 = arith.constant 0 : index
    %650 = vector.load %arg11[%c256, %c0_172] : memref<320x32xf32, #tpu.memory_space<vmem>>, vector<8x32xf32>
    %cst_173 = arith.constant dense<0.000000e+00> : vector<8x32xf32>
    %651 = tpu.matmul %648, %7, %cst_173 {dimension_numbers = #tpu.dot_dimension_numbers<[1], [0], [0], [1], [0, 0, 1, 1], [], []>} : vector<8x8xf32>, vector<8x32xf32>, vector<8x32xf32> -> vector<8x32xf32>
    %652 = arith.addf %650, %651 : vector<8x32xf32>
    %653 = vector.extract_strided_slice %652 {offsets = [0, 0], sizes = [8, 24], strides = [1, 1]} : vector<8x32xf32> to vector<8x24xf32>
    %654 = arith.negf %653 : vector<8x24xf32>
    %655 = math.exp %654 : vector<8x24xf32>
    %cst_174 = arith.constant 1.000000e+00 : f32
    %656 = vector.broadcast %cst_174 : f32 to vector<8x24xf32>
    %657 = arith.addf %656, %655 : vector<8x24xf32>
    %658 = arith.divf %656, %657 : vector<8x24xf32>
    %659 = vector.extract_strided_slice %658 {offsets = [0, 0], sizes = [8, 8], strides = [1, 1]} : vector<8x24xf32> to vector<8x8xf32>
    %660 = vector.extract_strided_slice %658 {offsets = [0, 8], sizes = [8, 8], strides = [1, 1]} : vector<8x24xf32> to vector<8x8xf32>
    %661 = vector.extract_strided_slice %658 {offsets = [0, 16], sizes = [8, 8], strides = [1, 1]} : vector<8x24xf32> to vector<8x8xf32>
    %662 = vector.extract_strided_slice %652 {offsets = [0, 24], sizes = [8, 8], strides = [1, 1]} : vector<8x32xf32> to vector<8x8xf32>
    %663 = math.tanh %662 : vector<8x8xf32>
    %664 = arith.mulf %660, %646 : vector<8x8xf32>
    %665 = arith.mulf %659, %663 : vector<8x8xf32>
    %666 = arith.addf %664, %665 : vector<8x8xf32>
    %667 = math.tanh %666 : vector<8x8xf32>
    %668 = arith.mulf %661, %667 : vector<8x8xf32>
    %c256_175 = arith.constant 256 : index
    %c0_176 = arith.constant 0 : index
    %669 = vector.load %arg12[%c256_175, %c0_176] : memref<320x8xf32, #tpu.memory_space<vmem>>, vector<8x8xf32>
    tpu.vector_store %arg12[%c256_175, %c0_176], %668 {strides = array<i32>} : memref<320x8xf32, #tpu.memory_space<vmem>>, vector<8x8xf32>,
    %c264 = arith.constant 264 : index
    %c0_177 = arith.constant 0 : index
    %670 = vector.load %arg11[%c264, %c0_177] : memref<320x32xf32, #tpu.memory_space<vmem>>, vector<8x32xf32>
    %cst_178 = arith.constant dense<0.000000e+00> : vector<8x32xf32>
    %671 = tpu.matmul %668, %7, %cst_178 {dimension_numbers = #tpu.dot_dimension_numbers<[1], [0], [0], [1], [0, 0, 1, 1], [], []>} : vector<8x8xf32>, vector<8x32xf32>, vector<8x32xf32> -> vector<8x32xf32>
    %672 = arith.addf %670, %671 : vector<8x32xf32>
    %673 = vector.extract_strided_slice %672 {offsets = [0, 0], sizes = [8, 24], strides = [1, 1]} : vector<8x32xf32> to vector<8x24xf32>
    %674 = arith.negf %673 : vector<8x24xf32>
    %675 = math.exp %674 : vector<8x24xf32>
    %cst_179 = arith.constant 1.000000e+00 : f32
    %676 = vector.broadcast %cst_179 : f32 to vector<8x24xf32>
    %677 = arith.addf %676, %675 : vector<8x24xf32>
    %678 = arith.divf %676, %677 : vector<8x24xf32>
    %679 = vector.extract_strided_slice %678 {offsets = [0, 0], sizes = [8, 8], strides = [1, 1]} : vector<8x24xf32> to vector<8x8xf32>
    %680 = vector.extract_strided_slice %678 {offsets = [0, 8], sizes = [8, 8], strides = [1, 1]} : vector<8x24xf32> to vector<8x8xf32>
    %681 = vector.extract_strided_slice %678 {offsets = [0, 16], sizes = [8, 8], strides = [1, 1]} : vector<8x24xf32> to vector<8x8xf32>
    %682 = vector.extract_strided_slice %672 {offsets = [0, 24], sizes = [8, 8], strides = [1, 1]} : vector<8x32xf32> to vector<8x8xf32>
    %683 = math.tanh %682 : vector<8x8xf32>
    %684 = arith.mulf %680, %666 : vector<8x8xf32>
    %685 = arith.mulf %679, %683 : vector<8x8xf32>
    %686 = arith.addf %684, %685 : vector<8x8xf32>
    %687 = math.tanh %686 : vector<8x8xf32>
    %688 = arith.mulf %681, %687 : vector<8x8xf32>
    %c264_180 = arith.constant 264 : index
    %c0_181 = arith.constant 0 : index
    %689 = vector.load %arg12[%c264_180, %c0_181] : memref<320x8xf32, #tpu.memory_space<vmem>>, vector<8x8xf32>
    tpu.vector_store %arg12[%c264_180, %c0_181], %688 {strides = array<i32>} : memref<320x8xf32, #tpu.memory_space<vmem>>, vector<8x8xf32>,
    %c272 = arith.constant 272 : index
    %c0_182 = arith.constant 0 : index
    %690 = vector.load %arg11[%c272, %c0_182] : memref<320x32xf32, #tpu.memory_space<vmem>>, vector<8x32xf32>
    %cst_183 = arith.constant dense<0.000000e+00> : vector<8x32xf32>
    %691 = tpu.matmul %688, %7, %cst_183 {dimension_numbers = #tpu.dot_dimension_numbers<[1], [0], [0], [1], [0, 0, 1, 1], [], []>} : vector<8x8xf32>, vector<8x32xf32>, vector<8x32xf32> -> vector<8x32xf32>
    %692 = arith.addf %690, %691 : vector<8x32xf32>
    %693 = vector.extract_strided_slice %692 {offsets = [0, 0], sizes = [8, 24], strides = [1, 1]} : vector<8x32xf32> to vector<8x24xf32>
    %694 = arith.negf %693 : vector<8x24xf32>
    %695 = math.exp %694 : vector<8x24xf32>
    %cst_184 = arith.constant 1.000000e+00 : f32
    %696 = vector.broadcast %cst_184 : f32 to vector<8x24xf32>
    %697 = arith.addf %696, %695 : vector<8x24xf32>
    %698 = arith.divf %696, %697 : vector<8x24xf32>
    %699 = vector.extract_strided_slice %698 {offsets = [0, 0], sizes = [8, 8], strides = [1, 1]} : vector<8x24xf32> to vector<8x8xf32>
    %700 = vector.extract_strided_slice %698 {offsets = [0, 8], sizes = [8, 8], strides = [1, 1]} : vector<8x24xf32> to vector<8x8xf32>
    %701 = vector.extract_strided_slice %698 {offsets = [0, 16], sizes = [8, 8], strides = [1, 1]} : vector<8x24xf32> to vector<8x8xf32>
    %702 = vector.extract_strided_slice %692 {offsets = [0, 24], sizes = [8, 8], strides = [1, 1]} : vector<8x32xf32> to vector<8x8xf32>
    %703 = math.tanh %702 : vector<8x8xf32>
    %704 = arith.mulf %700, %686 : vector<8x8xf32>
    %705 = arith.mulf %699, %703 : vector<8x8xf32>
    %706 = arith.addf %704, %705 : vector<8x8xf32>
    %707 = math.tanh %706 : vector<8x8xf32>
    %708 = arith.mulf %701, %707 : vector<8x8xf32>
    %c272_185 = arith.constant 272 : index
    %c0_186 = arith.constant 0 : index
    %709 = vector.load %arg12[%c272_185, %c0_186] : memref<320x8xf32, #tpu.memory_space<vmem>>, vector<8x8xf32>
    tpu.vector_store %arg12[%c272_185, %c0_186], %708 {strides = array<i32>} : memref<320x8xf32, #tpu.memory_space<vmem>>, vector<8x8xf32>,
    %c280 = arith.constant 280 : index
    %c0_187 = arith.constant 0 : index
    %710 = vector.load %arg11[%c280, %c0_187] : memref<320x32xf32, #tpu.memory_space<vmem>>, vector<8x32xf32>
    %cst_188 = arith.constant dense<0.000000e+00> : vector<8x32xf32>
    %711 = tpu.matmul %708, %7, %cst_188 {dimension_numbers = #tpu.dot_dimension_numbers<[1], [0], [0], [1], [0, 0, 1, 1], [], []>} : vector<8x8xf32>, vector<8x32xf32>, vector<8x32xf32> -> vector<8x32xf32>
    %712 = arith.addf %710, %711 : vector<8x32xf32>
    %713 = vector.extract_strided_slice %712 {offsets = [0, 0], sizes = [8, 24], strides = [1, 1]} : vector<8x32xf32> to vector<8x24xf32>
    %714 = arith.negf %713 : vector<8x24xf32>
    %715 = math.exp %714 : vector<8x24xf32>
    %cst_189 = arith.constant 1.000000e+00 : f32
    %716 = vector.broadcast %cst_189 : f32 to vector<8x24xf32>
    %717 = arith.addf %716, %715 : vector<8x24xf32>
    %718 = arith.divf %716, %717 : vector<8x24xf32>
    %719 = vector.extract_strided_slice %718 {offsets = [0, 0], sizes = [8, 8], strides = [1, 1]} : vector<8x24xf32> to vector<8x8xf32>
    %720 = vector.extract_strided_slice %718 {offsets = [0, 8], sizes = [8, 8], strides = [1, 1]} : vector<8x24xf32> to vector<8x8xf32>
    %721 = vector.extract_strided_slice %718 {offsets = [0, 16], sizes = [8, 8], strides = [1, 1]} : vector<8x24xf32> to vector<8x8xf32>
    %722 = vector.extract_strided_slice %712 {offsets = [0, 24], sizes = [8, 8], strides = [1, 1]} : vector<8x32xf32> to vector<8x8xf32>
    %723 = math.tanh %722 : vector<8x8xf32>
    %724 = arith.mulf %720, %706 : vector<8x8xf32>
    %725 = arith.mulf %719, %723 : vector<8x8xf32>
    %726 = arith.addf %724, %725 : vector<8x8xf32>
    %727 = math.tanh %726 : vector<8x8xf32>
    %728 = arith.mulf %721, %727 : vector<8x8xf32>
    %c280_190 = arith.constant 280 : index
    %c0_191 = arith.constant 0 : index
    %729 = vector.load %arg12[%c280_190, %c0_191] : memref<320x8xf32, #tpu.memory_space<vmem>>, vector<8x8xf32>
    tpu.vector_store %arg12[%c280_190, %c0_191], %728 {strides = array<i32>} : memref<320x8xf32, #tpu.memory_space<vmem>>, vector<8x8xf32>,
    %c288 = arith.constant 288 : index
    %c0_192 = arith.constant 0 : index
    %730 = vector.load %arg11[%c288, %c0_192] : memref<320x32xf32, #tpu.memory_space<vmem>>, vector<8x32xf32>
    %cst_193 = arith.constant dense<0.000000e+00> : vector<8x32xf32>
    %731 = tpu.matmul %728, %7, %cst_193 {dimension_numbers = #tpu.dot_dimension_numbers<[1], [0], [0], [1], [0, 0, 1, 1], [], []>} : vector<8x8xf32>, vector<8x32xf32>, vector<8x32xf32> -> vector<8x32xf32>
    %732 = arith.addf %730, %731 : vector<8x32xf32>
    %733 = vector.extract_strided_slice %732 {offsets = [0, 0], sizes = [8, 24], strides = [1, 1]} : vector<8x32xf32> to vector<8x24xf32>
    %734 = arith.negf %733 : vector<8x24xf32>
    %735 = math.exp %734 : vector<8x24xf32>
    %cst_194 = arith.constant 1.000000e+00 : f32
    %736 = vector.broadcast %cst_194 : f32 to vector<8x24xf32>
    %737 = arith.addf %736, %735 : vector<8x24xf32>
    %738 = arith.divf %736, %737 : vector<8x24xf32>
    %739 = vector.extract_strided_slice %738 {offsets = [0, 0], sizes = [8, 8], strides = [1, 1]} : vector<8x24xf32> to vector<8x8xf32>
    %740 = vector.extract_strided_slice %738 {offsets = [0, 8], sizes = [8, 8], strides = [1, 1]} : vector<8x24xf32> to vector<8x8xf32>
    %741 = vector.extract_strided_slice %738 {offsets = [0, 16], sizes = [8, 8], strides = [1, 1]} : vector<8x24xf32> to vector<8x8xf32>
    %742 = vector.extract_strided_slice %732 {offsets = [0, 24], sizes = [8, 8], strides = [1, 1]} : vector<8x32xf32> to vector<8x8xf32>
    %743 = math.tanh %742 : vector<8x8xf32>
    %744 = arith.mulf %740, %726 : vector<8x8xf32>
    %745 = arith.mulf %739, %743 : vector<8x8xf32>
    %746 = arith.addf %744, %745 : vector<8x8xf32>
    %747 = math.tanh %746 : vector<8x8xf32>
    %748 = arith.mulf %741, %747 : vector<8x8xf32>
    %c288_195 = arith.constant 288 : index
    %c0_196 = arith.constant 0 : index
    %749 = vector.load %arg12[%c288_195, %c0_196] : memref<320x8xf32, #tpu.memory_space<vmem>>, vector<8x8xf32>
    tpu.vector_store %arg12[%c288_195, %c0_196], %748 {strides = array<i32>} : memref<320x8xf32, #tpu.memory_space<vmem>>, vector<8x8xf32>,
    %c296 = arith.constant 296 : index
    %c0_197 = arith.constant 0 : index
    %750 = vector.load %arg11[%c296, %c0_197] : memref<320x32xf32, #tpu.memory_space<vmem>>, vector<8x32xf32>
    %cst_198 = arith.constant dense<0.000000e+00> : vector<8x32xf32>
    %751 = tpu.matmul %748, %7, %cst_198 {dimension_numbers = #tpu.dot_dimension_numbers<[1], [0], [0], [1], [0, 0, 1, 1], [], []>} : vector<8x8xf32>, vector<8x32xf32>, vector<8x32xf32> -> vector<8x32xf32>
    %752 = arith.addf %750, %751 : vector<8x32xf32>
    %753 = vector.extract_strided_slice %752 {offsets = [0, 0], sizes = [8, 24], strides = [1, 1]} : vector<8x32xf32> to vector<8x24xf32>
    %754 = arith.negf %753 : vector<8x24xf32>
    %755 = math.exp %754 : vector<8x24xf32>
    %cst_199 = arith.constant 1.000000e+00 : f32
    %756 = vector.broadcast %cst_199 : f32 to vector<8x24xf32>
    %757 = arith.addf %756, %755 : vector<8x24xf32>
    %758 = arith.divf %756, %757 : vector<8x24xf32>
    %759 = vector.extract_strided_slice %758 {offsets = [0, 0], sizes = [8, 8], strides = [1, 1]} : vector<8x24xf32> to vector<8x8xf32>
    %760 = vector.extract_strided_slice %758 {offsets = [0, 8], sizes = [8, 8], strides = [1, 1]} : vector<8x24xf32> to vector<8x8xf32>
    %761 = vector.extract_strided_slice %758 {offsets = [0, 16], sizes = [8, 8], strides = [1, 1]} : vector<8x24xf32> to vector<8x8xf32>
    %762 = vector.extract_strided_slice %752 {offsets = [0, 24], sizes = [8, 8], strides = [1, 1]} : vector<8x32xf32> to vector<8x8xf32>
    %763 = math.tanh %762 : vector<8x8xf32>
    %764 = arith.mulf %760, %746 : vector<8x8xf32>
    %765 = arith.mulf %759, %763 : vector<8x8xf32>
    %766 = arith.addf %764, %765 : vector<8x8xf32>
    %767 = math.tanh %766 : vector<8x8xf32>
    %768 = arith.mulf %761, %767 : vector<8x8xf32>
    %c296_200 = arith.constant 296 : index
    %c0_201 = arith.constant 0 : index
    %769 = vector.load %arg12[%c296_200, %c0_201] : memref<320x8xf32, #tpu.memory_space<vmem>>, vector<8x8xf32>
    tpu.vector_store %arg12[%c296_200, %c0_201], %768 {strides = array<i32>} : memref<320x8xf32, #tpu.memory_space<vmem>>, vector<8x8xf32>,
    %c304 = arith.constant 304 : index
    %c0_202 = arith.constant 0 : index
    %770 = vector.load %arg11[%c304, %c0_202] : memref<320x32xf32, #tpu.memory_space<vmem>>, vector<8x32xf32>
    %cst_203 = arith.constant dense<0.000000e+00> : vector<8x32xf32>
    %771 = tpu.matmul %768, %7, %cst_203 {dimension_numbers = #tpu.dot_dimension_numbers<[1], [0], [0], [1], [0, 0, 1, 1], [], []>} : vector<8x8xf32>, vector<8x32xf32>, vector<8x32xf32> -> vector<8x32xf32>
    %772 = arith.addf %770, %771 : vector<8x32xf32>
    %773 = vector.extract_strided_slice %772 {offsets = [0, 0], sizes = [8, 24], strides = [1, 1]} : vector<8x32xf32> to vector<8x24xf32>
    %774 = arith.negf %773 : vector<8x24xf32>
    %775 = math.exp %774 : vector<8x24xf32>
    %cst_204 = arith.constant 1.000000e+00 : f32
    %776 = vector.broadcast %cst_204 : f32 to vector<8x24xf32>
    %777 = arith.addf %776, %775 : vector<8x24xf32>
    %778 = arith.divf %776, %777 : vector<8x24xf32>
    %779 = vector.extract_strided_slice %778 {offsets = [0, 0], sizes = [8, 8], strides = [1, 1]} : vector<8x24xf32> to vector<8x8xf32>
    %780 = vector.extract_strided_slice %778 {offsets = [0, 8], sizes = [8, 8], strides = [1, 1]} : vector<8x24xf32> to vector<8x8xf32>
    %781 = vector.extract_strided_slice %778 {offsets = [0, 16], sizes = [8, 8], strides = [1, 1]} : vector<8x24xf32> to vector<8x8xf32>
    %782 = vector.extract_strided_slice %772 {offsets = [0, 24], sizes = [8, 8], strides = [1, 1]} : vector<8x32xf32> to vector<8x8xf32>
    %783 = math.tanh %782 : vector<8x8xf32>
    %784 = arith.mulf %780, %766 : vector<8x8xf32>
    %785 = arith.mulf %779, %783 : vector<8x8xf32>
    %786 = arith.addf %784, %785 : vector<8x8xf32>
    %787 = math.tanh %786 : vector<8x8xf32>
    %788 = arith.mulf %781, %787 : vector<8x8xf32>
    %c304_205 = arith.constant 304 : index
    %c0_206 = arith.constant 0 : index
    %789 = vector.load %arg12[%c304_205, %c0_206] : memref<320x8xf32, #tpu.memory_space<vmem>>, vector<8x8xf32>
    tpu.vector_store %arg12[%c304_205, %c0_206], %788 {strides = array<i32>} : memref<320x8xf32, #tpu.memory_space<vmem>>, vector<8x8xf32>,
    %c312 = arith.constant 312 : index
    %c0_207 = arith.constant 0 : index
    %790 = vector.load %arg11[%c312, %c0_207] : memref<320x32xf32, #tpu.memory_space<vmem>>, vector<8x32xf32>
    %cst_208 = arith.constant dense<0.000000e+00> : vector<8x32xf32>
    %791 = tpu.matmul %788, %7, %cst_208 {dimension_numbers = #tpu.dot_dimension_numbers<[1], [0], [0], [1], [0, 0, 1, 1], [], []>} : vector<8x8xf32>, vector<8x32xf32>, vector<8x32xf32> -> vector<8x32xf32>
    %792 = arith.addf %790, %791 : vector<8x32xf32>
    %793 = vector.extract_strided_slice %792 {offsets = [0, 0], sizes = [8, 24], strides = [1, 1]} : vector<8x32xf32> to vector<8x24xf32>
    %794 = arith.negf %793 : vector<8x24xf32>
    %795 = math.exp %794 : vector<8x24xf32>
    %cst_209 = arith.constant 1.000000e+00 : f32
    %796 = vector.broadcast %cst_209 : f32 to vector<8x24xf32>
    %797 = arith.addf %796, %795 : vector<8x24xf32>
    %798 = arith.divf %796, %797 : vector<8x24xf32>
    %799 = vector.extract_strided_slice %798 {offsets = [0, 0], sizes = [8, 8], strides = [1, 1]} : vector<8x24xf32> to vector<8x8xf32>
    %800 = vector.extract_strided_slice %798 {offsets = [0, 8], sizes = [8, 8], strides = [1, 1]} : vector<8x24xf32> to vector<8x8xf32>
    %801 = vector.extract_strided_slice %798 {offsets = [0, 16], sizes = [8, 8], strides = [1, 1]} : vector<8x24xf32> to vector<8x8xf32>
    %802 = vector.extract_strided_slice %792 {offsets = [0, 24], sizes = [8, 8], strides = [1, 1]} : vector<8x32xf32> to vector<8x8xf32>
    %803 = math.tanh %802 : vector<8x8xf32>
    %804 = arith.mulf %800, %786 : vector<8x8xf32>
    %805 = arith.mulf %799, %803 : vector<8x8xf32>
    %806 = arith.addf %804, %805 : vector<8x8xf32>
    %807 = math.tanh %806 : vector<8x8xf32>
    %808 = arith.mulf %801, %807 : vector<8x8xf32>
    %c312_210 = arith.constant 312 : index
    %c0_211 = arith.constant 0 : index
    %809 = vector.load %arg12[%c312_210, %c0_211] : memref<320x8xf32, #tpu.memory_space<vmem>>, vector<8x8xf32>
    tpu.vector_store %arg12[%c312_210, %c0_211], %808 {strides = array<i32>} : memref<320x8xf32, #tpu.memory_space<vmem>>, vector<8x8xf32>,
    %c0_212 = arith.constant 0 : index
    %c0_213 = arith.constant 0 : index
    %810 = vector.load %arg12[%c0_212, %c0_213] : memref<320x8xf32, #tpu.memory_space<vmem>>, vector<320x8xf32>
    %c0_214 = arith.constant 0 : index
    %c0_215 = arith.constant 0 : index
    %811 = vector.load %arg4[%c0_214, %c0_215] : memref<8x10xf32, #tpu.memory_space<vmem>>, vector<8x10xf32>
    %cst_216 = arith.constant dense<0.000000e+00> : vector<320x10xf32>
    %812 = tpu.matmul %810, %811, %cst_216 {dimension_numbers = #tpu.dot_dimension_numbers<[1], [0], [0], [1], [0, 0, 1, 1], [], []>} : vector<320x8xf32>, vector<8x10xf32>, vector<320x10xf32> -> vector<320x10xf32>
    %c0_217 = arith.constant 0 : index
    %c0_218 = arith.constant 0 : index
    %813 = vector.load %arg5[%c0_217, %c0_218] : memref<1x10xf32, #tpu.memory_space<vmem>>, vector<1x10xf32>
    %814 = vector.broadcast %813 : vector<1x10xf32> to vector<320x10xf32>
    %815 = arith.addf %812, %814 : vector<320x10xf32>
    %cst_219 = arith.constant 0.000000e+00 : f32
    %816 = vector.broadcast %cst_219 : f32 to vector<320x10xf32>
    %817 = arith.cmpf ogt, %815, %816 : vector<320x10xf32>
    %cst_220 = arith.constant 0.000000e+00 : f32
    %818 = vector.broadcast %cst_220 : f32 to vector<320x10xf32>
    %819 = arith.minimumf %815, %818 : vector<320x10xf32>
    %820 = math.exp %819 : vector<320x10xf32>
    %cst_221 = arith.constant 1.000000e+00 : f32
    %821 = vector.broadcast %cst_221 : f32 to vector<320x10xf32>
    %822 = arith.subf %820, %821 : vector<320x10xf32>
    %823 = arith.select %817, %815, %822 : vector<320x10xi1>, vector<320x10xf32>
    %c0_222 = arith.constant 0 : index
    %c0_223 = arith.constant 0 : index
    %824 = vector.load %arg6[%c0_222, %c0_223] : memref<1x10xf32, #tpu.memory_space<vmem>>, vector<1x10xf32>
    %825 = vector.broadcast %824 : vector<1x10xf32> to vector<320x10xf32>
    %826 = arith.mulf %823, %825 : vector<320x10xf32>
    %c0_224 = arith.constant 0 : index
    %c0_225 = arith.constant 0 : index
    %827 = vector.load %arg7[%c0_224, %c0_225] : memref<1x10xf32, #tpu.memory_space<vmem>>, vector<1x10xf32>
    %828 = vector.broadcast %827 : vector<1x10xf32> to vector<320x10xf32>
    %829 = arith.addf %826, %828 : vector<320x10xf32>
    %830 = vector.extract_strided_slice %829 {offsets = [0, 0], sizes = [8, 10], strides = [1, 1]} : vector<320x10xf32> to vector<8x10xf32>
    %831 = vector.extract_strided_slice %829 {offsets = [8, 0], sizes = [8, 10], strides = [1, 1]} : vector<320x10xf32> to vector<8x10xf32>
    %832 = arith.addf %830, %831 : vector<8x10xf32>
    %833 = vector.extract_strided_slice %829 {offsets = [16, 0], sizes = [8, 10], strides = [1, 1]} : vector<320x10xf32> to vector<8x10xf32>
    %834 = arith.addf %832, %833 : vector<8x10xf32>
    %835 = vector.extract_strided_slice %829 {offsets = [24, 0], sizes = [8, 10], strides = [1, 1]} : vector<320x10xf32> to vector<8x10xf32>
    %836 = arith.addf %834, %835 : vector<8x10xf32>
    %837 = vector.extract_strided_slice %829 {offsets = [32, 0], sizes = [8, 10], strides = [1, 1]} : vector<320x10xf32> to vector<8x10xf32>
    %838 = arith.addf %836, %837 : vector<8x10xf32>
    %839 = vector.extract_strided_slice %829 {offsets = [40, 0], sizes = [8, 10], strides = [1, 1]} : vector<320x10xf32> to vector<8x10xf32>
    %840 = arith.addf %838, %839 : vector<8x10xf32>
    %841 = vector.extract_strided_slice %829 {offsets = [48, 0], sizes = [8, 10], strides = [1, 1]} : vector<320x10xf32> to vector<8x10xf32>
    %842 = arith.addf %840, %841 : vector<8x10xf32>
    %843 = vector.extract_strided_slice %829 {offsets = [56, 0], sizes = [8, 10], strides = [1, 1]} : vector<320x10xf32> to vector<8x10xf32>
    %844 = arith.addf %842, %843 : vector<8x10xf32>
    %845 = vector.extract_strided_slice %829 {offsets = [64, 0], sizes = [8, 10], strides = [1, 1]} : vector<320x10xf32> to vector<8x10xf32>
    %846 = arith.addf %844, %845 : vector<8x10xf32>
    %847 = vector.extract_strided_slice %829 {offsets = [72, 0], sizes = [8, 10], strides = [1, 1]} : vector<320x10xf32> to vector<8x10xf32>
    %848 = arith.addf %846, %847 : vector<8x10xf32>
    %849 = vector.extract_strided_slice %829 {offsets = [80, 0], sizes = [8, 10], strides = [1, 1]} : vector<320x10xf32> to vector<8x10xf32>
    %850 = arith.addf %848, %849 : vector<8x10xf32>
    %851 = vector.extract_strided_slice %829 {offsets = [88, 0], sizes = [8, 10], strides = [1, 1]} : vector<320x10xf32> to vector<8x10xf32>
    %852 = arith.addf %850, %851 : vector<8x10xf32>
    %853 = vector.extract_strided_slice %829 {offsets = [96, 0], sizes = [8, 10], strides = [1, 1]} : vector<320x10xf32> to vector<8x10xf32>
    %854 = arith.addf %852, %853 : vector<8x10xf32>
    %855 = vector.extract_strided_slice %829 {offsets = [104, 0], sizes = [8, 10], strides = [1, 1]} : vector<320x10xf32> to vector<8x10xf32>
    %856 = arith.addf %854, %855 : vector<8x10xf32>
    %857 = vector.extract_strided_slice %829 {offsets = [112, 0], sizes = [8, 10], strides = [1, 1]} : vector<320x10xf32> to vector<8x10xf32>
    %858 = arith.addf %856, %857 : vector<8x10xf32>
    %859 = vector.extract_strided_slice %829 {offsets = [120, 0], sizes = [8, 10], strides = [1, 1]} : vector<320x10xf32> to vector<8x10xf32>
    %860 = arith.addf %858, %859 : vector<8x10xf32>
    %861 = vector.extract_strided_slice %829 {offsets = [128, 0], sizes = [8, 10], strides = [1, 1]} : vector<320x10xf32> to vector<8x10xf32>
    %862 = arith.addf %860, %861 : vector<8x10xf32>
    %863 = vector.extract_strided_slice %829 {offsets = [136, 0], sizes = [8, 10], strides = [1, 1]} : vector<320x10xf32> to vector<8x10xf32>
    %864 = arith.addf %862, %863 : vector<8x10xf32>
    %865 = vector.extract_strided_slice %829 {offsets = [144, 0], sizes = [8, 10], strides = [1, 1]} : vector<320x10xf32> to vector<8x10xf32>
    %866 = arith.addf %864, %865 : vector<8x10xf32>
    %867 = vector.extract_strided_slice %829 {offsets = [152, 0], sizes = [8, 10], strides = [1, 1]} : vector<320x10xf32> to vector<8x10xf32>
    %868 = arith.addf %866, %867 : vector<8x10xf32>
    %cst_226 = arith.constant 5.000000e-02 : f32
    %869 = vector.broadcast %cst_226 : f32 to vector<8x10xf32>
    %870 = arith.mulf %868, %869 : vector<8x10xf32>
    %871 = vector.extract_strided_slice %829 {offsets = [160, 0], sizes = [8, 10], strides = [1, 1]} : vector<320x10xf32> to vector<8x10xf32>
    %872 = vector.extract_strided_slice %829 {offsets = [168, 0], sizes = [8, 10], strides = [1, 1]} : vector<320x10xf32> to vector<8x10xf32>
    %873 = arith.addf %871, %872 : vector<8x10xf32>
    %874 = vector.extract_strided_slice %829 {offsets = [176, 0], sizes = [8, 10], strides = [1, 1]} : vector<320x10xf32> to vector<8x10xf32>
    %875 = arith.addf %873, %874 : vector<8x10xf32>
    %876 = vector.extract_strided_slice %829 {offsets = [184, 0], sizes = [8, 10], strides = [1, 1]} : vector<320x10xf32> to vector<8x10xf32>
    %877 = arith.addf %875, %876 : vector<8x10xf32>
    %878 = vector.extract_strided_slice %829 {offsets = [192, 0], sizes = [8, 10], strides = [1, 1]} : vector<320x10xf32> to vector<8x10xf32>
    %879 = arith.addf %877, %878 : vector<8x10xf32>
    %880 = vector.extract_strided_slice %829 {offsets = [200, 0], sizes = [8, 10], strides = [1, 1]} : vector<320x10xf32> to vector<8x10xf32>
    %881 = arith.addf %879, %880 : vector<8x10xf32>
    %882 = vector.extract_strided_slice %829 {offsets = [208, 0], sizes = [8, 10], strides = [1, 1]} : vector<320x10xf32> to vector<8x10xf32>
    %883 = arith.addf %881, %882 : vector<8x10xf32>
    %884 = vector.extract_strided_slice %829 {offsets = [216, 0], sizes = [8, 10], strides = [1, 1]} : vector<320x10xf32> to vector<8x10xf32>
    %885 = arith.addf %883, %884 : vector<8x10xf32>
    %886 = vector.extract_strided_slice %829 {offsets = [224, 0], sizes = [8, 10], strides = [1, 1]} : vector<320x10xf32> to vector<8x10xf32>
    %887 = arith.addf %885, %886 : vector<8x10xf32>
    %888 = vector.extract_strided_slice %829 {offsets = [232, 0], sizes = [8, 10], strides = [1, 1]} : vector<320x10xf32> to vector<8x10xf32>
    %889 = arith.addf %887, %888 : vector<8x10xf32>
    %890 = vector.extract_strided_slice %829 {offsets = [240, 0], sizes = [8, 10], strides = [1, 1]} : vector<320x10xf32> to vector<8x10xf32>
    %891 = arith.addf %889, %890 : vector<8x10xf32>
    %892 = vector.extract_strided_slice %829 {offsets = [248, 0], sizes = [8, 10], strides = [1, 1]} : vector<320x10xf32> to vector<8x10xf32>
    %893 = arith.addf %891, %892 : vector<8x10xf32>
    %894 = vector.extract_strided_slice %829 {offsets = [256, 0], sizes = [8, 10], strides = [1, 1]} : vector<320x10xf32> to vector<8x10xf32>
    %895 = arith.addf %893, %894 : vector<8x10xf32>
    %896 = vector.extract_strided_slice %829 {offsets = [264, 0], sizes = [8, 10], strides = [1, 1]} : vector<320x10xf32> to vector<8x10xf32>
    %897 = arith.addf %895, %896 : vector<8x10xf32>
    %898 = vector.extract_strided_slice %829 {offsets = [272, 0], sizes = [8, 10], strides = [1, 1]} : vector<320x10xf32> to vector<8x10xf32>
    %899 = arith.addf %897, %898 : vector<8x10xf32>
    %900 = vector.extract_strided_slice %829 {offsets = [280, 0], sizes = [8, 10], strides = [1, 1]} : vector<320x10xf32> to vector<8x10xf32>
    %901 = arith.addf %899, %900 : vector<8x10xf32>
    %902 = vector.extract_strided_slice %829 {offsets = [288, 0], sizes = [8, 10], strides = [1, 1]} : vector<320x10xf32> to vector<8x10xf32>
    %903 = arith.addf %901, %902 : vector<8x10xf32>
    %904 = vector.extract_strided_slice %829 {offsets = [296, 0], sizes = [8, 10], strides = [1, 1]} : vector<320x10xf32> to vector<8x10xf32>
    %905 = arith.addf %903, %904 : vector<8x10xf32>
    %906 = vector.extract_strided_slice %829 {offsets = [304, 0], sizes = [8, 10], strides = [1, 1]} : vector<320x10xf32> to vector<8x10xf32>
    %907 = arith.addf %905, %906 : vector<8x10xf32>
    %908 = vector.extract_strided_slice %829 {offsets = [312, 0], sizes = [8, 10], strides = [1, 1]} : vector<320x10xf32> to vector<8x10xf32>
    %909 = arith.addf %907, %908 : vector<8x10xf32>
    %cst_227 = arith.constant 5.000000e-02 : f32
    %910 = vector.broadcast %cst_227 : f32 to vector<8x10xf32>
    %911 = arith.mulf %909, %910 : vector<8x10xf32>
    %912 = tpu.concatenate %870, %911 in 1 : vector<8x10xf32>, vector<8x10xf32> -> vector<8x20xf32>
    %c0_228 = arith.constant 0 : index
    %c0_229 = arith.constant 0 : index
    %913 = vector.load %arg8[%c0_228, %c0_229] : memref<20x4xf32, #tpu.memory_space<vmem>>, vector<20x4xf32>
    %cst_230 = arith.constant dense<0.000000e+00> : vector<8x4xf32>
    %914 = tpu.matmul %912, %913, %cst_230 {dimension_numbers = #tpu.dot_dimension_numbers<[1], [0], [0], [1], [0, 0, 1, 1], [], []>} : vector<8x20xf32>, vector<20x4xf32>, vector<8x4xf32> -> vector<8x4xf32>
    %c0_231 = arith.constant 0 : index
    %c0_232 = arith.constant 0 : index
    %915 = vector.load %arg9[%c0_231, %c0_232] : memref<1x4xf32, #tpu.memory_space<vmem>>, vector<1x4xf32>
    %916 = vector.broadcast %915 : vector<1x4xf32> to vector<8x4xf32>
    %917 = arith.addf %914, %916 : vector<8x4xf32>
    %c0_233 = arith.constant 0 : index
    %c0_234 = arith.constant 0 : index
    %918 = vector.load %arg10[%c0_233, %c0_234] : memref<8x4xf32, #tpu.memory_space<vmem>>, vector<8x4xf32>
    tpu.vector_store %arg10[%c0_233, %c0_234], %917 {strides = array<i32>} : memref<8x4xf32, #tpu.memory_space<vmem>>, vector<8x4xf32>,
    return
  }
}

</mosaic_0001>

<bundles_post_ra>
// kernel: tpu_custom_call.1
= control target key start
LH: loop header
LB: loop body
LE: loop exit
PB: predicated region body
PF: predicated region fallthrough
CT: control target
= control target key end

     0   :  { %vm83_vm0 = vcmask 64512   ;;  %v6660_v5 = vmov 0.0   ;;  %vm6661_vm1 = vmmov 0   ;;  %vm469_vm2 = vcmask 261120   ;;  %s6662_s17 = smov 104   ;;  %s6663_s18 = smov 8   ;;  %s7831_s1 = inlined_call_operand.vmem [shape: f32[8,32], index: 1, kind: input, shape index: {}]   ;;  %s7832_s0 = inlined_call_operand.vmem [shape: f32[320,8], index: 0, kind: input, shape index: {}]   ;;  %s7833_s2 = inlined_call_operand.vmem [shape: f32[8,32], index: 2, kind: input, shape index: {}]   ;;  %s7834_s3 = inlined_call_operand.vmem [shape: f32[1,32], index: 3, kind: input, shape index: {}]   ;;  %s7835_s4 = inlined_call_operand.vmem [shape: f32[8,10], index: 4, kind: input, shape index: {}]   ;;  %s7836_s5 = inlined_call_operand.vmem [shape: f32[1,10], index: 5, kind: input, shape index: {}]   ;;  %s7837_s6 = inlined_call_operand.vmem [shape: f32[1,10], index: 6, kind: input, shape index: {}]   ;;  %s7838_s7 = inlined_call_operand.vmem [shape: f32[1,10], index: 7, kind: input, shape index: {}]   ;;  %s7839_s8 = inlined_call_operand.vmem [shape: f32[20,4], index: 8, kind: input, shape index: {}]   ;;  %s7840_s9 = inlined_call_operand.vmem [shape: f32[1,4], index: 9, kind: input, shape index: {}]   ;;  %s7841_s10 = inlined_call_operand.vmem [shape: f32[8,4], index: 10, kind: output, shape index: {}]  }
   0x1   :  { %v75_v0 = vld [vmem:[%s7831_s1] sm:$0xff]  ;;  %v57_v1 = vld [vmem:[%s7832_s0 + $0xb0] sm:$0xff]  ;;  %v58_v2 = vld [vmem:[%s7832_s0 + $0xb8] sm:$0xff]  ;;  %s6664_s19 = smov 112  }
   0x2   :  { %6247 = vmatprep.subr.mxu1 %v75_v0  ;;  %5946 = vmatprep.mubr.msk.f32.mxu1 %vm83_vm0, %v57_v1  ;;  %v6735_v3 = vld [vmem:[%s7833_s2] sm:$0xff]  ;;  %v60_v6 = vld [vmem:[%s7832_s0 + $0xc8] sm:$0xff]  ;;  %v61_v7 = vld [vmem:[%s7832_s0 + $0xd0] sm:$0xff] }
   0x3   :  { %v59_v4 = vld [vmem:[%s7832_s0 + $0xc0] sm:$0xff]  ;;  %6248 = vmatpush3.msra.mxu1 %v75_v0  ;;  %5911 = vmatprep.subr.mxu0 %v75_v0  ;;  %v36_v9 = vld [vmem:[%s7832_s0 + $0x8] sm:$0xff]  ;;  %v62_v10 = vld [vmem:[%s7832_s0 + $0xd8] sm:$0xff] }
   0x4   :  { %5947 = vmatmul.mubr.msk.f32.vlgmr.msra.gmra.mrb[0].mxu1 %vm83_vm0, %v58_v2  ;;  %5973 = vmatprep.subr.mxu1 %v6660_v5  ;;  %v35_v8 = vld [vmem:[%s7832_s0] sm:$0xff]  ;;  %v64_v12 = vld [vmem:[%s7832_s0 + $0xe8] sm:$0xff]  ;;  %v65_v13 = vld [vmem:[%s7832_s0 + $0xf0] sm:$0xff] }
   0x5   :  { %5974 = vmatpush3.msra.mxu1 %v6735_v3  ;;  %5949 = vmatprep.mubr.msk.f32.mxu1 %vm83_vm0, %v59_v4  ;;  %v63_v11 = vld [vmem:[%s7832_s0 + $0xe0] sm:$0xff]  ;;  %v66_v14 = vld [vmem:[%s7832_s0 + $0xf8] sm:$0xff]  ;;  %v68_v16 = vld [vmem:[%s7832_s0 + $0x108] sm:$0xff] }
   0x6   :  { %5912 = vmatpush3.msra.mxu0 %v75_v0  ;;  %5978 = vmatprep.subr.mxu1 %v6660_v5  ;;  %v67_v15 = vld [vmem:[%s7832_s0 + $0x100] sm:$0xff]  ;;  %v69_v17 = vld [vmem:[%s7832_s0 + $0x110] sm:$0xff]  ;;  %v70_v18 = vld [vmem:[%s7832_s0 + $0x118] sm:$0xff] }
   0x7   :  { %5913 = vmatprep.mubr.msk.f32.mxu0 %vm83_vm0, %v35_v8  ;;  %6073 = vmatprep.subr.mxu0 %v6660_v5  ;;  %v71_v19 = vld [vmem:[%s7832_s0 + $0x120] sm:$0xff]  ;;  %v72_v20 = vld [vmem:[%s7832_s0 + $0x128] sm:$0xff]  ;;  %v73_v21 = vld [vmem:[%s7832_s0 + $0x130] sm:$0xff] }
   0x8   :  { %5950 = vmatmul.mubr.msk.f32.gmra.mrb[2].mxu1 %vm83_vm0, %v60_v6  ;;  %5914 = vmatmul.mubr.msk.f32.vlgmr.msra.gmra.mrb[0].mxu0 %vm83_vm0, %v36_v9  ;;  %v74_v22 = vld [vmem:[%s7832_s0 + $0x138] sm:$0xff]  ;;  %v6826_v23 = vld [vmem:[%s7834_s3] ss:$0 sm:$0xff] }
   0x9   :  { %5952 = vmatprep.mubr.msk.f32.mxu1 %vm83_vm0, %v61_v7  ;;  %6074 = vmatpush3.msra.mxu0 %v6735_v3 }
   0xa   :  { %6083 = vmatprep.subr.mxu0 %v6660_v5 }
   0xc   :  { %5953 = vmatmul.mubr.msk.f32.gmra.mrb[4].mxu1 %vm83_vm0, %v62_v10 }
   0xd   :  { %5955 = vmatprep.mubr.msk.f32.mxu1 %vm83_vm0, %v63_v11 }
  0x10   :  { %5956 = vmatmul.mubr.msk.f32.gmra.mrb[6].mxu1 %vm83_vm0, %v64_v12 }
  0x11   :  { %5958 = vmatprep.mubr.msk.f32.mxu1 %vm83_vm0, %v65_v13 }
  0x14   :  { %5959 = vmatmul.mubr.msk.f32.gmra.mrb[8].mxu1 %vm83_vm0, %v66_v14 }
  0x15   :  { %5961 = vmatprep.mubr.msk.f32.mxu1 %vm83_vm0, %v67_v15 }
  0x18   :  { %5962 = vmatmul.mubr.msk.f32.gmra.mrb[10].mxu1 %vm83_vm0, %v68_v16 }
  0x19   :  { %5964 = vmatprep.mubr.msk.f32.mxu1 %vm83_vm0, %v69_v17 }
  0x1c   :  { %5965 = vmatmul.mubr.msk.f32.gmra.mrb[12].mxu1 %vm83_vm0, %v70_v18 }
  0x1d   :  { %5967 = vmatprep.mubr.msk.f32.mxu1 %vm83_vm0, %v71_v19 }
  0x20   :  { %5968 = vmatmul.mubr.msk.f32.gmra.mrb[14].mxu1 %vm83_vm0, %v72_v20 }
  0x21   :  { %5970 = vmatprep.mubr.msk.f32.mxu1 %vm83_vm0, %v73_v21 }
  0x24   :  { %5971 = vmatmul.mubr.msk.f32.gmra.mrb[16].mxu1 %vm83_vm0, %v74_v22 }
  0x25   :  { %5975 = vmatprep.mubr.msk.f32.mxu1 %vm6661_vm1, %v6660_v5 }
  0x28   :  { %5976 = vmatmul.mubr.f32.vlgmr.msra.gmra.mrb[18].mxu1 %v6660_v5 }
  0x29   :  { %5979 = vmatpush3.msra.mxu1 %v6735_v3  ;;  %5980 = vmatprep.mubr.msk.f32.mxu1 %vm6661_vm1, %v6660_v5 }
  0x2a   :  { %5983 = vmatprep.subr.mxu1 %v6660_v5 }
  0xd7   :  { %v5948_v24 = vpop.f32.mrb[0].mxu1 }
  0xd8   :  { %v386_v25 = vadd.f32 %v5948_v24, %v6826_v23  ;;  %v380_v26 = vpop.f32.mrb[1].mxu1 }
  0xd9   :  { %v381_v27 = vadd.f32 %v6826_v23, %v380_v26 }
  0xda   :  { %493 = vst.msk [vmem:[#allocation2 + $0xb8] sm:$0xff] %vm469_vm2, %v386_v25 }
  0xdb   :  { %492 = vst.msk [vmem:[#allocation2 + $0xb0] sm:$0xff] %vm469_vm2, %v381_v27  ;;  %v5951_v28 = vpop.f32.mrb[2].mxu1  ;;  %v5915_v29 = vpop.f32.mrb[0].mxu0 }
  0xdc   :  { %v396_v30 = vadd.f32 %v5951_v28, %v6826_v23  ;;  %v390_v31 = vpop.f32.mrb[3].mxu1  ;;  %v276_v32 = vadd.f32 %v5915_v29, %v6826_v23  ;;  %v270_v33 = vpop.f32.mrb[1].mxu0 }
  0xdd   :  { %v391_v34 = vadd.f32 %v6826_v23, %v390_v31  ;;  %v271_v35 = vadd.f32 %v6826_v23, %v270_v33 }
  0xde   :  { %495 = vst.msk [vmem:[#allocation2 + $0xc8] sm:$0xff] %vm469_vm2, %v396_v30  ;;  %471 = vst.msk [vmem:[#allocation2 + $0x8] sm:$0xff] %vm469_vm2, %v276_v32 }
  0xdf   :  { %494 = vst.msk [vmem:[#allocation2 + $0xc0] sm:$0xff] %vm469_vm2, %v391_v34  ;;  %v5954_v36 = vpop.f32.mrb[4].mxu1  ;;  %470 = vst.msk [vmem:[#allocation2] sm:$0xff] %vm469_vm2, %v271_v35  ;;  %v37_v35 = vld [vmem:[%s7832_s0 + $0x10] sm:$0xff] }
  0xe0   :  { %v406_v37 = vadd.f32 %v5954_v36, %v6826_v23  ;;  %v400_v38 = vpop.f32.mrb[5].mxu1  ;;  %v38_v36 = vld [vmem:[%s7832_s0 + $0x18] sm:$0xff]  ;;  %5916 = vmatprep.mubr.msk.f32.mxu0 %vm83_vm0, %v37_v35 }
  0xe1   :  { %v401_v39 = vadd.f32 %v6826_v23, %v400_v38  ;;  %5917 = vmatmul.mubr.msk.f32.gmra.mrb[2].mxu0 %vm83_vm0, %v38_v36 }
  0xe2   :  { %497 = vst.msk [vmem:[#allocation2 + $0xd8] sm:$0xff] %vm469_vm2, %v406_v37 }
  0xe3   :  { %496 = vst.msk [vmem:[#allocation2 + $0xd0] sm:$0xff] %vm469_vm2, %v401_v39  ;;  %v5957_v40 = vpop.f32.mrb[6].mxu1 }
  0xe4   :  { %v416_v41 = vadd.f32 %v5957_v40, %v6826_v23  ;;  %v410_v42 = vpop.f32.mrb[7].mxu1 }
  0xe5   :  { %v411_v43 = vadd.f32 %v6826_v23, %v410_v42  ;;  %v615_v20 = vld [vmem:[#allocation2 + $0x8] sm:$0xff] }
  0xe6   :  { %499 = vst.msk [vmem:[#allocation2 + $0xe8] sm:$0xff] %vm469_vm2, %v416_v41  ;;  %v511_v0 = vld [vmem:[#allocation2] sm:$0xff] }
  0xe7   :  { %498 = vst.msk [vmem:[#allocation2 + $0xe0] sm:$0xff] %vm469_vm2, %v411_v43  ;;  %v5960_v44 = vpop.f32.mrb[8].mxu1 }
  0xe8   :  { %v426_v45 = vadd.f32 %v5960_v44, %v6826_v23  ;;  %v420_v46 = vpop.f32.mrb[9].mxu1 }
  0xe9   :  { %v421_v47 = vadd.f32 %v6826_v23, %v420_v46 }
  0xea   :  { %501 = vst.msk [vmem:[#allocation2 + $0xf8] sm:$0xff] %vm469_vm2, %v426_v45 }
  0xeb   :  { %500 = vst.msk [vmem:[#allocation2 + $0xf0] sm:$0xff] %vm469_vm2, %v421_v47  ;;  %v5963_v48 = vpop.f32.mrb[10].mxu1 }
  0xec   :  { %v436_v49 = vadd.f32 %v5963_v48, %v6826_v23  ;;  %v430_v50 = vpop.f32.mrb[11].mxu1 }
  0xed   :  { %v431_v51 = vadd.f32 %v6826_v23, %v430_v50 }
  0xee   :  { %503 = vst.msk [vmem:[#allocation2 + $0x108] sm:$0xff] %vm469_vm2, %v436_v49 }
  0xef   :  { %502 = vst.msk [vmem:[#allocation2 + $0x100] sm:$0xff] %vm469_vm2, %v431_v51  ;;  %v5966_v52 = vpop.f32.mrb[12].mxu1 }
  0xf0   :  { %v446_v53 = vadd.f32 %v5966_v52, %v6826_v23  ;;  %v440_v54 = vpop.f32.mrb[13].mxu1 }
  0xf1   :  { %v441_v55 = vadd.f32 %v6826_v23, %v440_v54 }
  0xf2   :  { %505 = vst.msk [vmem:[#allocation2 + $0x118] sm:$0xff] %vm469_vm2, %v446_v53 }
  0xf3   :  { %504 = vst.msk [vmem:[#allocation2 + $0x110] sm:$0xff] %vm469_vm2, %v441_v55  ;;  %v5969_v56 = vpop.f32.mrb[14].mxu1 }
  0xf4   :  { %v456_v57 = vadd.f32 %v5969_v56, %v6826_v23  ;;  %v450_v58 = vpop.f32.mrb[15].mxu1 }
  0xf5   :  { %v451_v59 = vadd.f32 %v6826_v23, %v450_v58 }
  0xf6   :  { %507 = vst.msk [vmem:[#allocation2 + $0x128] sm:$0xff] %vm469_vm2, %v456_v57 }
  0xf7   :  { %506 = vst.msk [vmem:[#allocation2 + $0x120] sm:$0xff] %vm469_vm2, %v451_v59  ;;  %v5972_v60 = vpop.f32.mrb[16].mxu1 }
  0xf8   :  { %v466_v61 = vadd.f32 %v5972_v60, %v6826_v23  ;;  %v460_v62 = vpop.f32.mrb[17].mxu1 }
  0xf9   :  { %v461_v63 = vadd.f32 %v6826_v23, %v460_v62 }
  0xfa   :  { %509 = vst.msk [vmem:[#allocation2 + $0x138] sm:$0xff] %vm469_vm2, %v466_v61 }
  0xfb   :  { %508 = vst.msk [vmem:[#allocation2 + $0x130] sm:$0xff] %vm469_vm2, %v461_v63  ;;  %v581_v1 = vpop.f32.mrb[18].mxu1 }
  0xfc   :  { %v585_v2 = vadd.f32 %v581_v1, %v511_v0  ;;  %v5977_v4 = vpop.f32.mrb[19].mxu1 }
  0xfe   :  { %6256 = vtanh.f32 %v585_v2  ;;  %v5580_v7 = vmul.f32 -1.442695, %v585_v2 }
 0x100   :  { %6258 = vpow2.f32 %v5580_v7 }
 0x108   :  { %v6257_v6 = vpop.eup %6256 }
 0x109   :  { %595 = vrot.lane.b32.xlu0 %v6257_v6, %s6662_s17 }
 0x10a   :  { %v6259_v8 = vpop.eup %6258 }
 0x10b   :  { %v589_v9 = vadd.f32 1.0, %v6259_v8 }
 0x10d   :  { %6260 = vrcp.f32 %v589_v9 }
 0x117   :  { %v6261_v10 = vpop.eup %6260 }
 0x118   :  { %v593_v13 = vmul.f32 0.0, %v6261_v10 }
 0x17b   :  { %v596_v11 = vpop.permute.xlu0 %595 }
 0x17c   :  { %v598_v12 = vmul.f32 %v6261_v10, %v596_v11 }
 0x17e   :  { %600 = vrot.lane.b32.xlu0 %v598_v12, %s6663_s18 }
 0x1b4   :  { %v5918_v40 = vpop.f32.mrb[2].mxu0 }
 0x1b5   :  { %v286_v41 = vadd.f32 %v5918_v40, %v6826_v23  ;;  %v280_v42 = vpop.f32.mrb[3].mxu0 }
 0x1b6   :  { %v281_v43 = vadd.f32 %v6826_v23, %v280_v42 }
 0x1b7   :  { %473 = vst.msk [vmem:[#allocation2 + $0x18] sm:$0xff] %vm469_vm2, %v286_v41 }
 0x1b8   :  { %472 = vst.msk [vmem:[#allocation2 + $0x10] sm:$0xff] %vm469_vm2, %v281_v43 }
 0x1be   :  { %v821_v63 = vld [vmem:[#allocation2 + $0x18] sm:$0xff] }
 0x1bf   :  { %v718_v45 = vld [vmem:[#allocation2 + $0x10] sm:$0xff] }
 0x1f0   :  { %v601_v14 = vpop.permute.xlu0 %600 }
 0x1f1   :  { %v603_v15 = vadd.f32 %v601_v14, %v593_v13 }
 0x1f3   :  { %6262 = vtanh.f32 %v603_v15 }
 0x1fd   :  { %v6263_v16 = vpop.eup %6262 }
 0x1fe   :  { %606 = vrot.lane.b32.xlu1 %v6263_v16, %s6663_s18  ;;  %v40_v16 = vld [vmem:[%s7832_s0 + $0x28] sm:$0xff] }
 0x270   :  { %v607_v17 = vpop.permute.xlu1 %606 }
 0x271   :  { %v609_v18 = vmul.f32 %v6261_v10, %v607_v17 }
 0x273   :  { %611 = vrot.lane.b32.xlu1 %v609_v18, %s6664_s19 }
 0x2e5   :  { %v612_v19 = vpop.permute.xlu1 %611 }
 0x2e6   :  { %614 = vst.msk [vmem:[#allocation3] sm:$0xff] %vm83_vm0, %v612_v19  ;;  %5981 = vmatmul.mubr.msk.f32.vlgmr.msra.gmra.mrb[20].mxu1 %vm83_vm0, %v612_v19 }
 0x2e7   :  { %5984 = vmatpush3.msra.mxu1 %v6735_v3  ;;  %5985 = vmatprep.mubr.msk.f32.mxu1 %vm6661_vm1, %v6660_v5 }
 0x2e8   :  { %5988 = vmatprep.subr.mxu1 %v6660_v5 }
 0x3b9   :  { %v684_v21 = vpop.f32.mrb[20].mxu1 }
 0x3ba   :  { %v688_v22 = vadd.f32 %v684_v21, %v615_v20  ;;  %v5982_v24 = vpop.f32.mrb[21].mxu1 }
 0x3bc   :  { %6264 = vtanh.f32 %v688_v22  ;;  %v5582_v26 = vmul.f32 -1.442695, %v688_v22 }
 0x3be   :  { %6266 = vpow2.f32 %v5582_v26 }
 0x3c6   :  { %v6265_v25 = vpop.eup %6264 }
 0x3c7   :  { %698 = vrot.lane.b32.xlu0 %v6265_v25, %s6662_s17 }
 0x3c8   :  { %v6267_v27 = vpop.eup %6266 }
 0x3c9   :  { %v692_v28 = vadd.f32 1.0, %v6267_v27 }
 0x3cb   :  { %6268 = vrcp.f32 %v692_v28 }
 0x3d5   :  { %v6269_v29 = vpop.eup %6268 }
 0x3d6   :  { %v696_v32 = vmul.f32 %v6269_v29, %v603_v15  ;;  %v39_v15 = vld [vmem:[%s7832_s0 + $0x20] sm:$0xff] }
 0x3d7   :  { %5919 = vmatprep.mubr.msk.f32.mxu0 %vm83_vm0, %v39_v15 }
 0x3d8   :  { %5920 = vmatmul.mubr.msk.f32.gmra.mrb[4].mxu0 %vm83_vm0, %v40_v16 }
 0x439   :  { %v699_v30 = vpop.permute.xlu0 %698 }
 0x43a   :  { %v701_v31 = vmul.f32 %v6269_v29, %v699_v30 }
 0x43c   :  { %703 = vrot.lane.b32.xlu1 %v701_v31, %s6663_s18 }
 0x4ab   :  { %v5921_v20 = vpop.f32.mrb[4].mxu0 }
 0x4ac   :  { %v296_v21 = vadd.f32 %v5921_v20, %v6826_v23  ;;  %v290_v22 = vpop.f32.mrb[5].mxu0 }
 0x4ad   :  { %v291_v24 = vadd.f32 %v6826_v23, %v290_v22 }
 0x4ae   :  { %v704_v33 = vpop.permute.xlu1 %703  ;;  %475 = vst.msk [vmem:[#allocation2 + $0x28] sm:$0xff] %vm469_vm2, %v296_v21 }
 0x4af   :  { %v706_v34 = vadd.f32 %v704_v33, %v696_v32  ;;  %474 = vst.msk [vmem:[#allocation2 + $0x20] sm:$0xff] %vm469_vm2, %v291_v24 }
 0x4b1   :  { %6270 = vtanh.f32 %v706_v34 }
 0x4b6   :  { %v924_v26 = vld [vmem:[#allocation2 + $0x20] sm:$0xff] }
 0x4bb   :  { %v6271_v37 = vpop.eup %6270 }
 0x4bc   :  { %709 = vrot.lane.b32.xlu0 %v6271_v37, %s6663_s18 }
 0x52e   :  { %v710_v38 = vpop.permute.xlu0 %709 }
 0x52f   :  { %v712_v39 = vmul.f32 %v6269_v29, %v710_v38 }
 0x531   :  { %714 = vrot.lane.b32.xlu1 %v712_v39, %s6664_s19 }
 0x5a3   :  { %v715_v44 = vpop.permute.xlu1 %714 }
 0x5a4   :  { %717 = vst.msk [vmem:[#allocation3 + $0x8] sm:$0xff] %vm83_vm0, %v715_v44  ;;  %5986 = vmatmul.mubr.msk.f32.vlgmr.msra.gmra.mrb[22].mxu1 %vm83_vm0, %v715_v44  ;;  %v1027_v44 = vld [vmem:[#allocation2 + $0x28] sm:$0xff] }
 0x5a5   :  { %5989 = vmatpush3.msra.mxu1 %v6735_v3  ;;  %5990 = vmatprep.mubr.msk.f32.mxu1 %vm6661_vm1, %v6660_v5 }
 0x5a6   :  { %5993 = vmatprep.subr.mxu1 %v6660_v5 }
 0x677   :  { %v787_v46 = vpop.f32.mrb[22].mxu1 }
 0x678   :  { %v791_v47 = vadd.f32 %v787_v46, %v718_v45  ;;  %v5987_v48 = vpop.f32.mrb[23].mxu1 }
 0x67a   :  { %6272 = vtanh.f32 %v791_v47  ;;  %v5584_v50 = vmul.f32 -1.442695, %v791_v47 }
 0x67c   :  { %6274 = vpow2.f32 %v5584_v50 }
 0x684   :  { %v6273_v49 = vpop.eup %6272 }
 0x685   :  { %801 = vrot.lane.b32.xlu0 %v6273_v49, %s6662_s17 }
 0x686   :  { %v6275_v51 = vpop.eup %6274 }
 0x687   :  { %v795_v52 = vadd.f32 1.0, %v6275_v51 }
 0x689   :  { %6276 = vrcp.f32 %v795_v52 }
 0x693   :  { %v6277_v53 = vpop.eup %6276 }
 0x694   :  { %v799_v56 = vmul.f32 %v6277_v53, %v706_v34 }
 0x6f7   :  { %v802_v54 = vpop.permute.xlu0 %801 }
 0x6f8   :  { %v804_v55 = vmul.f32 %v6277_v53, %v802_v54 }
 0x6fa   :  { %806 = vrot.lane.b32.xlu1 %v804_v55, %s6663_s18 }
 0x76c   :  { %v807_v57 = vpop.permute.xlu1 %806 }
 0x76d   :  { %v809_v58 = vadd.f32 %v807_v57, %v799_v56 }
 0x76f   :  { %6278 = vtanh.f32 %v809_v58 }
 0x779   :  { %v6279_v59 = vpop.eup %6278 }
 0x77a   :  { %812 = vrot.lane.b32.xlu0 %v6279_v59, %s6663_s18  ;;  %v42_v59 = vld [vmem:[%s7832_s0 + $0x38] sm:$0xff] }
 0x7ec   :  { %v813_v60 = vpop.permute.xlu0 %812 }
 0x7ed   :  { %v815_v61 = vmul.f32 %v6277_v53, %v813_v60 }
 0x7ef   :  { %817 = vrot.lane.b32.xlu1 %v815_v61, %s6664_s19 }
 0x861   :  { %v818_v62 = vpop.permute.xlu1 %817 }
 0x862   :  { %820 = vst.msk [vmem:[#allocation3 + $0x10] sm:$0xff] %vm83_vm0, %v818_v62  ;;  %5991 = vmatmul.mubr.msk.f32.vlgmr.msra.gmra.mrb[24].mxu1 %vm83_vm0, %v818_v62 }
 0x863   :  { %5994 = vmatpush3.msra.mxu1 %v6735_v3  ;;  %5995 = vmatprep.mubr.msk.f32.mxu1 %vm6661_vm1, %v6660_v5 }
 0x864   :  { %5998 = vmatprep.subr.mxu1 %v6660_v5 }
 0x935   :  { %v890_v0 = vpop.f32.mrb[24].mxu1 }
 0x936   :  { %v894_v1 = vadd.f32 %v890_v0, %v821_v63  ;;  %v5992_v2 = vpop.f32.mrb[25].mxu1 }
 0x938   :  { %6280 = vtanh.f32 %v894_v1  ;;  %v5586_v6 = vmul.f32 -1.442695, %v894_v1 }
 0x93a   :  { %6282 = vpow2.f32 %v5586_v6 }
 0x942   :  { %v6281_v4 = vpop.eup %6280 }
 0x943   :  { %904 = vrot.lane.b32.xlu0 %v6281_v4, %s6662_s17 }
 0x944   :  { %v6283_v7 = vpop.eup %6282 }
 0x945   :  { %v898_v8 = vadd.f32 1.0, %v6283_v7 }
 0x947   :  { %6284 = vrcp.f32 %v898_v8 }
 0x951   :  { %v6285_v9 = vpop.eup %6284 }
 0x952   :  { %v902_v12 = vmul.f32 %v6285_v9, %v809_v58  ;;  %v41_v58 = vld [vmem:[%s7832_s0 + $0x30] sm:$0xff] }
 0x953   :  { %5922 = vmatprep.mubr.msk.f32.mxu0 %vm83_vm0, %v41_v58 }
 0x954   :  { %5923 = vmatmul.mubr.msk.f32.gmra.mrb[6].mxu0 %vm83_vm0, %v42_v59 }
 0x9b5   :  { %v905_v10 = vpop.permute.xlu0 %904 }
 0x9b6   :  { %v907_v11 = vmul.f32 %v6285_v9, %v905_v10 }
 0x9b8   :  { %909 = vrot.lane.b32.xlu1 %v907_v11, %s6663_s18 }
 0xa27   :  { %v5924_v63 = vpop.f32.mrb[6].mxu0 }
 0xa28   :  { %v306_v0 = vadd.f32 %v5924_v63, %v6826_v23  ;;  %v300_v1 = vpop.f32.mrb[7].mxu0 }
 0xa29   :  { %v301_v2 = vadd.f32 %v6826_v23, %v300_v1 }
 0xa2a   :  { %v910_v13 = vpop.permute.xlu1 %909  ;;  %477 = vst.msk [vmem:[#allocation2 + $0x38] sm:$0xff] %vm469_vm2, %v306_v0 }
 0xa2b   :  { %v912_v14 = vadd.f32 %v910_v13, %v902_v12  ;;  %476 = vst.msk [vmem:[#allocation2 + $0x30] sm:$0xff] %vm469_vm2, %v301_v2 }
 0xa2d   :  { %6286 = vtanh.f32 %v912_v14 }
 0xa32   :  { %v1130_v6 = vld [vmem:[#allocation2 + $0x30] sm:$0xff] }
 0xa37   :  { %v6287_v17 = vpop.eup %6286 }
 0xa38   :  { %915 = vrot.lane.b32.xlu0 %v6287_v17, %s6663_s18 }
 0xaaa   :  { %v916_v18 = vpop.permute.xlu0 %915 }
 0xaab   :  { %v918_v19 = vmul.f32 %v6285_v9, %v916_v18 }
 0xaad   :  { %920 = vrot.lane.b32.xlu1 %v918_v19, %s6664_s19 }
 0xb1f   :  { %v921_v25 = vpop.permute.xlu1 %920 }
 0xb20   :  { %923 = vst.msk [vmem:[#allocation3 + $0x18] sm:$0xff] %vm83_vm0, %v921_v25  ;;  %5996 = vmatmul.mubr.msk.f32.vlgmr.msra.gmra.mrb[26].mxu1 %vm83_vm0, %v921_v25  ;;  %v1233_v25 = vld [vmem:[#allocation2 + $0x38] sm:$0xff] }
 0xb21   :  { %5999 = vmatpush3.msra.mxu1 %v6735_v3  ;;  %6000 = vmatprep.mubr.msk.f32.mxu1 %vm6661_vm1, %v6660_v5 }
 0xb22   :  { %6003 = vmatprep.subr.mxu1 %v6660_v5 }
 0xbf3   :  { %v993_v27 = vpop.f32.mrb[26].mxu1 }
 0xbf4   :  { %v997_v28 = vadd.f32 %v993_v27, %v924_v26  ;;  %v5997_v29 = vpop.f32.mrb[27].mxu1 }
 0xbf6   :  { %6288 = vtanh.f32 %v997_v28  ;;  %v5588_v31 = vmul.f32 -1.442695, %v997_v28 }
 0xbf8   :  { %6290 = vpow2.f32 %v5588_v31 }
 0xc00   :  { %v6289_v30 = vpop.eup %6288 }
 0xc01   :  { %1007 = vrot.lane.b32.xlu0 %v6289_v30, %s6662_s17 }
 0xc02   :  { %v6291_v32 = vpop.eup %6290 }
 0xc03   :  { %v1001_v33 = vadd.f32 1.0, %v6291_v32 }
 0xc05   :  { %6292 = vrcp.f32 %v1001_v33 }
 0xc0f   :  { %v6293_v34 = vpop.eup %6292 }
 0xc10   :  { %v1005_v37 = vmul.f32 %v6293_v34, %v912_v14 }
 0xc73   :  { %v1008_v35 = vpop.permute.xlu0 %1007 }
 0xc74   :  { %v1010_v36 = vmul.f32 %v6293_v34, %v1008_v35 }
 0xc76   :  { %1012 = vrot.lane.b32.xlu1 %v1010_v36, %s6663_s18 }
 0xce8   :  { %v1013_v38 = vpop.permute.xlu1 %1012 }
 0xce9   :  { %v1015_v39 = vadd.f32 %v1013_v38, %v1005_v37 }
 0xceb   :  { %6294 = vtanh.f32 %v1015_v39 }
 0xcf5   :  { %v6295_v40 = vpop.eup %6294 }
 0xcf6   :  { %1018 = vrot.lane.b32.xlu0 %v6295_v40, %s6663_s18  ;;  %v44_v40 = vld [vmem:[%s7832_s0 + $0x48] sm:$0xff] }
 0xd68   :  { %v1019_v41 = vpop.permute.xlu0 %1018 }
 0xd69   :  { %v1021_v42 = vmul.f32 %v6293_v34, %v1019_v41 }
 0xd6b   :  { %1023 = vrot.lane.b32.xlu1 %v1021_v42, %s6664_s19 }
 0xddd   :  { %v1024_v43 = vpop.permute.xlu1 %1023 }
 0xdde   :  { %1026 = vst.msk [vmem:[#allocation3 + $0x20] sm:$0xff] %vm83_vm0, %v1024_v43  ;;  %6001 = vmatmul.mubr.msk.f32.vlgmr.msra.gmra.mrb[28].mxu1 %vm83_vm0, %v1024_v43 }
 0xddf   :  { %6004 = vmatpush3.msra.mxu1 %v6735_v3  ;;  %6005 = vmatprep.mubr.msk.f32.mxu1 %vm6661_vm1, %v6660_v5 }
 0xde0   :  { %6008 = vmatprep.subr.mxu1 %v6660_v5 }
 0xeb1   :  { %v1096_v45 = vpop.f32.mrb[28].mxu1 }
 0xeb2   :  { %v1100_v46 = vadd.f32 %v1096_v45, %v1027_v44  ;;  %v6002_v47 = vpop.f32.mrb[29].mxu1 }
 0xeb4   :  { %6296 = vtanh.f32 %v1100_v46  ;;  %v5590_v49 = vmul.f32 -1.442695, %v1100_v46 }
 0xeb6   :  { %6298 = vpow2.f32 %v5590_v49 }
 0xebe   :  { %v6297_v48 = vpop.eup %6296 }
 0xebf   :  { %1110 = vrot.lane.b32.xlu0 %v6297_v48, %s6662_s17 }
 0xec0   :  { %v6299_v50 = vpop.eup %6298 }
 0xec1   :  { %v1104_v51 = vadd.f32 1.0, %v6299_v50 }
 0xec3   :  { %6300 = vrcp.f32 %v1104_v51 }
 0xecd   :  { %v6301_v52 = vpop.eup %6300 }
 0xece   :  { %v1108_v55 = vmul.f32 %v6301_v52, %v1015_v39  ;;  %v43_v39 = vld [vmem:[%s7832_s0 + $0x40] sm:$0xff] }
 0xecf   :  { %5925 = vmatprep.mubr.msk.f32.mxu0 %vm83_vm0, %v43_v39 }
 0xed0   :  { %5926 = vmatmul.mubr.msk.f32.gmra.mrb[8].mxu0 %vm83_vm0, %v44_v40 }
 0xf31   :  { %v1111_v53 = vpop.permute.xlu0 %1110 }
 0xf32   :  { %v1113_v54 = vmul.f32 %v6301_v52, %v1111_v53 }
 0xf34   :  { %1115 = vrot.lane.b32.xlu1 %v1113_v54, %s6663_s18 }
 0xfa3   :  { %v5927_v44 = vpop.f32.mrb[8].mxu0 }
 0xfa4   :  { %v316_v45 = vadd.f32 %v5927_v44, %v6826_v23  ;;  %v310_v46 = vpop.f32.mrb[9].mxu0 }
 0xfa5   :  { %v311_v47 = vadd.f32 %v6826_v23, %v310_v46 }
 0xfa6   :  { %v1116_v56 = vpop.permute.xlu1 %1115  ;;  %479 = vst.msk [vmem:[#allocation2 + $0x48] sm:$0xff] %vm469_vm2, %v316_v45 }
 0xfa7   :  { %v1118_v57 = vadd.f32 %v1116_v56, %v1108_v55  ;;  %478 = vst.msk [vmem:[#allocation2 + $0x40] sm:$0xff] %vm469_vm2, %v311_v47 }
 0xfa9   :  { %6302 = vtanh.f32 %v1118_v57 }
 0xfae   :  { %v1336_v49 = vld [vmem:[#allocation2 + $0x40] sm:$0xff] }
 0xfb3   :  { %v6303_v60 = vpop.eup %6302 }
 0xfb4   :  { %1121 = vrot.lane.b32.xlu0 %v6303_v60, %s6663_s18 }
0x1026   :  { %v1122_v61 = vpop.permute.xlu0 %1121 }
0x1027   :  { %v1124_v62 = vmul.f32 %v6301_v52, %v1122_v61 }
0x1029   :  { %1126 = vrot.lane.b32.xlu1 %v1124_v62, %s6664_s19 }
0x109b   :  { %v1127_v4 = vpop.permute.xlu1 %1126 }
0x109c   :  { %1129 = vst.msk [vmem:[#allocation3 + $0x28] sm:$0xff] %vm83_vm0, %v1127_v4  ;;  %6006 = vmatmul.mubr.msk.f32.vlgmr.msra.gmra.mrb[30].mxu1 %vm83_vm0, %v1127_v4  ;;  %v1439_v4 = vld [vmem:[#allocation2 + $0x48] sm:$0xff] }
0x109d   :  { %6009 = vmatpush3.msra.mxu1 %v6735_v3  ;;  %6010 = vmatprep.mubr.msk.f32.mxu1 %vm6661_vm1, %v6660_v5 }
0x109e   :  { %6013 = vmatprep.subr.mxu1 %v6660_v5 }
0x116f   :  { %v1199_v7 = vpop.f32.mrb[30].mxu1 }
0x1170   :  { %v1203_v8 = vadd.f32 %v1199_v7, %v1130_v6  ;;  %v6007_v9 = vpop.f32.mrb[31].mxu1 }
0x1172   :  { %6304 = vtanh.f32 %v1203_v8  ;;  %v5592_v11 = vmul.f32 -1.442695, %v1203_v8 }
0x1174   :  { %6306 = vpow2.f32 %v5592_v11 }
0x117c   :  { %v6305_v10 = vpop.eup %6304 }
0x117d   :  { %1213 = vrot.lane.b32.xlu0 %v6305_v10, %s6662_s17 }
0x117e   :  { %v6307_v12 = vpop.eup %6306 }
0x117f   :  { %v1207_v13 = vadd.f32 1.0, %v6307_v12 }
0x1181   :  { %6308 = vrcp.f32 %v1207_v13 }
0x118b   :  { %v6309_v14 = vpop.eup %6308 }
0x118c   :  { %v1211_v17 = vmul.f32 %v6309_v14, %v1118_v57 }
0x11ef   :  { %v1214_v15 = vpop.permute.xlu0 %1213 }
0x11f0   :  { %v1216_v16 = vmul.f32 %v6309_v14, %v1214_v15 }
0x11f2   :  { %1218 = vrot.lane.b32.xlu1 %v1216_v16, %s6663_s18 }
0x1264   :  { %v1219_v18 = vpop.permute.xlu1 %1218 }
0x1265   :  { %v1221_v19 = vadd.f32 %v1219_v18, %v1211_v17 }
0x1267   :  { %6310 = vtanh.f32 %v1221_v19 }
0x1271   :  { %v6311_v20 = vpop.eup %6310 }
0x1272   :  { %1224 = vrot.lane.b32.xlu0 %v6311_v20, %s6663_s18  ;;  %v46_v20 = vld [vmem:[%s7832_s0 + $0x58] sm:$0xff] }
0x12e4   :  { %v1225_v21 = vpop.permute.xlu0 %1224 }
0x12e5   :  { %v1227_v22 = vmul.f32 %v6309_v14, %v1225_v21 }
0x12e7   :  { %1229 = vrot.lane.b32.xlu1 %v1227_v22, %s6664_s19 }
0x1359   :  { %v1230_v24 = vpop.permute.xlu1 %1229 }
0x135a   :  { %1232 = vst.msk [vmem:[#allocation3 + $0x30] sm:$0xff] %vm83_vm0, %v1230_v24  ;;  %6011 = vmatmul.mubr.msk.f32.vlgmr.msra.gmra.mrb[32].mxu1 %vm83_vm0, %v1230_v24 }
0x135b   :  { %6014 = vmatpush3.msra.mxu1 %v6735_v3  ;;  %6015 = vmatprep.mubr.msk.f32.mxu1 %vm6661_vm1, %v6660_v5 }
0x135c   :  { %6018 = vmatprep.subr.mxu1 %v6660_v5 }
0x142d   :  { %v1302_v26 = vpop.f32.mrb[32].mxu1 }
0x142e   :  { %v1306_v27 = vadd.f32 %v1302_v26, %v1233_v25  ;;  %v6012_v28 = vpop.f32.mrb[33].mxu1 }
0x1430   :  { %6312 = vtanh.f32 %v1306_v27  ;;  %v5594_v30 = vmul.f32 -1.442695, %v1306_v27 }
0x1432   :  { %6314 = vpow2.f32 %v5594_v30 }
0x143a   :  { %v6313_v29 = vpop.eup %6312 }
0x143b   :  { %1316 = vrot.lane.b32.xlu0 %v6313_v29, %s6662_s17 }
0x143c   :  { %v6315_v31 = vpop.eup %6314 }
0x143d   :  { %v1310_v32 = vadd.f32 1.0, %v6315_v31 }
0x143f   :  { %6316 = vrcp.f32 %v1310_v32 }
0x1449   :  { %v6317_v33 = vpop.eup %6316 }
0x144a   :  { %v1314_v36 = vmul.f32 %v6317_v33, %v1221_v19  ;;  %v45_v19 = vld [vmem:[%s7832_s0 + $0x50] sm:$0xff] }
0x144b   :  { %5928 = vmatprep.mubr.msk.f32.mxu0 %vm83_vm0, %v45_v19 }
0x144c   :  { %5929 = vmatmul.mubr.msk.f32.gmra.mrb[10].mxu0 %vm83_vm0, %v46_v20 }
0x14ad   :  { %v1317_v34 = vpop.permute.xlu0 %1316 }
0x14ae   :  { %v1319_v35 = vmul.f32 %v6317_v33, %v1317_v34 }
0x14b0   :  { %1321 = vrot.lane.b32.xlu1 %v1319_v35, %s6663_s18 }
0x151f   :  { %v5930_v25 = vpop.f32.mrb[10].mxu0 }
0x1520   :  { %v326_v26 = vadd.f32 %v5930_v25, %v6826_v23  ;;  %v320_v27 = vpop.f32.mrb[11].mxu0 }
0x1521   :  { %v321_v28 = vadd.f32 %v6826_v23, %v320_v27 }
0x1522   :  { %v1322_v37 = vpop.permute.xlu1 %1321  ;;  %481 = vst.msk [vmem:[#allocation2 + $0x58] sm:$0xff] %vm469_vm2, %v326_v26 }
0x1523   :  { %v1324_v38 = vadd.f32 %v1322_v37, %v1314_v36  ;;  %480 = vst.msk [vmem:[#allocation2 + $0x50] sm:$0xff] %vm469_vm2, %v321_v28 }
0x1525   :  { %6318 = vtanh.f32 %v1324_v38 }
0x152a   :  { %v1542_v30 = vld [vmem:[#allocation2 + $0x50] sm:$0xff] }
0x152f   :  { %v6319_v41 = vpop.eup %6318 }
0x1530   :  { %1327 = vrot.lane.b32.xlu0 %v6319_v41, %s6663_s18 }
0x15a2   :  { %v1328_v42 = vpop.permute.xlu0 %1327 }
0x15a3   :  { %v1330_v43 = vmul.f32 %v6317_v33, %v1328_v42 }
0x15a5   :  { %1332 = vrot.lane.b32.xlu1 %v1330_v43, %s6664_s19 }
0x1617   :  { %v1333_v48 = vpop.permute.xlu1 %1332 }
0x1618   :  { %1335 = vst.msk [vmem:[#allocation3 + $0x38] sm:$0xff] %vm83_vm0, %v1333_v48  ;;  %6016 = vmatmul.mubr.msk.f32.vlgmr.msra.gmra.mrb[34].mxu1 %vm83_vm0, %v1333_v48  ;;  %v1645_v48 = vld [vmem:[#allocation2 + $0x58] sm:$0xff] }
0x1619   :  { %6019 = vmatpush3.msra.mxu1 %v6735_v3  ;;  %6020 = vmatprep.mubr.msk.f32.mxu1 %vm6661_vm1, %v6660_v5 }
0x161a   :  { %6023 = vmatprep.subr.mxu1 %v6660_v5 }
0x16eb   :  { %v1405_v50 = vpop.f32.mrb[34].mxu1 }
0x16ec   :  { %v1409_v51 = vadd.f32 %v1405_v50, %v1336_v49  ;;  %v6017_v52 = vpop.f32.mrb[35].mxu1 }
0x16ee   :  { %6320 = vtanh.f32 %v1409_v51  ;;  %v5596_v54 = vmul.f32 -1.442695, %v1409_v51 }
0x16f0   :  { %6322 = vpow2.f32 %v5596_v54 }
0x16f8   :  { %v6321_v53 = vpop.eup %6320 }
0x16f9   :  { %1419 = vrot.lane.b32.xlu0 %v6321_v53, %s6662_s17 }
0x16fa   :  { %v6323_v55 = vpop.eup %6322 }
0x16fb   :  { %v1413_v56 = vadd.f32 1.0, %v6323_v55 }
0x16fd   :  { %6324 = vrcp.f32 %v1413_v56 }
0x1707   :  { %v6325_v57 = vpop.eup %6324 }
0x1708   :  { %v1417_v60 = vmul.f32 %v6325_v57, %v1324_v38 }
0x176b   :  { %v1420_v58 = vpop.permute.xlu0 %1419 }
0x176c   :  { %v1422_v59 = vmul.f32 %v6325_v57, %v1420_v58 }
0x176e   :  { %1424 = vrot.lane.b32.xlu1 %v1422_v59, %s6663_s18 }
0x17e0   :  { %v1425_v61 = vpop.permute.xlu1 %1424 }
0x17e1   :  { %v1427_v62 = vadd.f32 %v1425_v61, %v1417_v60  ;;  %v47_v61 = vld [vmem:[%s7832_s0 + $0x60] sm:$0xff] }
0x17e2   :  { %5931 = vmatprep.mubr.msk.f32.mxu0 %vm83_vm0, %v47_v61 }
0x17e3   :  { %6326 = vtanh.f32 %v1427_v62 }
0x17ed   :  { %v6327_v63 = vpop.eup %6326 }
0x17ee   :  { %1430 = vrot.lane.b32.xlu0 %v6327_v63, %s6663_s18 }
0x1860   :  { %v1431_v0 = vpop.permute.xlu0 %1430 }
0x1861   :  { %v1433_v1 = vmul.f32 %v6325_v57, %v1431_v0 }
0x1863   :  { %1435 = vrot.lane.b32.xlu1 %v1433_v1, %s6664_s19 }
0x18d5   :  { %v1436_v2 = vpop.permute.xlu1 %1435 }
0x18d6   :  { %1438 = vst.msk [vmem:[#allocation3 + $0x40] sm:$0xff] %vm83_vm0, %v1436_v2  ;;  %6021 = vmatmul.mubr.msk.f32.vlgmr.msra.gmra.mrb[36].mxu1 %vm83_vm0, %v1436_v2 }
0x18d7   :  { %6024 = vmatpush3.msra.mxu1 %v6735_v3  ;;  %6025 = vmatprep.mubr.msk.f32.mxu1 %vm6661_vm1, %v6660_v5 }
0x18d8   :  { %6028 = vmatprep.subr.mxu1 %v6660_v5 }
0x19a9   :  { %v1508_v6 = vpop.f32.mrb[36].mxu1 }
0x19aa   :  { %v1512_v7 = vadd.f32 %v1508_v6, %v1439_v4  ;;  %v6022_v8 = vpop.f32.mrb[37].mxu1 }
0x19ac   :  { %6328 = vtanh.f32 %v1512_v7  ;;  %v5598_v10 = vmul.f32 -1.442695, %v1512_v7 }
0x19ae   :  { %6330 = vpow2.f32 %v5598_v10 }
0x19b6   :  { %v6329_v9 = vpop.eup %6328 }
0x19b7   :  { %1522 = vrot.lane.b32.xlu0 %v6329_v9, %s6662_s17  ;;  %v7059_v9 = vld [vmem:[%s7833_s2] sm:$0xff] }
0x19b8   :  { %v6331_v11 = vpop.eup %6330 }
0x19b9   :  { %v1516_v12 = vadd.f32 1.0, %v6331_v11 }
0x19bb   :  { %6332 = vrcp.f32 %v1516_v12 }
0x19c5   :  { %v6333_v13 = vpop.eup %6332 }
0x19c6   :  { %v1520_v16 = vmul.f32 %v6333_v13, %v1427_v62  ;;  %v48_v62 = vld [vmem:[%s7832_s0 + $0x68] sm:$0xff] }
0x19c7   :  { %5932 = vmatmul.mubr.msk.f32.gmra.mrb[12].mxu0 %vm83_vm0, %v48_v62 }
0x1a29   :  { %v1523_v14 = vpop.permute.xlu0 %1522 }
0x1a2a   :  { %v1525_v15 = vmul.f32 %v6333_v13, %v1523_v14 }
0x1a2c   :  { %1527 = vrot.lane.b32.xlu1 %v1525_v15, %s6663_s18 }
0x1a9a   :  { %v5933_v2 = vpop.f32.mrb[12].mxu0 }
0x1a9b   :  { %v336_v4 = vadd.f32 %v5933_v2, %v6826_v23  ;;  %v330_v6 = vpop.f32.mrb[13].mxu0 }
0x1a9c   :  { %v331_v7 = vadd.f32 %v6826_v23, %v330_v6 }
0x1a9d   :  { %483 = vst.msk [vmem:[#allocation2 + $0x68] sm:$0xff] %vm469_vm2, %v336_v4 }
0x1a9e   :  { %v1528_v17 = vpop.permute.xlu1 %1527  ;;  %482 = vst.msk [vmem:[#allocation2 + $0x60] sm:$0xff] %vm469_vm2, %v331_v7 }
0x1a9f   :  { %v1530_v18 = vadd.f32 %v1528_v17, %v1520_v16 }
0x1aa1   :  { %6334 = vtanh.f32 %v1530_v18 }
0x1aa4   :  { %v1851_v28 = vld [vmem:[#allocation2 + $0x68] sm:$0xff] }
0x1aa5   :  { %v1748_v23 = vld [vmem:[#allocation2 + $0x60] sm:$0xff] }
0x1aab   :  { %v6335_v21 = vpop.eup %6334 }
0x1aac   :  { %1533 = vrot.lane.b32.xlu0 %v6335_v21, %s6663_s18 }
0x1b1e   :  { %v1534_v22 = vpop.permute.xlu0 %1533 }
0x1b1f   :  { %v1536_v24 = vmul.f32 %v6333_v13, %v1534_v22 }
0x1b21   :  { %1538 = vrot.lane.b32.xlu1 %v1536_v24, %s6664_s19 }
0x1b93   :  { %v1539_v29 = vpop.permute.xlu1 %1538 }
0x1b94   :  { %1541 = vst.msk [vmem:[#allocation3 + $0x48] sm:$0xff] %vm83_vm0, %v1539_v29  ;;  %6026 = vmatmul.mubr.msk.f32.vlgmr.msra.gmra.mrb[38].mxu1 %vm83_vm0, %v1539_v29 }
0x1b95   :  { %6029 = vmatpush3.msra.mxu1 %v6735_v3  ;;  %6030 = vmatprep.mubr.msk.f32.mxu1 %vm6661_vm1, %v6660_v5 }
0x1b96   :  { %6033 = vmatprep.subr.mxu1 %v6660_v5 }
0x1c67   :  { %v1611_v31 = vpop.f32.mrb[38].mxu1 }
0x1c68   :  { %v1615_v32 = vadd.f32 %v1611_v31, %v1542_v30  ;;  %v6027_v33 = vpop.f32.mrb[39].mxu1 }
0x1c6a   :  { %6336 = vtanh.f32 %v1615_v32  ;;  %v5600_v35 = vmul.f32 -1.442695, %v1615_v32 }
0x1c6c   :  { %6338 = vpow2.f32 %v5600_v35 }
0x1c74   :  { %v6337_v34 = vpop.eup %6336 }
0x1c75   :  { %1625 = vrot.lane.b32.xlu0 %v6337_v34, %s6662_s17 }
0x1c76   :  { %v6339_v36 = vpop.eup %6338 }
0x1c77   :  { %v1619_v37 = vadd.f32 1.0, %v6339_v36 }
0x1c79   :  { %6340 = vrcp.f32 %v1619_v37 }
0x1c83   :  { %v6341_v38 = vpop.eup %6340 }
0x1c84   :  { %v1623_v41 = vmul.f32 %v6341_v38, %v1530_v18 }
0x1ce7   :  { %v1626_v39 = vpop.permute.xlu0 %1625 }
0x1ce8   :  { %v1628_v40 = vmul.f32 %v6341_v38, %v1626_v39 }
0x1cea   :  { %1630 = vrot.lane.b32.xlu1 %v1628_v40, %s6663_s18 }
0x1d5c   :  { %v1631_v42 = vpop.permute.xlu1 %1630 }
0x1d5d   :  { %v1633_v43 = vadd.f32 %v1631_v42, %v1623_v41  ;;  %v49_v42 = vld [vmem:[%s7832_s0 + $0x70] sm:$0xff] }
0x1d5e   :  { %5934 = vmatprep.mubr.msk.f32.mxu0 %vm83_vm0, %v49_v42 }
0x1d5f   :  { %6342 = vtanh.f32 %v1633_v43 }
0x1d69   :  { %v6343_v44 = vpop.eup %6342 }
0x1d6a   :  { %1636 = vrot.lane.b32.xlu0 %v6343_v44, %s6663_s18 }
0x1ddc   :  { %v1637_v45 = vpop.permute.xlu0 %1636 }
0x1ddd   :  { %v1639_v46 = vmul.f32 %v6341_v38, %v1637_v45 }
0x1ddf   :  { %1641 = vrot.lane.b32.xlu1 %v1639_v46, %s6664_s19 }
0x1e51   :  { %v1642_v47 = vpop.permute.xlu1 %1641 }
0x1e52   :  { %1644 = vst.msk [vmem:[#allocation3 + $0x50] sm:$0xff] %vm83_vm0, %v1642_v47  ;;  %6031 = vmatmul.mubr.msk.f32.vlgmr.msra.gmra.mrb[40].mxu1 %vm83_vm0, %v1642_v47 }
0x1e53   :  { %6034 = vmatpush3.msra.mxu1 %v6735_v3  ;;  %6035 = vmatprep.mubr.msk.f32.mxu1 %vm6661_vm1, %v6660_v5 }
0x1e54   :  { %6038 = vmatprep.subr.mxu1 %v6660_v5 }
0x1f25   :  { %v1714_v49 = vpop.f32.mrb[40].mxu1 }
0x1f26   :  { %v1718_v50 = vadd.f32 %v1714_v49, %v1645_v48  ;;  %v6032_v51 = vpop.f32.mrb[41].mxu1  ;;  %v7090_v48 = vld [vmem:[%s7834_s3] ss:$0 sm:$0xff] }
0x1f28   :  { %6344 = vtanh.f32 %v1718_v50  ;;  %v5602_v53 = vmul.f32 -1.442695, %v1718_v50 }
0x1f2a   :  { %6346 = vpow2.f32 %v5602_v53 }
0x1f32   :  { %v6345_v52 = vpop.eup %6344 }
0x1f33   :  { %1728 = vrot.lane.b32.xlu0 %v6345_v52, %s6662_s17 }
0x1f34   :  { %v6347_v54 = vpop.eup %6346 }
0x1f35   :  { %v1722_v55 = vadd.f32 1.0, %v6347_v54 }
0x1f37   :  { %6348 = vrcp.f32 %v1722_v55 }
0x1f41   :  { %v6349_v56 = vpop.eup %6348 }
0x1f42   :  { %v1726_v58 = vmul.f32 %v6349_v56, %v1633_v43  ;;  %v50_v43 = vld [vmem:[%s7832_s0 + $0x78] sm:$0xff] }
0x1f43   :  { %5935 = vmatmul.mubr.msk.f32.gmra.mrb[14].mxu0 %vm83_vm0, %v50_v43 }
0x1fa5   :  { %v1729_v3 = vpop.permute.xlu0 %1728 }
0x1fa6   :  { %v1731_v57 = vmul.f32 %v6349_v56, %v1729_v3 }
0x1fa8   :  { %1733 = vrot.lane.b32.xlu1 %v1731_v57, %s6663_s18 }
0x2016   :  { %v5936_v47 = vpop.f32.mrb[14].mxu0 }
0x2017   :  { %v346_v49 = vadd.f32 %v7090_v48, %v5936_v47  ;;  %v340_v50 = vpop.f32.mrb[15].mxu0 }
0x2018   :  { %v341_v51 = vadd.f32 %v7090_v48, %v340_v50 }
0x2019   :  { %485 = vst.msk [vmem:[#allocation2 + $0x78] sm:$0xff] %vm469_vm2, %v346_v49 }
0x201a   :  { %v1734_v59 = vpop.permute.xlu1 %1733  ;;  %484 = vst.msk [vmem:[#allocation2 + $0x70] sm:$0xff] %vm469_vm2, %v341_v51 }
0x201b   :  { %v1736_v60 = vadd.f32 %v1734_v59, %v1726_v58 }
0x201d   :  { %6350 = vtanh.f32 %v1736_v60 }
0x2021   :  { %v1954_v53 = vld [vmem:[#allocation2 + $0x70] sm:$0xff] }
0x2027   :  { %v6351_v63 = vpop.eup %6350 }
0x2028   :  { %1739 = vrot.lane.b32.xlu0 %v6351_v63, %s6663_s18 }
0x209a   :  { %v1740_v0 = vpop.permute.xlu0 %1739 }
0x209b   :  { %v1742_v1 = vmul.f32 %v6349_v56, %v1740_v0 }
0x209d   :  { %1744 = vrot.lane.b32.xlu1 %v1742_v1, %s6664_s19 }
0x210f   :  { %v1745_v8 = vpop.permute.xlu1 %1744 }
0x2110   :  { %1747 = vst.msk [vmem:[#allocation3 + $0x58] sm:$0xff] %vm83_vm0, %v1745_v8  ;;  %6036 = vmatmul.mubr.msk.f32.vlgmr.msra.gmra.mrb[42].mxu1 %vm83_vm0, %v1745_v8  ;;  %v2057_v8 = vld [vmem:[#allocation2 + $0x78] sm:$0xff] }
0x2111   :  { %6039 = vmatpush3.msra.mxu1 %v7059_v9  ;;  %6040 = vmatprep.mubr.msk.f32.mxu1 %vm6661_vm1, %v6660_v5 }
0x2112   :  { %6043 = vmatprep.subr.mxu1 %v6660_v5 }
0x21e3   :  { %v1817_v10 = vpop.f32.mrb[42].mxu1 }
0x21e4   :  { %v1821_v11 = vadd.f32 %v1817_v10, %v1748_v23  ;;  %v6037_v12 = vpop.f32.mrb[43].mxu1 }
0x21e6   :  { %6352 = vtanh.f32 %v1821_v11  ;;  %v5604_v14 = vmul.f32 -1.442695, %v1821_v11 }
0x21e8   :  { %6354 = vpow2.f32 %v5604_v14 }
0x21f0   :  { %v6353_v13 = vpop.eup %6352 }
0x21f1   :  { %1831 = vrot.lane.b32.xlu0 %v6353_v13, %s6662_s17 }
0x21f2   :  { %v6355_v15 = vpop.eup %6354 }
0x21f3   :  { %v1825_v16 = vadd.f32 1.0, %v6355_v15 }
0x21f5   :  { %6356 = vrcp.f32 %v1825_v16 }
0x21ff   :  { %v6357_v17 = vpop.eup %6356 }
0x2200   :  { %v1829_v20 = vmul.f32 %v6357_v17, %v1736_v60 }
0x2263   :  { %v1832_v18 = vpop.permute.xlu0 %1831 }
0x2264   :  { %v1834_v19 = vmul.f32 %v6357_v17, %v1832_v18 }
0x2266   :  { %1836 = vrot.lane.b32.xlu1 %v1834_v19, %s6663_s18 }
0x22d8   :  { %v1837_v21 = vpop.permute.xlu1 %1836 }
0x22d9   :  { %v1839_v22 = vadd.f32 %v1837_v21, %v1829_v20 }
0x22db   :  { %6358 = vtanh.f32 %v1839_v22 }
0x22e5   :  { %v6359_v24 = vpop.eup %6358 }
0x22e6   :  { %1842 = vrot.lane.b32.xlu0 %v6359_v24, %s6663_s18  ;;  %v52_v24 = vld [vmem:[%s7832_s0 + $0x88] sm:$0xff] }
0x2358   :  { %v1843_v25 = vpop.permute.xlu0 %1842 }
0x2359   :  { %v1845_v26 = vmul.f32 %v6357_v17, %v1843_v25 }
0x235b   :  { %1847 = vrot.lane.b32.xlu1 %v1845_v26, %s6664_s19 }
0x23cd   :  { %v1848_v27 = vpop.permute.xlu1 %1847 }
0x23ce   :  { %1850 = vst.msk [vmem:[#allocation3 + $0x60] sm:$0xff] %vm83_vm0, %v1848_v27  ;;  %6041 = vmatmul.mubr.msk.f32.vlgmr.msra.gmra.mrb[44].mxu1 %vm83_vm0, %v1848_v27 }
0x23cf   :  { %6044 = vmatpush3.msra.mxu1 %v7059_v9  ;;  %6045 = vmatprep.mubr.msk.f32.mxu1 %vm6661_vm1, %v6660_v5 }
0x23d0   :  { %6048 = vmatprep.subr.mxu1 %v6660_v5 }
0x24a1   :  { %v1920_v29 = vpop.f32.mrb[44].mxu1 }
0x24a2   :  { %v1924_v30 = vadd.f32 %v1920_v29, %v1851_v28  ;;  %v6042_v31 = vpop.f32.mrb[45].mxu1 }
0x24a4   :  { %6360 = vtanh.f32 %v1924_v30  ;;  %v5606_v33 = vmul.f32 -1.442695, %v1924_v30 }
0x24a6   :  { %6362 = vpow2.f32 %v5606_v33 }
0x24ae   :  { %v6361_v32 = vpop.eup %6360 }
0x24af   :  { %1934 = vrot.lane.b32.xlu0 %v6361_v32, %s6662_s17 }
0x24b0   :  { %v6363_v34 = vpop.eup %6362 }
0x24b1   :  { %v1928_v35 = vadd.f32 1.0, %v6363_v34 }
0x24b3   :  { %6364 = vrcp.f32 %v1928_v35 }
0x24bd   :  { %v6365_v36 = vpop.eup %6364 }
0x24be   :  { %v1932_v39 = vmul.f32 %v6365_v36, %v1839_v22  ;;  %v51_v22 = vld [vmem:[%s7832_s0 + $0x80] sm:$0xff] }
0x24bf   :  { %5937 = vmatprep.mubr.msk.f32.mxu0 %vm83_vm0, %v51_v22 }
0x24c0   :  { %5938 = vmatmul.mubr.msk.f32.gmra.mrb[16].mxu0 %vm83_vm0, %v52_v24 }
0x2521   :  { %v1935_v37 = vpop.permute.xlu0 %1934 }
0x2522   :  { %v1937_v38 = vmul.f32 %v6365_v36, %v1935_v37 }
0x2524   :  { %1939 = vrot.lane.b32.xlu1 %v1937_v38, %s6663_s18 }
0x2593   :  { %v5939_v28 = vpop.f32.mrb[16].mxu0 }
0x2594   :  { %v356_v29 = vadd.f32 %v7090_v48, %v5939_v28  ;;  %v350_v30 = vpop.f32.mrb[17].mxu0 }
0x2595   :  { %v351_v31 = vadd.f32 %v7090_v48, %v350_v30 }
0x2596   :  { %v1940_v40 = vpop.permute.xlu1 %1939  ;;  %487 = vst.msk [vmem:[#allocation2 + $0x88] sm:$0xff] %vm469_vm2, %v356_v29 }
0x2597   :  { %v1942_v41 = vadd.f32 %v1940_v40, %v1932_v39  ;;  %486 = vst.msk [vmem:[#allocation2 + $0x80] sm:$0xff] %vm469_vm2, %v351_v31 }
0x2599   :  { %6366 = vtanh.f32 %v1942_v41 }
0x259e   :  { %v2160_v33 = vld [vmem:[#allocation2 + $0x80] sm:$0xff] }
0x25a3   :  { %v6367_v44 = vpop.eup %6366 }
0x25a4   :  { %1945 = vrot.lane.b32.xlu0 %v6367_v44, %s6663_s18 }
0x2616   :  { %v1946_v45 = vpop.permute.xlu0 %1945 }
0x2617   :  { %v1948_v46 = vmul.f32 %v6365_v36, %v1946_v45 }
0x2619   :  { %1950 = vrot.lane.b32.xlu1 %v1948_v46, %s6664_s19 }
0x268b   :  { %v1951_v52 = vpop.permute.xlu1 %1950 }
0x268c   :  { %1953 = vst.msk [vmem:[#allocation3 + $0x68] sm:$0xff] %vm83_vm0, %v1951_v52  ;;  %6046 = vmatmul.mubr.msk.f32.vlgmr.msra.gmra.mrb[46].mxu1 %vm83_vm0, %v1951_v52  ;;  %v2263_v52 = vld [vmem:[#allocation2 + $0x88] sm:$0xff] }
0x268d   :  { %6049 = vmatpush3.msra.mxu1 %v7059_v9  ;;  %6050 = vmatprep.mubr.msk.f32.mxu1 %vm6661_vm1, %v6660_v5 }
0x268e   :  { %6053 = vmatprep.subr.mxu1 %v6660_v5 }
0x275f   :  { %v2023_v54 = vpop.f32.mrb[46].mxu1 }
0x2760   :  { %v2027_v55 = vadd.f32 %v2023_v54, %v1954_v53  ;;  %v6047_v56 = vpop.f32.mrb[47].mxu1 }
0x2762   :  { %6368 = vtanh.f32 %v2027_v55  ;;  %v5608_v57 = vmul.f32 -1.442695, %v2027_v55 }
0x2764   :  { %6370 = vpow2.f32 %v5608_v57 }
0x276c   :  { %v6369_v3 = vpop.eup %6368 }
0x276d   :  { %2037 = vrot.lane.b32.xlu0 %v6369_v3, %s6662_s17 }
0x276e   :  { %v6371_v58 = vpop.eup %6370 }
0x276f   :  { %v2031_v59 = vadd.f32 1.0, %v6371_v58 }
0x2771   :  { %6372 = vrcp.f32 %v2031_v59 }
0x277b   :  { %v6373_v60 = vpop.eup %6372 }
0x277c   :  { %v2035_v63 = vmul.f32 %v6373_v60, %v1942_v41 }
0x27df   :  { %v2038_v61 = vpop.permute.xlu0 %2037 }
0x27e0   :  { %v2040_v62 = vmul.f32 %v6373_v60, %v2038_v61 }
0x27e2   :  { %2042 = vrot.lane.b32.xlu1 %v2040_v62, %s6663_s18 }
0x2854   :  { %v2043_v0 = vpop.permute.xlu1 %2042 }
0x2855   :  { %v2045_v1 = vadd.f32 %v2043_v0, %v2035_v63 }
0x2857   :  { %6374 = vtanh.f32 %v2045_v1 }
0x2861   :  { %v6375_v2 = vpop.eup %6374 }
0x2862   :  { %2048 = vrot.lane.b32.xlu0 %v6375_v2, %s6663_s18  ;;  %v54_v2 = vld [vmem:[%s7832_s0 + $0x98] sm:$0xff] }
0x28d4   :  { %v2049_v4 = vpop.permute.xlu0 %2048 }
0x28d5   :  { %v2051_v6 = vmul.f32 %v6373_v60, %v2049_v4 }
0x28d7   :  { %2053 = vrot.lane.b32.xlu1 %v2051_v6, %s6664_s19 }
0x2949   :  { %v2054_v7 = vpop.permute.xlu1 %2053 }
0x294a   :  { %2056 = vst.msk [vmem:[#allocation3 + $0x70] sm:$0xff] %vm83_vm0, %v2054_v7  ;;  %6051 = vmatmul.mubr.msk.f32.vlgmr.msra.gmra.mrb[48].mxu1 %vm83_vm0, %v2054_v7 }
0x294b   :  { %6054 = vmatpush3.msra.mxu1 %v7059_v9  ;;  %6055 = vmatprep.mubr.msk.f32.mxu1 %vm6661_vm1, %v6660_v5 }
0x294c   :  { %6058 = vmatprep.subr.mxu1 %v6660_v5 }
0x2a1d   :  { %v2126_v23 = vpop.f32.mrb[48].mxu1 }
0x2a1e   :  { %v2130_v10 = vadd.f32 %v2126_v23, %v2057_v8  ;;  %v6052_v11 = vpop.f32.mrb[49].mxu1 }
0x2a20   :  { %6376 = vtanh.f32 %v2130_v10  ;;  %v5610_v13 = vmul.f32 -1.442695, %v2130_v10 }
0x2a22   :  { %6378 = vpow2.f32 %v5610_v13 }
0x2a2a   :  { %v6377_v12 = vpop.eup %6376 }
0x2a2b   :  { %2140 = vrot.lane.b32.xlu0 %v6377_v12, %s6662_s17 }
0x2a2c   :  { %v6379_v14 = vpop.eup %6378 }
0x2a2d   :  { %v2134_v15 = vadd.f32 1.0, %v6379_v14 }
0x2a2f   :  { %6380 = vrcp.f32 %v2134_v15 }
0x2a39   :  { %v6381_v16 = vpop.eup %6380 }
0x2a3a   :  { %v2138_v19 = vmul.f32 %v6381_v16, %v2045_v1  ;;  %v53_v1 = vld [vmem:[%s7832_s0 + $0x90] sm:$0xff] }
0x2a3b   :  { %5940 = vmatprep.mubr.msk.f32.mxu0 %vm83_vm0, %v53_v1 }
0x2a3c   :  { %5941 = vmatmul.mubr.msk.f32.gmra.mrb[18].mxu0 %vm83_vm0, %v54_v2 }
0x2a9d   :  { %v2141_v17 = vpop.permute.xlu0 %2140 }
0x2a9e   :  { %v2143_v18 = vmul.f32 %v6381_v16, %v2141_v17 }
0x2aa0   :  { %2145 = vrot.lane.b32.xlu1 %v2143_v18, %s6663_s18 }
0x2b0f   :  { %v5942_v8 = vpop.f32.mrb[18].mxu0 }
0x2b10   :  { %v366_v23 = vadd.f32 %v7090_v48, %v5942_v8  ;;  %v360_v10 = vpop.f32.mrb[19].mxu0 }
0x2b11   :  { %v361_v11 = vadd.f32 %v7090_v48, %v360_v10 }
0x2b12   :  { %v2146_v20 = vpop.permute.xlu1 %2145  ;;  %489 = vst.msk [vmem:[#allocation2 + $0x98] sm:$0xff] %vm469_vm2, %v366_v23 }
0x2b13   :  { %v2148_v21 = vadd.f32 %v2146_v20, %v2138_v19  ;;  %488 = vst.msk [vmem:[#allocation2 + $0x90] sm:$0xff] %vm469_vm2, %v361_v11 }
0x2b15   :  { %6382 = vtanh.f32 %v2148_v21 }
0x2b1a   :  { %v2366_v13 = vld [vmem:[#allocation2 + $0x90] sm:$0xff] }
0x2b1f   :  { %v6383_v25 = vpop.eup %6382 }
0x2b20   :  { %2151 = vrot.lane.b32.xlu0 %v6383_v25, %s6663_s18 }
0x2b92   :  { %v2152_v26 = vpop.permute.xlu0 %2151 }
0x2b93   :  { %v2154_v27 = vmul.f32 %v6381_v16, %v2152_v26 }
0x2b95   :  { %2156 = vrot.lane.b32.xlu1 %v2154_v27, %s6664_s19 }
0x2c07   :  { %v2157_v32 = vpop.permute.xlu1 %2156 }
0x2c08   :  { %2159 = vst.msk [vmem:[#allocation3 + $0x78] sm:$0xff] %vm83_vm0, %v2157_v32  ;;  %6056 = vmatmul.mubr.msk.f32.vlgmr.msra.gmra.mrb[50].mxu1 %vm83_vm0, %v2157_v32  ;;  %v2469_v32 = vld [vmem:[#allocation2 + $0x98] sm:$0xff] }
0x2c09   :  { %6059 = vmatpush3.msra.mxu1 %v7059_v9  ;;  %6060 = vmatprep.mubr.msk.f32.mxu1 %vm6661_vm1, %v6660_v5 }
0x2c0a   :  { %6063 = vmatprep.subr.mxu1 %v6660_v5 }
0x2cdb   :  { %v2229_v34 = vpop.f32.mrb[50].mxu1 }
0x2cdc   :  { %v2233_v35 = vadd.f32 %v2229_v34, %v2160_v33  ;;  %v6057_v36 = vpop.f32.mrb[51].mxu1 }
0x2cde   :  { %6384 = vtanh.f32 %v2233_v35  ;;  %v5612_v38 = vmul.f32 -1.442695, %v2233_v35 }
0x2ce0   :  { %6386 = vpow2.f32 %v5612_v38 }
0x2ce8   :  { %v6385_v37 = vpop.eup %6384 }
0x2ce9   :  { %2243 = vrot.lane.b32.xlu0 %v6385_v37, %s6662_s17 }
0x2cea   :  { %v6387_v39 = vpop.eup %6386 }
0x2ceb   :  { %v2237_v40 = vadd.f32 1.0, %v6387_v39 }
0x2ced   :  { %6388 = vrcp.f32 %v2237_v40 }
0x2cf7   :  { %v6389_v41 = vpop.eup %6388 }
0x2cf8   :  { %v2241_v44 = vmul.f32 %v6389_v41, %v2148_v21 }
0x2d5b   :  { %v2244_v42 = vpop.permute.xlu0 %2243 }
0x2d5c   :  { %v2246_v43 = vmul.f32 %v6389_v41, %v2244_v42 }
0x2d5e   :  { %2248 = vrot.lane.b32.xlu1 %v2246_v43, %s6663_s18 }
0x2dd0   :  { %v2249_v45 = vpop.permute.xlu1 %2248 }
0x2dd1   :  { %v2251_v46 = vadd.f32 %v2249_v45, %v2241_v44 }
0x2dd3   :  { %6390 = vtanh.f32 %v2251_v46 }
0x2ddd   :  { %v6391_v47 = vpop.eup %6390 }
0x2dde   :  { %2254 = vrot.lane.b32.xlu0 %v6391_v47, %s6663_s18  ;;  %v56_v47 = vld [vmem:[%s7832_s0 + $0xa8] sm:$0xff] }
0x2e50   :  { %v2255_v49 = vpop.permute.xlu0 %2254 }
0x2e51   :  { %v2257_v50 = vmul.f32 %v6389_v41, %v2255_v49 }
0x2e53   :  { %2259 = vrot.lane.b32.xlu1 %v2257_v50, %s6664_s19 }
0x2ec5   :  { %v2260_v51 = vpop.permute.xlu1 %2259 }
0x2ec6   :  { %2262 = vst.msk [vmem:[#allocation3 + $0x80] sm:$0xff] %vm83_vm0, %v2260_v51  ;;  %6061 = vmatmul.mubr.msk.f32.vlgmr.msra.gmra.mrb[52].mxu1 %vm83_vm0, %v2260_v51 }
0x2ec7   :  { %6064 = vmatpush3.msra.mxu1 %v7059_v9  ;;  %6065 = vmatprep.mubr.msk.f32.mxu1 %vm6661_vm1, %v6660_v5 }
0x2ec8   :  { %6068 = vmatprep.subr.mxu1 %v6660_v5 }
0x2f99   :  { %v2332_v53 = vpop.f32.mrb[52].mxu1 }
0x2f9a   :  { %v2336_v54 = vadd.f32 %v2332_v53, %v2263_v52  ;;  %v6062_v55 = vpop.f32.mrb[53].mxu1 }
0x2f9c   :  { %6392 = vtanh.f32 %v2336_v54  ;;  %v5614_v3 = vmul.f32 -1.442695, %v2336_v54 }
0x2f9e   :  { %6394 = vpow2.f32 %v5614_v3 }
0x2fa6   :  { %v6393_v56 = vpop.eup %6392 }
0x2fa7   :  { %2346 = vrot.lane.b32.xlu0 %v6393_v56, %s6662_s17 }
0x2fa8   :  { %v6395_v57 = vpop.eup %6394 }
0x2fa9   :  { %v2340_v58 = vadd.f32 1.0, %v6395_v57 }
0x2fab   :  { %6396 = vrcp.f32 %v2340_v58 }
0x2fb5   :  { %v6397_v59 = vpop.eup %6396 }
0x2fb6   :  { %v2344_v62 = vmul.f32 %v6397_v59, %v2251_v46  ;;  %v55_v46 = vld [vmem:[%s7832_s0 + $0xa0] sm:$0xff] }
0x2fb7   :  { %5943 = vmatprep.mubr.msk.f32.mxu0 %vm83_vm0, %v55_v46 }
0x2fb8   :  { %5944 = vmatmul.mubr.msk.f32.gmra.mrb[20].mxu0 %vm83_vm0, %v56_v47 }
0x2fb9   :  { %6075 = vmatprep.mubr.msk.f32.mxu0 %vm6661_vm1, %v6660_v5 }
0x3019   :  { %v2347_v60 = vpop.permute.xlu0 %2346 }
0x301a   :  { %v2349_v61 = vmul.f32 %v6397_v59, %v2347_v60 }
0x301c   :  { %2351 = vrot.lane.b32.xlu1 %v2349_v61, %s6663_s18 }
0x308b   :  { %v5945_v52 = vpop.f32.mrb[20].mxu0 }
0x308c   :  { %v376_v53 = vadd.f32 %v7090_v48, %v5945_v52  ;;  %v370_v54 = vpop.f32.mrb[21].mxu0 }
0x308d   :  { %v371_v55 = vadd.f32 %v7090_v48, %v370_v54 }
0x308e   :  { %v2352_v63 = vpop.permute.xlu1 %2351  ;;  %491 = vst.msk [vmem:[#allocation2 + $0xa8] sm:$0xff] %vm469_vm2, %v376_v53 }
0x308f   :  { %v2354_v0 = vadd.f32 %v2352_v63, %v2344_v62  ;;  %490 = vst.msk [vmem:[#allocation2 + $0xa0] sm:$0xff] %vm469_vm2, %v371_v55 }
0x3091   :  { %6398 = vtanh.f32 %v2354_v0 }
0x3095   :  { %v2675_v11 = vld [vmem:[#allocation2 + $0xa8] sm:$0xff] }
0x3096   :  { %v2572_v3 = vld [vmem:[#allocation2 + $0xa0] sm:$0xff] }
0x309b   :  { %v6399_v4 = vpop.eup %6398 }
0x309c   :  { %2357 = vrot.lane.b32.xlu0 %v6399_v4, %s6663_s18 }
0x310e   :  { %v2358_v6 = vpop.permute.xlu0 %2357 }
0x310f   :  { %v2360_v7 = vmul.f32 %v6397_v59, %v2358_v6 }
0x3111   :  { %2362 = vrot.lane.b32.xlu1 %v2360_v7, %s6664_s19 }
0x3183   :  { %v2363_v12 = vpop.permute.xlu1 %2362 }
0x3184   :  { %2365 = vst.msk [vmem:[#allocation3 + $0x88] sm:$0xff] %vm83_vm0, %v2363_v12  ;;  %6066 = vmatmul.mubr.msk.f32.vlgmr.msra.gmra.mrb[54].mxu1 %vm83_vm0, %v2363_v12 }
0x3185   :  { %6069 = vmatpush3.msra.mxu1 %v7059_v9  ;;  %6070 = vmatprep.mubr.msk.f32.mxu1 %vm6661_vm1, %v6660_v5 }
0x3186   :  { %6078 = vmatprep.subr.mxu1 %v6660_v5 }
0x3257   :  { %v2435_v14 = vpop.f32.mrb[54].mxu1 }
0x3258   :  { %v2439_v15 = vadd.f32 %v2435_v14, %v2366_v13  ;;  %v6067_v16 = vpop.f32.mrb[55].mxu1 }
0x325a   :  { %6400 = vtanh.f32 %v2439_v15  ;;  %v5616_v18 = vmul.f32 -1.442695, %v2439_v15 }
0x325c   :  { %6402 = vpow2.f32 %v5616_v18 }
0x3264   :  { %v6401_v17 = vpop.eup %6400 }
0x3265   :  { %2449 = vrot.lane.b32.xlu0 %v6401_v17, %s6662_s17 }
0x3266   :  { %v6403_v19 = vpop.eup %6402 }
0x3267   :  { %v2443_v20 = vadd.f32 1.0, %v6403_v19 }
0x3269   :  { %6404 = vrcp.f32 %v2443_v20 }
0x3273   :  { %v6405_v21 = vpop.eup %6404 }
0x3274   :  { %v2447_v25 = vmul.f32 %v6405_v21, %v2354_v0 }
0x32d7   :  { %v2450_v22 = vpop.permute.xlu0 %2449 }
0x32d8   :  { %v2452_v24 = vmul.f32 %v6405_v21, %v2450_v22 }
0x32da   :  { %2454 = vrot.lane.b32.xlu1 %v2452_v24, %s6663_s18 }
0x334c   :  { %v2455_v26 = vpop.permute.xlu1 %2454 }
0x334d   :  { %v2457_v27 = vadd.f32 %v2455_v26, %v2447_v25 }
0x334f   :  { %6406 = vtanh.f32 %v2457_v27 }
0x3359   :  { %v6407_v28 = vpop.eup %6406 }
0x335a   :  { %2460 = vrot.lane.b32.xlu0 %v6407_v28, %s6663_s18 }
0x33cc   :  { %v2461_v29 = vpop.permute.xlu0 %2460 }
0x33cd   :  { %v2463_v30 = vmul.f32 %v6405_v21, %v2461_v29 }
0x33cf   :  { %2465 = vrot.lane.b32.xlu1 %v2463_v30, %s6664_s19  ;;  %v2778_v30 = vld [vmem:[#allocation2 + $0xb0] sm:$0xff] }
0x3441   :  { %v2466_v31 = vpop.permute.xlu1 %2465 }
0x3442   :  { %2468 = vst.msk [vmem:[#allocation3 + $0x90] sm:$0xff] %vm83_vm0, %v2466_v31  ;;  %6071 = vmatmul.mubr.msk.f32.vlgmr.msra.gmra.mrb[56].mxu1 %vm83_vm0, %v2466_v31 }
0x3443   :  { %6079 = vmatpush3.msra.mxu1 %v7059_v9  ;;  %6080 = vmatprep.mubr.msk.f32.mxu1 %vm6661_vm1, %v6660_v5 }
0x3444   :  { %6088 = vmatprep.subr.mxu1 %v6660_v5 }
0x3515   :  { %v2538_v33 = vpop.f32.mrb[56].mxu1 }
0x3516   :  { %v2542_v34 = vadd.f32 %v2538_v33, %v2469_v32  ;;  %v6072_v35 = vpop.f32.mrb[57].mxu1 }
0x3518   :  { %6408 = vtanh.f32 %v2542_v34  ;;  %v5618_v37 = vmul.f32 -1.442695, %v2542_v34 }
0x351a   :  { %6410 = vpow2.f32 %v5618_v37 }
0x3522   :  { %v6409_v36 = vpop.eup %6408 }
0x3523   :  { %2552 = vrot.lane.b32.xlu0 %v6409_v36, %s6662_s17 }
0x3524   :  { %v6411_v38 = vpop.eup %6410 }
0x3525   :  { %v2546_v39 = vadd.f32 1.0, %v6411_v38 }
0x3527   :  { %6412 = vrcp.f32 %v2546_v39 }
0x3531   :  { %v6413_v40 = vpop.eup %6412 }
0x3532   :  { %v2550_v43 = vmul.f32 %v6413_v40, %v2457_v27 }
0x3595   :  { %v2553_v41 = vpop.permute.xlu0 %2552 }
0x3596   :  { %v2555_v42 = vmul.f32 %v6413_v40, %v2553_v41 }
0x3598   :  { %2557 = vrot.lane.b32.xlu1 %v2555_v42, %s6663_s18 }
0x360a   :  { %v2558_v44 = vpop.permute.xlu1 %2557 }
0x360b   :  { %v2560_v45 = vadd.f32 %v2558_v44, %v2550_v43 }
0x360d   :  { %6414 = vtanh.f32 %v2560_v45 }
0x3617   :  { %v6415_v49 = vpop.eup %6414 }
0x3618   :  { %2563 = vrot.lane.b32.xlu0 %v6415_v49, %s6663_s18  ;;  %v2881_v49 = vld [vmem:[#allocation2 + $0xb8] sm:$0xff] }
0x368a   :  { %v2564_v50 = vpop.permute.xlu0 %2563 }
0x368b   :  { %v2566_v51 = vmul.f32 %v6413_v40, %v2564_v50 }
0x368d   :  { %2568 = vrot.lane.b32.xlu1 %v2566_v51, %s6664_s19 }
0x36ff   :  { %v2569_v56 = vpop.permute.xlu1 %2568 }
0x3700   :  { %2571 = vst.msk [vmem:[#allocation3 + $0x98] sm:$0xff] %vm83_vm0, %v2569_v56  ;;  %6076 = vmatmul.mubr.msk.f32.vlgmr.msra.gmra.mrb[22].mxu0 %vm83_vm0, %v2569_v56 }
0x3701   :  { %6084 = vmatpush3.msra.mxu0 %v7059_v9  ;;  %6085 = vmatprep.mubr.msk.f32.mxu0 %vm6661_vm1, %v6660_v5 }
0x3702   :  { %6093 = vmatprep.subr.mxu0 %v6660_v5 }
0x37d3   :  { %v2641_v57 = vpop.f32.mrb[22].mxu0 }
0x37d4   :  { %v2645_v58 = vadd.f32 %v2641_v57, %v2572_v3  ;;  %v6077_v48 = vpop.f32.mrb[23].mxu0 }
0x37d6   :  { %6416 = vtanh.f32 %v2645_v58  ;;  %v5620_v60 = vmul.f32 -1.442695, %v2645_v58 }
0x37d8   :  { %6418 = vpow2.f32 %v5620_v60 }
0x37e0   :  { %v6417_v59 = vpop.eup %6416 }
0x37e1   :  { %2655 = vrot.lane.b32.xlu0 %v6417_v59, %s6662_s17 }
0x37e2   :  { %v6419_v61 = vpop.eup %6418 }
0x37e3   :  { %v2649_v62 = vadd.f32 1.0, %v6419_v61 }
0x37e5   :  { %6420 = vrcp.f32 %v2649_v62 }
0x37ef   :  { %v6421_v63 = vpop.eup %6420 }
0x37f0   :  { %v2653_v2 = vmul.f32 %v6421_v63, %v2560_v45 }
0x3853   :  { %v2656_v0 = vpop.permute.xlu0 %2655 }
0x3854   :  { %v2658_v1 = vmul.f32 %v6421_v63, %v2656_v0 }
0x3856   :  { %2660 = vrot.lane.b32.xlu1 %v2658_v1, %s6663_s18  ;;  %v2984_v1 = vld [vmem:[#allocation2 + $0xc0] sm:$0xff] }
0x38c8   :  { %v2661_v4 = vpop.permute.xlu1 %2660 }
0x38c9   :  { %v2663_v6 = vadd.f32 %v2661_v4, %v2653_v2 }
0x38cb   :  { %6422 = vtanh.f32 %v2663_v6 }
0x38d5   :  { %v6423_v7 = vpop.eup %6422 }
0x38d6   :  { %2666 = vrot.lane.b32.xlu0 %v6423_v7, %s6663_s18 }
0x3948   :  { %v2667_v8 = vpop.permute.xlu0 %2666 }
0x3949   :  { %v2669_v23 = vmul.f32 %v6421_v63, %v2667_v8 }
0x394b   :  { %2671 = vrot.lane.b32.xlu1 %v2669_v23, %s6664_s19 }
0x39bd   :  { %v2672_v10 = vpop.permute.xlu1 %2671 }
0x39be   :  { %2674 = vst.msk [vmem:[#allocation3 + $0xa0] sm:$0xff] %vm83_vm0, %v2672_v10  ;;  %6081 = vmatmul.mubr.msk.f32.vlgmr.msra.gmra.mrb[58].mxu1 %vm83_vm0, %v2672_v10 }
0x39bf   :  { %6089 = vmatpush3.msra.mxu1 %v7059_v9  ;;  %6090 = vmatprep.mubr.msk.f32.mxu1 %vm6661_vm1, %v6660_v5 }
0x39c0   :  { %6098 = vmatprep.subr.mxu1 %v6660_v5 }
0x3a91   :  { %v2744_v12 = vpop.f32.mrb[58].mxu1 }
0x3a92   :  { %v2748_v13 = vadd.f32 %v2744_v12, %v2675_v11  ;;  %v6082_v14 = vpop.f32.mrb[59].mxu1 }
0x3a94   :  { %6424 = vtanh.f32 %v2748_v13  ;;  %v5622_v16 = vmul.f32 -1.442695, %v2748_v13 }
0x3a96   :  { %6426 = vpow2.f32 %v5622_v16 }
0x3a9e   :  { %v6425_v15 = vpop.eup %6424 }
0x3a9f   :  { %2758 = vrot.lane.b32.xlu0 %v6425_v15, %s6662_s17 }
0x3aa0   :  { %v6427_v17 = vpop.eup %6426 }
0x3aa1   :  { %v2752_v18 = vadd.f32 1.0, %v6427_v17 }
0x3aa3   :  { %6428 = vrcp.f32 %v2752_v18 }
0x3aad   :  { %v6429_v19 = vpop.eup %6428 }
0x3aae   :  { %v2756_v22 = vmul.f32 %v6429_v19, %v2663_v6 }
0x3b11   :  { %v2759_v20 = vpop.permute.xlu0 %2758 }
0x3b12   :  { %v2761_v21 = vmul.f32 %v6429_v19, %v2759_v20 }
0x3b14   :  { %2763 = vrot.lane.b32.xlu1 %v2761_v21, %s6663_s18  ;;  %v3087_v21 = vld [vmem:[#allocation2 + $0xc8] sm:$0xff] }
0x3b86   :  { %v2764_v24 = vpop.permute.xlu1 %2763 }
0x3b87   :  { %v2766_v25 = vadd.f32 %v2764_v24, %v2756_v22 }
0x3b89   :  { %6430 = vtanh.f32 %v2766_v25 }
0x3b93   :  { %v6431_v26 = vpop.eup %6430 }
0x3b94   :  { %2769 = vrot.lane.b32.xlu0 %v6431_v26, %s6663_s18 }
0x3c06   :  { %v2770_v27 = vpop.permute.xlu0 %2769 }
0x3c07   :  { %v2772_v28 = vmul.f32 %v6429_v19, %v2770_v27 }
0x3c09   :  { %2774 = vrot.lane.b32.xlu1 %v2772_v28, %s6664_s19 }
0x3c7b   :  { %v2775_v29 = vpop.permute.xlu1 %2774 }
0x3c7c   :  { %2777 = vst.msk [vmem:[#allocation3 + $0xa8] sm:$0xff] %vm83_vm0, %v2775_v29  ;;  %6086 = vmatmul.mubr.msk.f32.vlgmr.msra.gmra.mrb[24].mxu0 %vm83_vm0, %v2775_v29 }
0x3c7d   :  { %6094 = vmatpush3.msra.mxu0 %v7059_v9  ;;  %6095 = vmatprep.mubr.msk.f32.mxu0 %vm6661_vm1, %v6660_v5 }
0x3c7e   :  { %6103 = vmatprep.subr.mxu0 %v6660_v5 }
0x3d4f   :  { %v2847_v31 = vpop.f32.mrb[24].mxu0 }
0x3d50   :  { %v2851_v32 = vadd.f32 %v2847_v31, %v2778_v30  ;;  %v6087_v33 = vpop.f32.mrb[25].mxu0 }
0x3d52   :  { %6432 = vtanh.f32 %v2851_v32  ;;  %v5624_v35 = vmul.f32 -1.442695, %v2851_v32 }
0x3d54   :  { %6434 = vpow2.f32 %v5624_v35 }
0x3d5c   :  { %v6433_v34 = vpop.eup %6432 }
0x3d5d   :  { %2861 = vrot.lane.b32.xlu0 %v6433_v34, %s6662_s17 }
0x3d5e   :  { %v6435_v36 = vpop.eup %6434 }
0x3d5f   :  { %v2855_v37 = vadd.f32 1.0, %v6435_v36 }
0x3d61   :  { %6436 = vrcp.f32 %v2855_v37 }
0x3d6b   :  { %v6437_v38 = vpop.eup %6436 }
0x3d6c   :  { %v2859_v41 = vmul.f32 %v6437_v38, %v2766_v25 }
0x3dcf   :  { %v2862_v39 = vpop.permute.xlu0 %2861 }
0x3dd0   :  { %v2864_v40 = vmul.f32 %v6437_v38, %v2862_v39 }
0x3dd2   :  { %2866 = vrot.lane.b32.xlu1 %v2864_v40, %s6663_s18  ;;  %v3190_v40 = vld [vmem:[#allocation2 + $0xd0] sm:$0xff] }
0x3e44   :  { %v2867_v42 = vpop.permute.xlu1 %2866 }
0x3e45   :  { %v2869_v43 = vadd.f32 %v2867_v42, %v2859_v41 }
0x3e47   :  { %6438 = vtanh.f32 %v2869_v43 }
0x3e51   :  { %v6439_v44 = vpop.eup %6438 }
0x3e52   :  { %2872 = vrot.lane.b32.xlu0 %v6439_v44, %s6663_s18 }
0x3ec4   :  { %v2873_v45 = vpop.permute.xlu0 %2872 }
0x3ec5   :  { %v2875_v46 = vmul.f32 %v6437_v38, %v2873_v45 }
0x3ec7   :  { %2877 = vrot.lane.b32.xlu1 %v2875_v46, %s6664_s19 }
0x3f39   :  { %v2878_v47 = vpop.permute.xlu1 %2877 }
0x3f3a   :  { %2880 = vst.msk [vmem:[#allocation3 + $0xb0] sm:$0xff] %vm83_vm0, %v2878_v47  ;;  %6091 = vmatmul.mubr.msk.f32.vlgmr.msra.gmra.mrb[60].mxu1 %vm83_vm0, %v2878_v47 }
0x3f3b   :  { %6099 = vmatpush3.msra.mxu1 %v7059_v9  ;;  %6100 = vmatprep.mubr.msk.f32.mxu1 %vm6661_vm1, %v6660_v5 }
0x3f3c   :  { %6108 = vmatprep.subr.mxu1 %v6660_v5 }
0x400d   :  { %v2950_v50 = vpop.f32.mrb[60].mxu1 }
0x400e   :  { %v2954_v51 = vadd.f32 %v2950_v50, %v2881_v49  ;;  %v6092_v52 = vpop.f32.mrb[61].mxu1 }
0x4010   :  { %6440 = vtanh.f32 %v2954_v51  ;;  %v5626_v54 = vmul.f32 -1.442695, %v2954_v51 }
0x4012   :  { %6442 = vpow2.f32 %v5626_v54 }
0x401a   :  { %v6441_v53 = vpop.eup %6440 }
0x401b   :  { %2964 = vrot.lane.b32.xlu0 %v6441_v53, %s6662_s17 }
0x401c   :  { %v6443_v55 = vpop.eup %6442 }
0x401d   :  { %v2958_v56 = vadd.f32 1.0, %v6443_v55 }
0x401f   :  { %6444 = vrcp.f32 %v2958_v56 }
0x4029   :  { %v6445_v3 = vpop.eup %6444 }
0x402a   :  { %v2962_v48 = vmul.f32 %v6445_v3, %v2869_v43 }
0x408d   :  { %v2965_v57 = vpop.permute.xlu0 %2964 }
0x408e   :  { %v2967_v58 = vmul.f32 %v6445_v3, %v2965_v57 }
0x4090   :  { %2969 = vrot.lane.b32.xlu1 %v2967_v58, %s6663_s18  ;;  %v3293_v58 = vld [vmem:[#allocation2 + $0xd8] sm:$0xff] }
0x4102   :  { %v2970_v59 = vpop.permute.xlu1 %2969 }
0x4103   :  { %v2972_v60 = vadd.f32 %v2970_v59, %v2962_v48 }
0x4105   :  { %6446 = vtanh.f32 %v2972_v60 }
0x410f   :  { %v6447_v61 = vpop.eup %6446 }
0x4110   :  { %2975 = vrot.lane.b32.xlu0 %v6447_v61, %s6663_s18 }
0x4182   :  { %v2976_v62 = vpop.permute.xlu0 %2975 }
0x4183   :  { %v2978_v63 = vmul.f32 %v6445_v3, %v2976_v62 }
0x4185   :  { %2980 = vrot.lane.b32.xlu1 %v2978_v63, %s6664_s19 }
0x41f7   :  { %v2981_v0 = vpop.permute.xlu1 %2980 }
0x41f8   :  { %2983 = vst.msk [vmem:[#allocation3 + $0xb8] sm:$0xff] %vm83_vm0, %v2981_v0  ;;  %6096 = vmatmul.mubr.msk.f32.vlgmr.msra.gmra.mrb[26].mxu0 %vm83_vm0, %v2981_v0 }
0x41f9   :  { %6104 = vmatpush3.msra.mxu0 %v7059_v9  ;;  %6105 = vmatprep.mubr.msk.f32.mxu0 %vm6661_vm1, %v6660_v5 }
0x41fa   :  { %6113 = vmatprep.subr.mxu0 %v6660_v5 }
0x42cb   :  { %v3053_v2 = vpop.f32.mrb[26].mxu0 }
0x42cc   :  { %v3057_v4 = vadd.f32 %v3053_v2, %v2984_v1  ;;  %v6097_v6 = vpop.f32.mrb[27].mxu0 }
0x42ce   :  { %6448 = vtanh.f32 %v3057_v4  ;;  %v5628_v8 = vmul.f32 -1.442695, %v3057_v4 }
0x42d0   :  { %6450 = vpow2.f32 %v5628_v8 }
0x42d8   :  { %v6449_v7 = vpop.eup %6448 }
0x42d9   :  { %3067 = vrot.lane.b32.xlu0 %v6449_v7, %s6662_s17 }
0x42da   :  { %v6451_v23 = vpop.eup %6450 }
0x42db   :  { %v3061_v10 = vadd.f32 1.0, %v6451_v23 }
0x42dd   :  { %6452 = vrcp.f32 %v3061_v10 }
0x42e7   :  { %v6453_v11 = vpop.eup %6452 }
0x42e8   :  { %v3065_v14 = vmul.f32 %v6453_v11, %v2972_v60 }
0x434b   :  { %v3068_v12 = vpop.permute.xlu0 %3067 }
0x434c   :  { %v3070_v13 = vmul.f32 %v6453_v11, %v3068_v12  ;;  %v7279_v12 = vld [vmem:[%s7833_s2] sm:$0xff] }
0x434e   :  { %3072 = vrot.lane.b32.xlu1 %v3070_v13, %s6663_s18  ;;  %v3396_v13 = vld [vmem:[#allocation2 + $0xe0] sm:$0xff] }
0x43c0   :  { %v3073_v15 = vpop.permute.xlu1 %3072 }
0x43c1   :  { %v3075_v16 = vadd.f32 %v3073_v15, %v3065_v14 }
0x43c3   :  { %6454 = vtanh.f32 %v3075_v16 }
0x43cd   :  { %v6455_v17 = vpop.eup %6454 }
0x43ce   :  { %3078 = vrot.lane.b32.xlu0 %v6455_v17, %s6663_s18 }
0x4440   :  { %v3079_v18 = vpop.permute.xlu0 %3078 }
0x4441   :  { %v3081_v19 = vmul.f32 %v6453_v11, %v3079_v18 }
0x4443   :  { %3083 = vrot.lane.b32.xlu1 %v3081_v19, %s6664_s19 }
0x44b5   :  { %v3084_v20 = vpop.permute.xlu1 %3083 }
0x44b6   :  { %3086 = vst.msk [vmem:[#allocation3 + $0xc0] sm:$0xff] %vm83_vm0, %v3084_v20  ;;  %6101 = vmatmul.mubr.msk.f32.vlgmr.msra.gmra.mrb[62].mxu1 %vm83_vm0, %v3084_v20 }
0x44b7   :  { %6109 = vmatpush3.msra.mxu1 %v7059_v9  ;;  %6110 = vmatprep.mubr.msk.f32.mxu1 %vm6661_vm1, %v6660_v5 }
0x44b8   :  { %6118 = vmatprep.subr.mxu1 %v6660_v5 }
0x4589   :  { %v3156_v22 = vpop.f32.mrb[62].mxu1 }
0x458a   :  { %v3160_v24 = vadd.f32 %v3156_v22, %v3087_v21  ;;  %v6102_v25 = vpop.f32.mrb[63].mxu1 }
0x458c   :  { %6456 = vtanh.f32 %v3160_v24  ;;  %v5630_v27 = vmul.f32 -1.442695, %v3160_v24 }
0x458e   :  { %6458 = vpow2.f32 %v5630_v27 }
0x4596   :  { %v6457_v26 = vpop.eup %6456 }
0x4597   :  { %3170 = vrot.lane.b32.xlu0 %v6457_v26, %s6662_s17 }
0x4598   :  { %v6459_v28 = vpop.eup %6458 }
0x4599   :  { %v3164_v29 = vadd.f32 1.0, %v6459_v28 }
0x459b   :  { %6460 = vrcp.f32 %v3164_v29 }
0x45a5   :  { %v6461_v30 = vpop.eup %6460 }
0x45a6   :  { %v3168_v33 = vmul.f32 %v6461_v30, %v3075_v16 }
0x4609   :  { %v3171_v31 = vpop.permute.xlu0 %3170 }
0x460a   :  { %v3173_v32 = vmul.f32 %v6461_v30, %v3171_v31 }
0x460c   :  { %3175 = vrot.lane.b32.xlu1 %v3173_v32, %s6663_s18  ;;  %v3499_v32 = vld [vmem:[#allocation2 + $0xe8] sm:$0xff] }
0x467e   :  { %v3176_v34 = vpop.permute.xlu1 %3175 }
0x467f   :  { %v3178_v35 = vadd.f32 %v3176_v34, %v3168_v33 }
0x4681   :  { %6462 = vtanh.f32 %v3178_v35 }
0x468b   :  { %v6463_v36 = vpop.eup %6462 }
0x468c   :  { %3181 = vrot.lane.b32.xlu0 %v6463_v36, %s6663_s18 }
0x46fe   :  { %v3182_v37 = vpop.permute.xlu0 %3181 }
0x46ff   :  { %v3184_v38 = vmul.f32 %v6461_v30, %v3182_v37 }
0x4701   :  { %3186 = vrot.lane.b32.xlu1 %v3184_v38, %s6664_s19 }
0x4773   :  { %v3187_v39 = vpop.permute.xlu1 %3186 }
0x4774   :  { %3189 = vst.msk [vmem:[#allocation3 + $0xc8] sm:$0xff] %vm83_vm0, %v3187_v39  ;;  %6106 = vmatmul.mubr.msk.f32.vlgmr.msra.gmra.mrb[28].mxu0 %vm83_vm0, %v3187_v39 }
0x4775   :  { %6114 = vmatpush3.msra.mxu0 %v7059_v9  ;;  %6115 = vmatprep.mubr.msk.f32.mxu0 %vm6661_vm1, %v6660_v5 }
0x4776   :  { %6123 = vmatprep.subr.mxu0 %v6660_v5 }
0x4847   :  { %v3259_v41 = vpop.f32.mrb[28].mxu0 }
0x4848   :  { %v3263_v42 = vadd.f32 %v3259_v41, %v3190_v40  ;;  %v6107_v43 = vpop.f32.mrb[29].mxu0 }
0x484a   :  { %6464 = vtanh.f32 %v3263_v42  ;;  %v5632_v45 = vmul.f32 -1.442695, %v3263_v42 }
0x484c   :  { %6466 = vpow2.f32 %v5632_v45 }
0x4854   :  { %v6465_v44 = vpop.eup %6464 }
0x4855   :  { %3273 = vrot.lane.b32.xlu0 %v6465_v44, %s6662_s17 }
0x4856   :  { %v6467_v46 = vpop.eup %6466 }
0x4857   :  { %v3267_v47 = vadd.f32 1.0, %v6467_v46 }
0x4859   :  { %6468 = vrcp.f32 %v3267_v47 }
0x4863   :  { %v6469_v49 = vpop.eup %6468 }
0x4864   :  { %v3271_v52 = vmul.f32 %v6469_v49, %v3178_v35 }
0x48c7   :  { %v3274_v50 = vpop.permute.xlu0 %3273 }
0x48c8   :  { %v3276_v51 = vmul.f32 %v6469_v49, %v3274_v50 }
0x48ca   :  { %3278 = vrot.lane.b32.xlu1 %v3276_v51, %s6663_s18  ;;  %v3602_v51 = vld [vmem:[#allocation2 + $0xf0] sm:$0xff] }
0x493c   :  { %v3279_v53 = vpop.permute.xlu1 %3278 }
0x493d   :  { %v3281_v54 = vadd.f32 %v3279_v53, %v3271_v52 }
0x493f   :  { %6470 = vtanh.f32 %v3281_v54 }
0x4949   :  { %v6471_v55 = vpop.eup %6470 }
0x494a   :  { %3284 = vrot.lane.b32.xlu0 %v6471_v55, %s6663_s18 }
0x49bc   :  { %v3285_v56 = vpop.permute.xlu0 %3284 }
0x49bd   :  { %v3287_v3 = vmul.f32 %v6469_v49, %v3285_v56 }
0x49bf   :  { %3289 = vrot.lane.b32.xlu1 %v3287_v3, %s6664_s19 }
0x4a31   :  { %v3290_v57 = vpop.permute.xlu1 %3289 }
0x4a32   :  { %3292 = vst.msk [vmem:[#allocation3 + $0xd0] sm:$0xff] %vm83_vm0, %v3290_v57  ;;  %6111 = vmatmul.mubr.msk.f32.vlgmr.msra.gmra.mrb[64].mxu1 %vm83_vm0, %v3290_v57 }
0x4a33   :  { %6119 = vmatpush3.msra.mxu1 %v7059_v9  ;;  %6120 = vmatprep.mubr.msk.f32.mxu1 %vm6661_vm1, %v6660_v5 }
0x4a34   :  { %6128 = vmatprep.subr.mxu1 %v6660_v5 }
0x4b05   :  { %v3362_v48 = vpop.f32.mrb[64].mxu1 }
0x4b06   :  { %v3366_v59 = vadd.f32 %v3362_v48, %v3293_v58  ;;  %v6112_v60 = vpop.f32.mrb[65].mxu1 }
0x4b08   :  { %6472 = vtanh.f32 %v3366_v59  ;;  %v5634_v62 = vmul.f32 -1.442695, %v3366_v59 }
0x4b0a   :  { %6474 = vpow2.f32 %v5634_v62 }
0x4b12   :  { %v6473_v61 = vpop.eup %6472 }
0x4b13   :  { %3376 = vrot.lane.b32.xlu0 %v6473_v61, %s6662_s17 }
0x4b14   :  { %v6475_v63 = vpop.eup %6474 }
0x4b15   :  { %v3370_v0 = vadd.f32 1.0, %v6475_v63 }
0x4b17   :  { %6476 = vrcp.f32 %v3370_v0 }
0x4b21   :  { %v6477_v1 = vpop.eup %6476 }
0x4b22   :  { %v3374_v4 = vmul.f32 %v6477_v1, %v3281_v54 }
0x4b85   :  { %v3377_v9 = vpop.permute.xlu0 %3376 }
0x4b86   :  { %v3379_v2 = vmul.f32 %v6477_v1, %v3377_v9 }
0x4b88   :  { %3381 = vrot.lane.b32.xlu1 %v3379_v2, %s6663_s18  ;;  %v3705_v2 = vld [vmem:[#allocation2 + $0xf8] sm:$0xff] }
0x4bfa   :  { %v3382_v6 = vpop.permute.xlu1 %3381 }
0x4bfb   :  { %v3384_v7 = vadd.f32 %v3382_v6, %v3374_v4 }
0x4bfd   :  { %6478 = vtanh.f32 %v3384_v7 }
0x4c07   :  { %v6479_v8 = vpop.eup %6478 }
0x4c08   :  { %3387 = vrot.lane.b32.xlu0 %v6479_v8, %s6663_s18 }
0x4c7a   :  { %v3388_v23 = vpop.permute.xlu0 %3387 }
0x4c7b   :  { %v3390_v10 = vmul.f32 %v6477_v1, %v3388_v23 }
0x4c7d   :  { %3392 = vrot.lane.b32.xlu1 %v3390_v10, %s6664_s19 }
0x4cef   :  { %v3393_v11 = vpop.permute.xlu1 %3392 }
0x4cf0   :  { %3395 = vst.msk [vmem:[#allocation3 + $0xd8] sm:$0xff] %vm83_vm0, %v3393_v11  ;;  %6116 = vmatmul.mubr.msk.f32.vlgmr.msra.gmra.mrb[30].mxu0 %vm83_vm0, %v3393_v11 }
0x4cf1   :  { %6124 = vmatpush3.msra.mxu0 %v7279_v12  ;;  %6125 = vmatprep.mubr.msk.f32.mxu0 %vm6661_vm1, %v6660_v5 }
0x4cf2   :  { %6133 = vmatprep.subr.mxu0 %v6660_v5 }
0x4dc3   :  { %v3465_v14 = vpop.f32.mrb[30].mxu0 }
0x4dc4   :  { %v3469_v15 = vadd.f32 %v3465_v14, %v3396_v13  ;;  %v6117_v16 = vpop.f32.mrb[31].mxu0 }
0x4dc6   :  { %6480 = vtanh.f32 %v3469_v15  ;;  %v5636_v18 = vmul.f32 -1.442695, %v3469_v15 }
0x4dc8   :  { %6482 = vpow2.f32 %v5636_v18 }
0x4dd0   :  { %v6481_v17 = vpop.eup %6480 }
0x4dd1   :  { %3479 = vrot.lane.b32.xlu0 %v6481_v17, %s6662_s17 }
0x4dd2   :  { %v6483_v19 = vpop.eup %6482 }
0x4dd3   :  { %v3473_v20 = vadd.f32 1.0, %v6483_v19 }
0x4dd5   :  { %6484 = vrcp.f32 %v3473_v20 }
0x4ddf   :  { %v6485_v21 = vpop.eup %6484 }
0x4de0   :  { %v3477_v25 = vmul.f32 %v6485_v21, %v3384_v7 }
0x4e43   :  { %v3480_v22 = vpop.permute.xlu0 %3479 }
0x4e44   :  { %v3482_v24 = vmul.f32 %v6485_v21, %v3480_v22 }
0x4e46   :  { %3484 = vrot.lane.b32.xlu1 %v3482_v24, %s6663_s18  ;;  %v3808_v24 = vld [vmem:[#allocation2 + $0x100] sm:$0xff] }
0x4eb8   :  { %v3485_v26 = vpop.permute.xlu1 %3484 }
0x4eb9   :  { %v3487_v27 = vadd.f32 %v3485_v26, %v3477_v25 }
0x4ebb   :  { %6486 = vtanh.f32 %v3487_v27 }
0x4ec5   :  { %v6487_v28 = vpop.eup %6486 }
0x4ec6   :  { %3490 = vrot.lane.b32.xlu0 %v6487_v28, %s6663_s18 }
0x4f38   :  { %v3491_v29 = vpop.permute.xlu0 %3490 }
0x4f39   :  { %v3493_v30 = vmul.f32 %v6485_v21, %v3491_v29 }
0x4f3b   :  { %3495 = vrot.lane.b32.xlu1 %v3493_v30, %s6664_s19 }
0x4fad   :  { %v3496_v31 = vpop.permute.xlu1 %3495 }
0x4fae   :  { %3498 = vst.msk [vmem:[#allocation3 + $0xe0] sm:$0xff] %vm83_vm0, %v3496_v31  ;;  %6121 = vmatmul.mubr.msk.f32.vlgmr.msra.gmra.mrb[66].mxu1 %vm83_vm0, %v3496_v31 }
0x4faf   :  { %6129 = vmatpush3.msra.mxu1 %v7279_v12  ;;  %6130 = vmatprep.mubr.msk.f32.mxu1 %vm6661_vm1, %v6660_v5 }
0x4fb0   :  { %6138 = vmatprep.subr.mxu1 %v6660_v5 }
0x5081   :  { %v3568_v33 = vpop.f32.mrb[66].mxu1 }
0x5082   :  { %v3572_v34 = vadd.f32 %v3568_v33, %v3499_v32  ;;  %v6122_v35 = vpop.f32.mrb[67].mxu1 }
0x5084   :  { %6488 = vtanh.f32 %v3572_v34  ;;  %v5638_v37 = vmul.f32 -1.442695, %v3572_v34 }
0x5086   :  { %6490 = vpow2.f32 %v5638_v37 }
0x508e   :  { %v6489_v36 = vpop.eup %6488 }
0x508f   :  { %3582 = vrot.lane.b32.xlu0 %v6489_v36, %s6662_s17 }
0x5090   :  { %v6491_v38 = vpop.eup %6490 }
0x5091   :  { %v3576_v39 = vadd.f32 1.0, %v6491_v38 }
0x5093   :  { %6492 = vrcp.f32 %v3576_v39 }
0x509d   :  { %v6493_v40 = vpop.eup %6492 }
0x509e   :  { %v3580_v43 = vmul.f32 %v6493_v40, %v3487_v27 }
0x5101   :  { %v3583_v41 = vpop.permute.xlu0 %3582 }
0x5102   :  { %v3585_v42 = vmul.f32 %v6493_v40, %v3583_v41 }
0x5104   :  { %3587 = vrot.lane.b32.xlu1 %v3585_v42, %s6663_s18  ;;  %v3911_v42 = vld [vmem:[#allocation2 + $0x108] sm:$0xff] }
0x5176   :  { %v3588_v44 = vpop.permute.xlu1 %3587 }
0x5177   :  { %v3590_v45 = vadd.f32 %v3588_v44, %v3580_v43 }
0x5179   :  { %6494 = vtanh.f32 %v3590_v45 }
0x5183   :  { %v6495_v46 = vpop.eup %6494 }
0x5184   :  { %3593 = vrot.lane.b32.xlu0 %v6495_v46, %s6663_s18 }
0x51f6   :  { %v3594_v47 = vpop.permute.xlu0 %3593 }
0x51f7   :  { %v3596_v49 = vmul.f32 %v6493_v40, %v3594_v47 }
0x51f9   :  { %3598 = vrot.lane.b32.xlu1 %v3596_v49, %s6664_s19 }
0x526b   :  { %v3599_v50 = vpop.permute.xlu1 %3598 }
0x526c   :  { %3601 = vst.msk [vmem:[#allocation3 + $0xe8] sm:$0xff] %vm83_vm0, %v3599_v50  ;;  %6126 = vmatmul.mubr.msk.f32.vlgmr.msra.gmra.mrb[32].mxu0 %vm83_vm0, %v3599_v50 }
0x526d   :  { %6134 = vmatpush3.msra.mxu0 %v7279_v12  ;;  %6135 = vmatprep.mubr.msk.f32.mxu0 %vm6661_vm1, %v6660_v5 }
0x526e   :  { %6143 = vmatprep.subr.mxu0 %v6660_v5 }
0x533f   :  { %v3671_v52 = vpop.f32.mrb[32].mxu0 }
0x5340   :  { %v3675_v53 = vadd.f32 %v3671_v52, %v3602_v51  ;;  %v6127_v54 = vpop.f32.mrb[33].mxu0 }
0x5342   :  { %6496 = vtanh.f32 %v3675_v53  ;;  %v5640_v56 = vmul.f32 -1.442695, %v3675_v53 }
0x5344   :  { %6498 = vpow2.f32 %v5640_v56 }
0x534c   :  { %v6497_v55 = vpop.eup %6496 }
0x534d   :  { %3685 = vrot.lane.b32.xlu0 %v6497_v55, %s6662_s17 }
0x534e   :  { %v6499_v3 = vpop.eup %6498 }
0x534f   :  { %v3679_v57 = vadd.f32 1.0, %v6499_v3 }
0x5351   :  { %6500 = vrcp.f32 %v3679_v57 }
0x535b   :  { %v6501_v58 = vpop.eup %6500 }
0x535c   :  { %v3683_v60 = vmul.f32 %v6501_v58, %v3590_v45 }
0x53bf   :  { %v3686_v48 = vpop.permute.xlu0 %3685 }
0x53c0   :  { %v3688_v59 = vmul.f32 %v6501_v58, %v3686_v48 }
0x53c2   :  { %3690 = vrot.lane.b32.xlu1 %v3688_v59, %s6663_s18  ;;  %v4014_v59 = vld [vmem:[#allocation2 + $0x110] sm:$0xff] }
0x5434   :  { %v3691_v61 = vpop.permute.xlu1 %3690 }
0x5435   :  { %v3693_v62 = vadd.f32 %v3691_v61, %v3683_v60 }
0x5437   :  { %6502 = vtanh.f32 %v3693_v62 }
0x5441   :  { %v6503_v63 = vpop.eup %6502 }
0x5442   :  { %3696 = vrot.lane.b32.xlu0 %v6503_v63, %s6663_s18 }
0x54b4   :  { %v3697_v0 = vpop.permute.xlu0 %3696 }
0x54b5   :  { %v3699_v1 = vmul.f32 %v6501_v58, %v3697_v0 }
0x54b7   :  { %3701 = vrot.lane.b32.xlu1 %v3699_v1, %s6664_s19 }
0x5529   :  { %v3702_v9 = vpop.permute.xlu1 %3701 }
0x552a   :  { %3704 = vst.msk [vmem:[#allocation3 + $0xf0] sm:$0xff] %vm83_vm0, %v3702_v9  ;;  %6131 = vmatmul.mubr.msk.f32.vlgmr.msra.gmra.mrb[68].mxu1 %vm83_vm0, %v3702_v9 }
0x552b   :  { %6139 = vmatpush3.msra.mxu1 %v7279_v12  ;;  %6140 = vmatprep.mubr.msk.f32.mxu1 %vm6661_vm1, %v6660_v5 }
0x552c   :  { %6148 = vmatprep.subr.mxu1 %v6660_v5 }
0x55fd   :  { %v3774_v4 = vpop.f32.mrb[68].mxu1 }
0x55fe   :  { %v3778_v6 = vadd.f32 %v3774_v4, %v3705_v2  ;;  %v6132_v7 = vpop.f32.mrb[69].mxu1 }
0x5600   :  { %6504 = vtanh.f32 %v3778_v6  ;;  %v5642_v23 = vmul.f32 -1.442695, %v3778_v6 }
0x5602   :  { %6506 = vpow2.f32 %v5642_v23 }
0x560a   :  { %v6505_v8 = vpop.eup %6504 }
0x560b   :  { %3788 = vrot.lane.b32.xlu0 %v6505_v8, %s6662_s17 }
0x560c   :  { %v6507_v10 = vpop.eup %6506 }
0x560d   :  { %v3782_v11 = vadd.f32 1.0, %v6507_v10 }
0x560f   :  { %6508 = vrcp.f32 %v3782_v11 }
0x5619   :  { %v6509_v13 = vpop.eup %6508 }
0x561a   :  { %v3786_v16 = vmul.f32 %v6509_v13, %v3693_v62 }
0x567d   :  { %v3789_v14 = vpop.permute.xlu0 %3788 }
0x567e   :  { %v3791_v15 = vmul.f32 %v6509_v13, %v3789_v14 }
0x5680   :  { %3793 = vrot.lane.b32.xlu1 %v3791_v15, %s6663_s18  ;;  %v4117_v15 = vld [vmem:[#allocation2 + $0x118] sm:$0xff] }
0x56f2   :  { %v3794_v17 = vpop.permute.xlu1 %3793 }
0x56f3   :  { %v3796_v18 = vadd.f32 %v3794_v17, %v3786_v16 }
0x56f5   :  { %6510 = vtanh.f32 %v3796_v18 }
0x56ff   :  { %v6511_v19 = vpop.eup %6510 }
0x5700   :  { %3799 = vrot.lane.b32.xlu0 %v6511_v19, %s6663_s18 }
0x5772   :  { %v3800_v20 = vpop.permute.xlu0 %3799 }
0x5773   :  { %v3802_v21 = vmul.f32 %v6509_v13, %v3800_v20 }
0x5775   :  { %3804 = vrot.lane.b32.xlu1 %v3802_v21, %s6664_s19 }
0x57e7   :  { %v3805_v22 = vpop.permute.xlu1 %3804 }
0x57e8   :  { %3807 = vst.msk [vmem:[#allocation3 + $0xf8] sm:$0xff] %vm83_vm0, %v3805_v22  ;;  %6136 = vmatmul.mubr.msk.f32.vlgmr.msra.gmra.mrb[34].mxu0 %vm83_vm0, %v3805_v22 }
0x57e9   :  { %6144 = vmatpush3.msra.mxu0 %v7279_v12  ;;  %6145 = vmatprep.mubr.msk.f32.mxu0 %vm6661_vm1, %v6660_v5 }
0x57ea   :  { %6153 = vmatprep.subr.mxu0 %v6660_v5 }
0x58bb   :  { %v3877_v25 = vpop.f32.mrb[34].mxu0 }
0x58bc   :  { %v3881_v26 = vadd.f32 %v3877_v25, %v3808_v24  ;;  %v6137_v27 = vpop.f32.mrb[35].mxu0 }
0x58be   :  { %6512 = vtanh.f32 %v3881_v26  ;;  %v5644_v29 = vmul.f32 -1.442695, %v3881_v26 }
0x58c0   :  { %6514 = vpow2.f32 %v5644_v29 }
0x58c8   :  { %v6513_v28 = vpop.eup %6512 }
0x58c9   :  { %3891 = vrot.lane.b32.xlu0 %v6513_v28, %s6662_s17 }
0x58ca   :  { %v6515_v30 = vpop.eup %6514 }
0x58cb   :  { %v3885_v31 = vadd.f32 1.0, %v6515_v30 }
0x58cd   :  { %6516 = vrcp.f32 %v3885_v31 }
0x58d7   :  { %v6517_v32 = vpop.eup %6516 }
0x58d8   :  { %v3889_v35 = vmul.f32 %v6517_v32, %v3796_v18 }
0x593b   :  { %v3892_v33 = vpop.permute.xlu0 %3891 }
0x593c   :  { %v3894_v34 = vmul.f32 %v6517_v32, %v3892_v33 }
0x593e   :  { %3896 = vrot.lane.b32.xlu1 %v3894_v34, %s6663_s18  ;;  %v4220_v34 = vld [vmem:[#allocation2 + $0x120] sm:$0xff] }
0x59b0   :  { %v3897_v36 = vpop.permute.xlu1 %3896 }
0x59b1   :  { %v3899_v37 = vadd.f32 %v3897_v36, %v3889_v35 }
0x59b3   :  { %6518 = vtanh.f32 %v3899_v37 }
0x59bd   :  { %v6519_v38 = vpop.eup %6518 }
0x59be   :  { %3902 = vrot.lane.b32.xlu0 %v6519_v38, %s6663_s18 }
0x5a30   :  { %v3903_v39 = vpop.permute.xlu0 %3902 }
0x5a31   :  { %v3905_v40 = vmul.f32 %v6517_v32, %v3903_v39 }
0x5a33   :  { %3907 = vrot.lane.b32.xlu1 %v3905_v40, %s6664_s19 }
0x5aa5   :  { %v3908_v41 = vpop.permute.xlu1 %3907 }
0x5aa6   :  { %3910 = vst.msk [vmem:[#allocation3 + $0x100] sm:$0xff] %vm83_vm0, %v3908_v41  ;;  %6141 = vmatmul.mubr.msk.f32.vlgmr.msra.gmra.mrb[70].mxu1 %vm83_vm0, %v3908_v41 }
0x5aa7   :  { %6149 = vmatpush3.msra.mxu1 %v7279_v12  ;;  %6150 = vmatprep.mubr.msk.f32.mxu1 %vm6661_vm1, %v6660_v5 }
0x5aa8   :  { %6158 = vmatprep.subr.mxu1 %v6660_v5 }
0x5b79   :  { %v3980_v43 = vpop.f32.mrb[70].mxu1 }
0x5b7a   :  { %v3984_v44 = vadd.f32 %v3980_v43, %v3911_v42  ;;  %v6142_v45 = vpop.f32.mrb[71].mxu1 }
0x5b7c   :  { %6520 = vtanh.f32 %v3984_v44  ;;  %v5646_v47 = vmul.f32 -1.442695, %v3984_v44 }
0x5b7e   :  { %6522 = vpow2.f32 %v5646_v47 }
0x5b86   :  { %v6521_v46 = vpop.eup %6520 }
0x5b87   :  { %3994 = vrot.lane.b32.xlu0 %v6521_v46, %s6662_s17 }
0x5b88   :  { %v6523_v49 = vpop.eup %6522 }
0x5b89   :  { %v3988_v50 = vadd.f32 1.0, %v6523_v49 }
0x5b8b   :  { %6524 = vrcp.f32 %v3988_v50 }
0x5b95   :  { %v6525_v51 = vpop.eup %6524 }
0x5b96   :  { %v3992_v54 = vmul.f32 %v6525_v51, %v3899_v37 }
0x5bf9   :  { %v3995_v52 = vpop.permute.xlu0 %3994 }
0x5bfa   :  { %v3997_v53 = vmul.f32 %v6525_v51, %v3995_v52 }
0x5bfc   :  { %3999 = vrot.lane.b32.xlu1 %v3997_v53, %s6663_s18  ;;  %v4323_v53 = vld [vmem:[#allocation2 + $0x128] sm:$0xff] }
0x5c6e   :  { %v4000_v55 = vpop.permute.xlu1 %3999 }
0x5c6f   :  { %v4002_v56 = vadd.f32 %v4000_v55, %v3992_v54 }
0x5c71   :  { %6526 = vtanh.f32 %v4002_v56 }
0x5c7b   :  { %v6527_v3 = vpop.eup %6526 }
0x5c7c   :  { %4005 = vrot.lane.b32.xlu0 %v6527_v3, %s6663_s18 }
0x5cee   :  { %v4006_v57 = vpop.permute.xlu0 %4005 }
0x5cef   :  { %v4008_v58 = vmul.f32 %v6525_v51, %v4006_v57 }
0x5cf1   :  { %4010 = vrot.lane.b32.xlu1 %v4008_v58, %s6664_s19 }
0x5d63   :  { %v4011_v48 = vpop.permute.xlu1 %4010 }
0x5d64   :  { %4013 = vst.msk [vmem:[#allocation3 + $0x108] sm:$0xff] %vm83_vm0, %v4011_v48  ;;  %6146 = vmatmul.mubr.msk.f32.vlgmr.msra.gmra.mrb[36].mxu0 %vm83_vm0, %v4011_v48 }
0x5d65   :  { %6154 = vmatpush3.msra.mxu0 %v7279_v12  ;;  %6155 = vmatprep.mubr.msk.f32.mxu0 %vm6661_vm1, %v6660_v5 }
0x5d66   :  { %6163 = vmatprep.subr.mxu0 %v6660_v5 }
0x5e37   :  { %v4083_v60 = vpop.f32.mrb[36].mxu0 }
0x5e38   :  { %v4087_v61 = vadd.f32 %v4083_v60, %v4014_v59  ;;  %v6147_v62 = vpop.f32.mrb[37].mxu0 }
0x5e3a   :  { %6528 = vtanh.f32 %v4087_v61  ;;  %v5648_v0 = vmul.f32 -1.442695, %v4087_v61 }
0x5e3c   :  { %6530 = vpow2.f32 %v5648_v0 }
0x5e44   :  { %v6529_v63 = vpop.eup %6528 }
0x5e45   :  { %4097 = vrot.lane.b32.xlu0 %v6529_v63, %s6662_s17 }
0x5e46   :  { %v6531_v1 = vpop.eup %6530 }
0x5e47   :  { %v4091_v9 = vadd.f32 1.0, %v6531_v1  ;;  %v4672_v1 = vld [vmem:[%s7835_s4] sm:$0xff] }
0x5e49   :  { %6532 = vrcp.f32 %v4091_v9 }
0x5e53   :  { %v6533_v2 = vpop.eup %6532 }
0x5e54   :  { %v4095_v7 = vmul.f32 %v6533_v2, %v4002_v56 }
0x5eb7   :  { %v4098_v4 = vpop.permute.xlu0 %4097 }
0x5eb8   :  { %v4100_v6 = vmul.f32 %v6533_v2, %v4098_v4 }
0x5eba   :  { %4102 = vrot.lane.b32.xlu1 %v4100_v6, %s6663_s18  ;;  %v4632_v6 = vld [vmem:[#allocation3] sm:$0xff] }
0x5f2c   :  { %v4103_v8 = vpop.permute.xlu1 %4102 }
0x5f2d   :  { %v4105_v23 = vadd.f32 %v4103_v8, %v4095_v7  ;;  %v4633_v7 = vld [vmem:[#allocation3 + $0x8] sm:$0xff]  ;;  %v4634_v8 = vld [vmem:[#allocation3 + $0x10] sm:$0xff] }
0x5f2f   :  { %6534 = vtanh.f32 %v4105_v23 }
0x5f39   :  { %v6535_v10 = vpop.eup %6534 }
0x5f3a   :  { %4108 = vrot.lane.b32.xlu0 %v6535_v10, %s6663_s18  ;;  %v4636_v10 = vld [vmem:[#allocation3 + $0x20] sm:$0xff] }
0x5fac   :  { %v4109_v11 = vpop.permute.xlu0 %4108 }
0x5fad   :  { %v4111_v13 = vmul.f32 %v6533_v2, %v4109_v11  ;;  %v4637_v11 = vld [vmem:[#allocation3 + $0x28] sm:$0xff] }
0x5faf   :  { %4113 = vrot.lane.b32.xlu1 %v4111_v13, %s6664_s19  ;;  %v4638_v13 = vld [vmem:[#allocation3 + $0x30] sm:$0xff] }
0x6021   :  { %v4114_v14 = vpop.permute.xlu1 %4113 }
0x6022   :  { %4116 = vst.msk [vmem:[#allocation3 + $0x110] sm:$0xff] %vm83_vm0, %v4114_v14  ;;  %6151 = vmatmul.mubr.msk.f32.vlgmr.msra.gmra.mrb[72].mxu1 %vm83_vm0, %v4114_v14  ;;  %v4639_v14 = vld [vmem:[#allocation3 + $0x38] sm:$0xff] }
0x6023   :  { %6159 = vmatpush3.msra.mxu1 %v7279_v12  ;;  %6160 = vmatprep.mubr.msk.f32.mxu1 %vm6661_vm1, %v6660_v5 }
0x6024   :  { %6168 = vmatprep.subr.mxu1 %v6660_v5 }
0x60f5   :  { %v4186_v16 = vpop.f32.mrb[72].mxu1 }
0x60f6   :  { %v4190_v17 = vadd.f32 %v4186_v16, %v4117_v15  ;;  %v6152_v18 = vpop.f32.mrb[73].mxu1  ;;  %v4640_v15 = vld [vmem:[#allocation3 + $0x40] sm:$0xff]  ;;  %v4641_v16 = vld [vmem:[#allocation3 + $0x48] sm:$0xff] }
0x60f7   :  { %v4643_v18 = vld [vmem:[#allocation3 + $0x58] sm:$0xff] }
0x60f8   :  { %6536 = vtanh.f32 %v4190_v17  ;;  %v5650_v20 = vmul.f32 -1.442695, %v4190_v17  ;;  %v4642_v17 = vld [vmem:[#allocation3 + $0x50] sm:$0xff] }
0x60fa   :  { %6538 = vpow2.f32 %v5650_v20  ;;  %v4645_v20 = vld [vmem:[#allocation3 + $0x68] sm:$0xff] }
0x6102   :  { %v6537_v19 = vpop.eup %6536 }
0x6103   :  { %4200 = vrot.lane.b32.xlu0 %v6537_v19, %s6662_s17  ;;  %v4644_v19 = vld [vmem:[#allocation3 + $0x60] sm:$0xff] }
0x6104   :  { %v6539_v21 = vpop.eup %6538 }
0x6105   :  { %v4194_v22 = vadd.f32 1.0, %v6539_v21  ;;  %v4646_v21 = vld [vmem:[#allocation3 + $0x70] sm:$0xff] }
0x6107   :  { %6540 = vrcp.f32 %v4194_v22  ;;  %v4647_v22 = vld [vmem:[#allocation3 + $0x78] sm:$0xff] }
0x6111   :  { %v6541_v24 = vpop.eup %6540 }
0x6112   :  { %v4198_v27 = vmul.f32 %v6541_v24, %v4105_v23  ;;  %v4635_v23 = vld [vmem:[#allocation3 + $0x18] sm:$0xff] }
0x6175   :  { %v4201_v25 = vpop.permute.xlu0 %4200 }
0x6176   :  { %v4203_v26 = vmul.f32 %v6541_v24, %v4201_v25  ;;  %v4649_v25 = vld [vmem:[#allocation3 + $0x88] sm:$0xff] }
0x6178   :  { %4205 = vrot.lane.b32.xlu1 %v4203_v26, %s6663_s18  ;;  %v4650_v26 = vld [vmem:[#allocation3 + $0x90] sm:$0xff] }
0x61ea   :  { %v4206_v28 = vpop.permute.xlu1 %4205 }
0x61eb   :  { %v4208_v29 = vadd.f32 %v4206_v28, %v4198_v27  ;;  %v4651_v27 = vld [vmem:[#allocation3 + $0x98] sm:$0xff]  ;;  %v4652_v28 = vld [vmem:[#allocation3 + $0xa0] sm:$0xff] }
0x61ed   :  { %6542 = vtanh.f32 %v4208_v29 }
0x61f7   :  { %v6543_v30 = vpop.eup %6542 }
0x61f8   :  { %4211 = vrot.lane.b32.xlu0 %v6543_v30, %s6663_s18  ;;  %v4654_v30 = vld [vmem:[#allocation3 + $0xb0] sm:$0xff] }
0x626a   :  { %v4212_v31 = vpop.permute.xlu0 %4211 }
0x626b   :  { %v4214_v32 = vmul.f32 %v6541_v24, %v4212_v31  ;;  %v4648_v24 = vld [vmem:[#allocation3 + $0x80] sm:$0xff]  ;;  %v4655_v31 = vld [vmem:[#allocation3 + $0xb8] sm:$0xff] }
0x626d   :  { %4216 = vrot.lane.b32.xlu1 %v4214_v32, %s6664_s19  ;;  %v4656_v32 = vld [vmem:[#allocation3 + $0xc0] sm:$0xff] }
0x62df   :  { %v4217_v33 = vpop.permute.xlu1 %4216 }
0x62e0   :  { %4219 = vst.msk [vmem:[#allocation3 + $0x118] sm:$0xff] %vm83_vm0, %v4217_v33  ;;  %6156 = vmatmul.mubr.msk.f32.vlgmr.msra.gmra.mrb[38].mxu0 %vm83_vm0, %v4217_v33  ;;  %v4657_v33 = vld [vmem:[#allocation3 + $0xc8] sm:$0xff] }
0x62e1   :  { %6164 = vmatpush3.msra.mxu0 %v7279_v12  ;;  %6165 = vmatprep.mubr.msk.f32.mxu0 %vm6661_vm1, %v6660_v5 }
0x62e2   :  { %6173 = vmatprep.subr.mxu0 %v4672_v1 }
0x63b3   :  { %v4289_v35 = vpop.f32.mrb[38].mxu0 }
0x63b4   :  { %v4293_v36 = vadd.f32 %v4289_v35, %v4220_v34  ;;  %v6157_v37 = vpop.f32.mrb[39].mxu0  ;;  %v4658_v34 = vld [vmem:[#allocation3 + $0xd0] sm:$0xff]  ;;  %v4659_v35 = vld [vmem:[#allocation3 + $0xd8] sm:$0xff] }
0x63b5   :  { %v4661_v37 = vld [vmem:[#allocation3 + $0xe8] sm:$0xff] }
0x63b6   :  { %6544 = vtanh.f32 %v4293_v36  ;;  %v5652_v39 = vmul.f32 -1.442695, %v4293_v36  ;;  %v4660_v36 = vld [vmem:[#allocation3 + $0xe0] sm:$0xff] }
0x63b8   :  { %6546 = vpow2.f32 %v5652_v39  ;;  %v4663_v39 = vld [vmem:[#allocation3 + $0xf8] sm:$0xff] }
0x63c0   :  { %v6545_v38 = vpop.eup %6544 }
0x63c1   :  { %4303 = vrot.lane.b32.xlu0 %v6545_v38, %s6662_s17  ;;  %v4662_v38 = vld [vmem:[#allocation3 + $0xf0] sm:$0xff] }
0x63c2   :  { %v6547_v40 = vpop.eup %6546 }
0x63c3   :  { %v4297_v41 = vadd.f32 1.0, %v6547_v40  ;;  %v4664_v40 = vld [vmem:[#allocation3 + $0x100] sm:$0xff] }
0x63c5   :  { %6548 = vrcp.f32 %v4297_v41  ;;  %v4665_v41 = vld [vmem:[#allocation3 + $0x108] sm:$0xff] }
0x63cf   :  { %v6549_v42 = vpop.eup %6548 }
0x63d0   :  { %v4301_v45 = vmul.f32 %v6549_v42, %v4208_v29  ;;  %v4653_v29 = vld [vmem:[#allocation3 + $0xa8] sm:$0xff] }
0x6433   :  { %v4304_v43 = vpop.permute.xlu0 %4303 }
0x6434   :  { %v4306_v44 = vmul.f32 %v6549_v42, %v4304_v43  ;;  %v4667_v43 = vld [vmem:[#allocation3 + $0x118] sm:$0xff] }
0x6436   :  { %4308 = vrot.lane.b32.xlu1 %v4306_v44, %s6663_s18 }
0x64a8   :  { %v4309_v46 = vpop.permute.xlu1 %4308 }
0x64a9   :  { %v4311_v47 = vadd.f32 %v4309_v46, %v4301_v45  ;;  %v4426_v46 = vld [vmem:[#allocation2 + $0x130] sm:$0xff] }
0x64ab   :  { %6550 = vtanh.f32 %v4311_v47 }
0x64b5   :  { %v6551_v49 = vpop.eup %6550 }
0x64b6   :  { %4314 = vrot.lane.b32.xlu0 %v6551_v49, %s6663_s18 }
0x6528   :  { %v4315_v50 = vpop.permute.xlu0 %4314 }
0x6529   :  { %v4317_v51 = vmul.f32 %v6549_v42, %v4315_v50  ;;  %v4666_v42 = vld [vmem:[#allocation3 + $0x110] sm:$0xff] }
0x652b   :  { %4319 = vrot.lane.b32.xlu1 %v4317_v51, %s6664_s19  ;;  %v7428_v51 = vld [vmem:[%s7836_s5] ss:$0 sm:$0xff] }
0x659d   :  { %v4320_v52 = vpop.permute.xlu1 %4319 }
0x659e   :  { %4322 = vst.msk [vmem:[#allocation3 + $0x120] sm:$0xff] %vm83_vm0, %v4320_v52  ;;  %6161 = vmatmul.mubr.msk.f32.vlgmr.msra.gmra.mrb[74].mxu1 %vm83_vm0, %v4320_v52 }
0x659f   :  { %6169 = vmatpush3.msra.mxu1 %v7279_v12  ;;  %6170 = vmatprep.mubr.msk.f32.mxu1 %vm6661_vm1, %v6660_v5 }
0x65a5   :  { %v4668_v44 = vld [vmem:[#allocation3 + $0x120] sm:$0xff] }
0x6671   :  { %v4392_v54 = vpop.f32.mrb[74].mxu1 }
0x6672   :  { %v4396_v55 = vadd.f32 %v4392_v54, %v4323_v53  ;;  %v6162_v56 = vpop.f32.mrb[75].mxu1 }
0x6674   :  { %6552 = vtanh.f32 %v4396_v55  ;;  %v5654_v57 = vmul.f32 -1.442695, %v4396_v55 }
0x6676   :  { %6554 = vpow2.f32 %v5654_v57 }
0x667e   :  { %v6553_v3 = vpop.eup %6552 }
0x667f   :  { %4406 = vrot.lane.b32.xlu0 %v6553_v3, %s6662_s17 }
0x6680   :  { %v6555_v58 = vpop.eup %6554 }
0x6681   :  { %v4400_v48 = vadd.f32 1.0, %v6555_v58 }
0x6683   :  { %6556 = vrcp.f32 %v4400_v48 }
0x668d   :  { %v6557_v59 = vpop.eup %6556 }
0x668e   :  { %v4404_v12 = vmul.f32 %v6557_v59, %v4311_v47 }
0x66f1   :  { %v4407_v60 = vpop.permute.xlu0 %4406 }
0x66f2   :  { %v4409_v61 = vmul.f32 %v6557_v59, %v4407_v60 }
0x66f4   :  { %4411 = vrot.lane.b32.xlu1 %v4409_v61, %s6663_s18 }
0x6766   :  { %v4412_v62 = vpop.permute.xlu1 %4411 }
0x6767   :  { %v7375_v63 = vadd.f32 %v4412_v62, %v4404_v12 }
0x6769   :  { %6558 = vtanh.f32 %v7375_v63 }
0x6773   :  { %v6559_v0 = vpop.eup %6558 }
0x6774   :  { %4417 = vrot.lane.b32.xlu0 %v6559_v0, %s6663_s18 }
0x67e6   :  { %v4418_v9 = vpop.permute.xlu0 %4417 }
0x67e7   :  { %v4420_v2 = vmul.f32 %v6557_v59, %v4418_v9 }
0x67e9   :  { %4422 = vrot.lane.b32.xlu1 %v4420_v2, %s6664_s19 }
0x685b   :  { %v4423_v4 = vpop.permute.xlu1 %4422 }
0x685c   :  { %4425 = vst.msk [vmem:[#allocation3 + $0x128] sm:$0xff] %vm83_vm0, %v4423_v4  ;;  %6166 = vmatmul.mubr.msk.f32.vlgmr.msra.gmra.mrb[40].mxu0 %vm83_vm0, %v4423_v4 }
0x685d   :  { %6175 = vmatprep.mubr.msk.f32.mxu0 %vm83_vm0, %v4632_v6  ;;  %6174 = vmatpush3.msra.mxu0 %v4672_v1 }
0x6860   :  { %6176 = vmatmul.mubr.msk.f32.vlgmr.msra.gmra.mrb[42].mxu0 %vm83_vm0, %v4633_v7 }
0x6861   :  { %6178 = vmatprep.mubr.msk.f32.mxu0 %vm83_vm0, %v4634_v8 }
0x6863   :  { %v4669_v45 = vld [vmem:[#allocation3 + $0x128] sm:$0xff] }
0x6864   :  { %6179 = vmatmul.mubr.msk.f32.gmra.mrb[44].mxu0 %vm83_vm0, %v4635_v23 }
0x6865   :  { %6181 = vmatprep.mubr.msk.f32.mxu0 %vm83_vm0, %v4636_v10 }
0x6868   :  { %6182 = vmatmul.mubr.msk.f32.gmra.mrb[46].mxu0 %vm83_vm0, %v4637_v11 }
0x6869   :  { %6184 = vmatprep.mubr.msk.f32.mxu0 %vm83_vm0, %v4638_v13 }
0x686c   :  { %6185 = vmatmul.mubr.msk.f32.gmra.mrb[48].mxu0 %vm83_vm0, %v4639_v14 }
0x686d   :  { %6187 = vmatprep.mubr.msk.f32.mxu0 %vm83_vm0, %v4640_v15 }
0x6870   :  { %6188 = vmatmul.mubr.msk.f32.gmra.mrb[50].mxu0 %vm83_vm0, %v4641_v16 }
0x6871   :  { %6190 = vmatprep.mubr.msk.f32.mxu0 %vm83_vm0, %v4642_v17 }
0x6874   :  { %6191 = vmatmul.mubr.msk.f32.gmra.mrb[52].mxu0 %vm83_vm0, %v4643_v18 }
0x6875   :  { %6193 = vmatprep.mubr.msk.f32.mxu0 %vm83_vm0, %v4644_v19 }
0x6878   :  { %6194 = vmatmul.mubr.msk.f32.gmra.mrb[54].mxu0 %vm83_vm0, %v4645_v20 }
0x6879   :  { %6196 = vmatprep.mubr.msk.f32.mxu0 %vm83_vm0, %v4646_v21 }
0x687c   :  { %6197 = vmatmul.mubr.msk.f32.gmra.mrb[56].mxu0 %vm83_vm0, %v4647_v22 }
0x687d   :  { %6199 = vmatprep.mubr.msk.f32.mxu0 %vm83_vm0, %v4648_v24 }
0x6880   :  { %6200 = vmatmul.mubr.msk.f32.gmra.mrb[58].mxu0 %vm83_vm0, %v4649_v25 }
0x6881   :  { %6202 = vmatprep.mubr.msk.f32.mxu0 %vm83_vm0, %v4650_v26 }
0x6884   :  { %6203 = vmatmul.mubr.msk.f32.gmra.mrb[60].mxu0 %vm83_vm0, %v4651_v27  ;;  %v7464_v27 = vld [vmem:[%s7837_s6] ss:$0 sm:$0xff] }
0x6885   :  { %6205 = vmatprep.mubr.msk.f32.mxu0 %vm83_vm0, %v4652_v28 }
0x6888   :  { %6206 = vmatmul.mubr.msk.f32.gmra.mrb[62].mxu0 %vm83_vm0, %v4653_v29 }
0x6889   :  { %6208 = vmatprep.mubr.msk.f32.mxu0 %vm83_vm0, %v4654_v30 }
0x688c   :  { %6209 = vmatmul.mubr.msk.f32.gmra.mrb[64].mxu0 %vm83_vm0, %v4655_v31 }
0x688d   :  { %6211 = vmatprep.mubr.msk.f32.mxu0 %vm83_vm0, %v4656_v32 }
0x6890   :  { %6212 = vmatmul.mubr.msk.f32.gmra.mrb[66].mxu0 %vm83_vm0, %v4657_v33  ;;  %v7474_v33 = vld [vmem:[%s7838_s7] ss:$0 sm:$0xff] }
0x6891   :  { %6214 = vmatprep.mubr.msk.f32.mxu0 %vm83_vm0, %v4658_v34 }
0x6894   :  { %6215 = vmatmul.mubr.msk.f32.gmra.mrb[68].mxu0 %vm83_vm0, %v4659_v35 }
0x6895   :  { %6217 = vmatprep.mubr.msk.f32.mxu0 %vm83_vm0, %v4660_v36 }
0x6898   :  { %6218 = vmatmul.mubr.msk.f32.gmra.mrb[70].mxu0 %vm83_vm0, %v4661_v37 }
0x6899   :  { %6220 = vmatprep.mubr.msk.f32.mxu0 %vm83_vm0, %v4662_v38 }
0x689c   :  { %6221 = vmatmul.mubr.msk.f32.gmra.mrb[72].mxu0 %vm83_vm0, %v4663_v39 }
0x689d   :  { %6223 = vmatprep.mubr.msk.f32.mxu0 %vm83_vm0, %v4664_v40 }
0x68a0   :  { %6224 = vmatmul.mubr.msk.f32.gmra.mrb[74].mxu0 %vm83_vm0, %v4665_v41 }
0x68a1   :  { %6226 = vmatprep.mubr.msk.f32.mxu0 %vm83_vm0, %v4666_v42 }
0x68a4   :  { %6227 = vmatmul.mubr.msk.f32.gmra.mrb[76].mxu0 %vm83_vm0, %v4667_v43 }
0x68a5   :  { %6229 = vmatprep.mubr.msk.f32.mxu0 %vm83_vm0, %v4668_v44 }
0x68a8   :  { %6230 = vmatmul.mubr.msk.f32.gmra.mrb[78].mxu0 %vm83_vm0, %v4669_v45 }
0x692f   :  { %v4495_v47 = vpop.f32.mrb[40].mxu0 }
0x6930   :  { %v7423_v49 = vadd.f32 %v4495_v47, %v4426_v46  ;;  %v6167_v50 = vpop.f32.mrb[41].mxu0 }
0x6932   :  { %6560 = vtanh.f32 %v7423_v49 }
0x6933   :  { %v6177_v52 = vpop.f32.mrb[42].mxu0 }
0x6934   :  { %v4872_v53 = vadd.f32 %v6177_v52, %v7428_v51  ;;  %v4866_v54 = vpop.f32.mrb[43].mxu0 }
0x6935   :  { %v4867_v55 = vadd.f32 %v7428_v51, %v4866_v54 }
0x6936   :  { %v5106_v56 = vmin.f32 %v4872_v53, 0.0  ;;  %vm5066_vm3 = vcmp.gt.f32.partialorder %v4872_v53, 0.0 }
0x6937   :  { %v5105_v3 = vmin.f32 %v4867_v55, 0.0  ;;  %v6180_v57 = vpop.f32.mrb[44].mxu0  ;;  %vm5065_vm4 = vcmp.gt.f32.partialorder %v4867_v55, 0.0 }
0x6938   :  { %v5147_v58 = vmul.f32 1.442695, %v5106_v56  ;;  %v7434_v48 = vadd.f32 %v6180_v57, %v7428_v51  ;;  %v4876_v59 = vpop.f32.mrb[45].mxu0 }
0x6939   :  { %v5145_v60 = vmul.f32 1.442695, %v5105_v3  ;;  %v7437_v61 = vadd.f32 %v7428_v51, %v4876_v59 }
0x693a   :  { %6562 = vpow2.f32 %v5147_v58  ;;  %v5108_v12 = vmin.f32 %v7434_v48, 0.0  ;;  %vm5068_vm5 = vcmp.gt.f32.partialorder %v7434_v48, 0.0 }
0x693b   :  { %6564 = vpow2.f32 %v5145_v60  ;;  %v5107_v62 = vmin.f32 %v7437_v61, 0.0  ;;  %v6183_v0 = vpop.f32.mrb[46].mxu0  ;;  %vm5067_vm6 = vcmp.gt.f32.partialorder %v7437_v61, 0.0 }
0x693c   :  { %v6561_v1 = vpop.eup %6560  ;;  %v5151_v9 = vmul.f32 1.442695, %v5108_v12  ;;  %v7442_v2 = vadd.f32 %v6183_v0, %v7428_v51  ;;  %v4886_v4 = vpop.f32.mrb[47].mxu0 }
0x693d   :  { %v5149_v6 = vmul.f32 1.442695, %v5107_v62  ;;  %v7445_v7 = vadd.f32 %v7428_v51, %v4886_v4  ;;  %4509 = vrot.lane.b32.xlu0 %v6561_v1, %s6662_s17 }
0x693e   :  { %6566 = vpow2.f32 %v5151_v9  ;;  %v5110_v8 = vmin.f32 %v7442_v2, 0.0  ;;  %vm5070_vm7 = vcmp.gt.f32.partialorder %v7442_v2, 0.0 }
0x693f   :  { %6568 = vpow2.f32 %v5149_v6  ;;  %v5109_v23 = vmin.f32 %v7445_v7, 0.0  ;;  %v6186_v10 = vpop.f32.mrb[48].mxu0  ;;  %vm5069_vm8 = vcmp.gt.f32.partialorder %v7445_v7, 0.0 }
0x6940   :  { %v5155_v11 = vmul.f32 1.442695, %v5110_v8  ;;  %v7451_v13 = vadd.f32 %v6186_v10, %v7428_v51  ;;  %v4896_v14 = vpop.f32.mrb[49].mxu0 }
0x6941   :  { %v5153_v15 = vmul.f32 1.442695, %v5109_v23  ;;  %v7454_v16 = vadd.f32 %v7428_v51, %v4896_v14 }
0x6942   :  { %6570 = vpow2.f32 %v5155_v11  ;;  %v5112_v17 = vmin.f32 %v7451_v13, 0.0  ;;  %vm5072_vm9 = vcmp.gt.f32.partialorder %v7451_v13, 0.0 }
0x6943   :  { %6572 = vpow2.f32 %v5153_v15  ;;  %v5111_v18 = vmin.f32 %v7454_v16, 0.0  ;;  %v6189_v19 = vpop.f32.mrb[50].mxu0  ;;  %vm5071_vm10 = vcmp.gt.f32.partialorder %v7454_v16, 0.0 }
0x6944   :  { %v6563_v20 = vpop.eup %6562  ;;  %v5159_v21 = vmul.f32 1.442695, %v5112_v17  ;;  %v7459_v22 = vadd.f32 %v6189_v19, %v7428_v51  ;;  %v4906_v24 = vpop.f32.mrb[51].mxu0 }
0x6945   :  { %v6565_v25 = vpop.eup %6564  ;;  %v5701_v26 = vadd.f32 -1.0, %v6563_v20  ;;  %v5157_v28 = vmul.f32 1.442695, %v5111_v18  ;;  %v7467_v29 = vadd.f32 %v7428_v51, %v4906_v24 }
0x6946   :  { %v5700_v30 = vadd.f32 -1.0, %v6565_v25  ;;  %6574 = vpow2.f32 %v5159_v21  ;;  %v5114_v31 = vmin.f32 %v7459_v22, 0.0  ;;  %vm5074_vm11 = vcmp.gt.f32.partialorder %v7459_v22, 0.0 }
0x6947   :  { %v5266_v32 = vsel %vm5066_vm3, %v4872_v53, %v5701_v26  ;;  %6576 = vpow2.f32 %v5157_v28  ;;  %v5113_v34 = vmin.f32 %v7467_v29, 0.0  ;;  %v6192_v35 = vpop.f32.mrb[52].mxu0  ;;  %vm5073_vm12 = vcmp.gt.f32.partialorder %v7467_v29, 0.0 }
0x6948   :  { %v6567_v36 = vpop.eup %6566  ;;  %v5313_v37 = vmul.f32 %v7464_v27, %v5266_v32  ;;  %v5265_v38 = vsel %vm5065_vm4, %v4867_v55, %v5700_v30  ;;  %v5163_v39 = vmul.f32 1.442695, %v5114_v31  ;;  %v7480_v40 = vadd.f32 %v6192_v35, %v7428_v51  ;;  %v4916_v41 = vpop.f32.mrb[53].mxu0 }
0x6949   :  { %v6569_v42 = vpop.eup %6568  ;;  %v5312_v43 = vmul.f32 %v7464_v27, %v5265_v38  ;;  %v5703_v44 = vadd.f32 -1.0, %v6567_v36  ;;  %v5161_v45 = vmul.f32 1.442695, %v5113_v34  ;;  %v7484_v46 = vadd.f32 %v7428_v51, %v4916_v41 }
0x694a   :  { %v5360_v47 = vadd.f32 %v7474_v33, %v5313_v37  ;;  %v5702_v50 = vadd.f32 -1.0, %v6569_v42  ;;  %6578 = vpow2.f32 %v5163_v39  ;;  %v5116_v54 = vmin.f32 %v7480_v40, 0.0 }
0x694b   :  { %v5359_v52 = vadd.f32 %v7474_v33, %v5312_v43  ;;  %v5268_v53 = vsel %vm5068_vm5, %v7434_v48, %v5703_v44  ;;  %6580 = vpow2.f32 %v5161_v45  ;;  %v6195_v55 = vpop.f32.mrb[54].mxu0  ;;  %v5115_v58 = vmin.f32 %v7484_v46, 0.0 }
0x694c   :  { %v6571_v56 = vpop.eup %6570  ;;  %v5315_v3 = vmul.f32 %v7464_v27, %v5268_v53  ;;  %v5267_v57 = vsel %vm5067_vm6, %v7437_v61, %v5702_v50  ;;  %v4926_v59 = vpop.f32.mrb[55].mxu0  ;;  %v5167_v0 = vmul.f32 1.442695, %v5116_v54  ;;  %v7502_v4 = vadd.f32 %v6195_v55, %v7428_v51 }
0x694d   :  { %v6573_v60 = vpop.eup %6572  ;;  %v5399_v12 = vadd.f32 %v5360_v47, %v5359_v52  ;;  %v5314_v48 = vmul.f32 %v7464_v27, %v5267_v57  ;;  %v5705_v62 = vadd.f32 -1.0, %v6571_v56  ;;  %v5165_v9 = vmul.f32 1.442695, %v5115_v58 }
0x694e   :  { %v5704_v1 = vadd.f32 -1.0, %v6573_v60  ;;  %6582 = vpow2.f32 %v5167_v0  ;;  %v7509_v8 = vadd.f32 %v7428_v51, %v4926_v59  ;;  %v5362_v11 = vadd.f32 %v7474_v33, %v5315_v3 }
0x694f   :  { %v5361_v61 = vadd.f32 %v7474_v33, %v5314_v48  ;;  %v5270_v6 = vsel %vm5070_vm7, %v7442_v2, %v5705_v62  ;;  %v6198_v23 = vpop.f32.mrb[56].mxu0  ;;  %6584 = vpow2.f32 %v5165_v9  ;;  %v5118_v21 = vmin.f32 %v7502_v4, 0.0 }
0x6950   :  { %v6575_v10 = vpop.eup %6574  ;;  %v5317_v14 = vmul.f32 %v7464_v27, %v5270_v6  ;;  %v5269_v15 = vsel %vm5069_vm8, %v7445_v7, %v5704_v1  ;;  %v4936_v17 = vpop.f32.mrb[57].mxu0  ;;  %v5117_v26 = vmin.f32 %v7509_v8, 0.0  ;;  %v7528_v38 = vadd.f32 %v6198_v23, %v7428_v51 }
0x6951   :  { %v6577_v18 = vpop.eup %6576  ;;  %v5400_v19 = vadd.f32 %v5399_v12, %v5361_v61  ;;  %v5316_v2 = vmul.f32 %v7464_v27, %v5269_v15  ;;  %v5707_v20 = vadd.f32 -1.0, %v6575_v10  ;;  %v5171_v31 = vmul.f32 1.442695, %v5118_v21 }
0x6952   :  { %v5364_v24 = vadd.f32 %v7474_v33, %v5317_v14  ;;  %v5706_v25 = vadd.f32 -1.0, %v6577_v18  ;;  %v5169_v37 = vmul.f32 1.442695, %v5117_v26  ;;  %v5120_v50 = vmin.f32 %v7528_v38, 0.0 }
0x6953   :  { %v5363_v28 = vadd.f32 %v7474_v33, %v5316_v2  ;;  %v5401_v30 = vadd.f32 %v5400_v19, %v5362_v11  ;;  %v5272_v7 = vsel %vm5072_vm9, %v7451_v13, %v5707_v20  ;;  %v6201_v32 = vpop.f32.mrb[58].mxu0  ;;  %6586 = vpow2.f32 %v5171_v31 }
0x6954   :  { %v6579_v34 = vpop.eup %6578  ;;  %v5319_v35 = vmul.f32 %v7464_v27, %v5272_v7  ;;  %v5271_v36 = vsel %vm5071_vm10, %v7454_v16, %v5706_v25  ;;  %v4946_v39 = vpop.f32.mrb[59].mxu0  ;;  %6588 = vpow2.f32 %v5169_v37  ;;  %v7539_v55 = vadd.f32 %v7428_v51, %v4936_v17 }
0x6955   :  { %v6581_v41 = vpop.eup %6580  ;;  %v5402_v42 = vadd.f32 %v5401_v30, %v5363_v28  ;;  %v5318_v43 = vmul.f32 %v7464_v27, %v5271_v36  ;;  %v5709_v44 = vadd.f32 -1.0, %v6579_v34  ;;  %v7542_v56 = vadd.f32 %v6201_v32, %v7428_v51 }
0x6956   :  { %v5708_v13 = vadd.f32 -1.0, %v6581_v41  ;;  %v5366_v53 = vadd.f32 %v7474_v33, %v5319_v35  ;;  %v5175_v60 = vmul.f32 1.442695, %v5120_v50  ;;  %vm5076_vm13 = vcmp.gt.f32.partialorder %v7480_v40, 0.0 }
0x6957   :  { %v5365_v45 = vadd.f32 %v7474_v33, %v5318_v43  ;;  %v5403_v16 = vadd.f32 %v5402_v42, %v5364_v24  ;;  %v5274_v47 = vsel %vm5074_vm11, %v7459_v22, %v5709_v44  ;;  %v6204_v52 = vpop.f32.mrb[60].mxu0  ;;  %v7549_v62 = vadd.f32 %v7428_v51, %v4946_v39 }
0x6958   :  { %v5273_v54 = vsel %vm5073_vm12, %v7467_v29, %v5708_v13  ;;  %v4956_v3 = vpop.f32.mrb[61].mxu0  ;;  %v6583_v57 = vpop.eup %6582  ;;  %v5321_v59 = vmul.f32 %v7464_v27, %v5274_v47  ;;  %v5119_v29 = vmin.f32 %v7539_v55, 0.0  ;;  %6590 = vpow2.f32 %v5175_v60 }
0x6959   :  { %v5404_v58 = vadd.f32 %v5403_v16, %v5365_v45  ;;  %v5320_v22 = vmul.f32 %v7464_v27, %v5273_v54  ;;  %v6585_v12 = vpop.eup %6584  ;;  %v5711_v48 = vadd.f32 -1.0, %v6583_v57  ;;  %vm5075_vm14 = vcmp.gt.f32.partialorder %v7484_v46, 0.0 }
0x695a   :  { %v5710_v9 = vadd.f32 -1.0, %v6585_v12  ;;  %v5173_v23 = vmul.f32 1.442695, %v5119_v29  ;;  %v5122_v10 = vmin.f32 %v7542_v56, 0.0  ;;  %v5368_v14 = vadd.f32 %v7474_v33, %v5321_v59 }
0x695b   :  { %v5367_v0 = vadd.f32 %v7474_v33, %v5320_v22  ;;  %v5405_v1 = vadd.f32 %v5404_v58, %v5366_v53  ;;  %v6207_v61 = vpop.f32.mrb[62].mxu0  ;;  %v5276_v6 = vsel %vm5076_vm13, %v7480_v40, %v5711_v48  ;;  %v5121_v20 = vmin.f32 %v7549_v62, 0.0 }
0x695c   :  { %v4966_v11 = vpop.f32.mrb[63].mxu0  ;;  %v5323_v17 = vmul.f32 %v7464_v27, %v5276_v6  ;;  %v5275_v18 = vsel %vm5075_vm14, %v7484_v46, %v5710_v9  ;;  %6592 = vpow2.f32 %v5173_v23  ;;  %v5179_v2 = vmul.f32 1.442695, %v5122_v10 }
0x695d   :  { %v5406_v15 = vadd.f32 %v5405_v1, %v5367_v0  ;;  %v5322_v19 = vmul.f32 %v7464_v27, %v5275_v18  ;;  %v6587_v40 = vpop.eup %6586  ;;  %vm5078_vm15 = vcmp.gt.f32.partialorder %v7502_v4, 0.0  ;;  %v7562_v24 = vadd.f32 %v6204_v52, %v7428_v51 }
0x695e   :  { %v7565_v25 = vadd.f32 %v7428_v51, %v4956_v3  ;;  %v6589_v28 = vpop.eup %6588  ;;  %v5713_v30 = vadd.f32 -1.0, %v6587_v40  ;;  %6594 = vpow2.f32 %v5179_v2  ;;  %v5177_v7 = vmul.f32 1.442695, %v5121_v20 }
0x695f   :  { %v5407_v21 = vadd.f32 %v5406_v15, %v5368_v14  ;;  %v6210_v26 = vpop.f32.mrb[64].mxu0  ;;  %v5369_v46 = vadd.f32 %v7474_v33, %v5322_v19  ;;  %v5370_v32 = vadd.f32 %v7474_v33, %v5323_v17  ;;  %vm5077_vm2 = vcmp.gt.f32.partialorder %v7509_v8, 0.0 }
0x6960   :  { %v4976_v31 = vpop.f32.mrb[65].mxu0  ;;  %v5712_v34 = vadd.f32 -1.0, %v6589_v28  ;;  %v5124_v35 = vmin.f32 %v7562_v24, 0.0  ;;  %v5278_v37 = vsel %vm5078_vm15, %v7502_v4, %v5713_v30  ;;  %6596 = vpow2.f32 %v5177_v7 }
0x6961   :  { %v5408_v36 = vadd.f32 %v5407_v21, %v5369_v46  ;;  %v5123_v39 = vmin.f32 %v7565_v25, 0.0  ;;  %v5325_v41 = vmul.f32 %v7464_v27, %v5278_v37  ;;  %v7576_v43 = vadd.f32 %v6207_v61, %v7428_v51 }
0x6962   :  { %v5277_v42 = vsel %vm5077_vm2, %v7509_v8, %v5712_v34  ;;  %v5183_v16 = vmul.f32 1.442695, %v5124_v35  ;;  %v7580_v47 = vadd.f32 %v7428_v51, %v4966_v11  ;;  %v6591_v4 = vpop.eup %6590  ;;  %vm5080_vm3 = vcmp.gt.f32.partialorder %v7528_v38, 0.0 }
0x6963   :  { %v6213_v44 = vpop.f32.mrb[66].mxu0  ;;  %v5324_v13 = vmul.f32 %v7464_v27, %v5277_v42  ;;  %v5409_v45 = vadd.f32 %v5408_v36, %v5370_v32  ;;  %v5126_v52 = vmin.f32 %v7576_v43, 0.0  ;;  %v5715_v8 = vadd.f32 -1.0, %v6591_v4 }
0x6964   :  { %v4986_v50 = vpop.f32.mrb[67].mxu0  ;;  %v5181_v54 = vmul.f32 1.442695, %v5123_v39  ;;  %v5372_v3 = vadd.f32 %v7474_v33, %v5325_v41  ;;  %v5125_v58 = vmin.f32 %v7580_v47, 0.0  ;;  %v7588_v59 = vadd.f32 %v6210_v26, %v7428_v51 }
0x6965   :  { %v5371_v53 = vadd.f32 %v7474_v33, %v5324_v13  ;;  %v5187_v57 = vmul.f32 1.442695, %v5126_v52  ;;  %v5280_v48 = vsel %vm5080_vm3, %v7528_v38, %v5715_v8  ;;  %6598 = vpow2.f32 %v5183_v16 }
0x6966   :  { %v6593_v60 = vpop.eup %6592  ;;  %v7592_v29 = vadd.f32 %v7428_v51, %v4976_v31  ;;  %v5185_v9 = vmul.f32 1.442695, %v5125_v58  ;;  %v7595_v61 = vadd.f32 %v6213_v44, %v7428_v51  ;;  %vm5079_vm4 = vcmp.gt.f32.partialorder %v7539_v55, 0.0 }
0x6967   :  { %v6216_v22 = vpop.f32.mrb[68].mxu0  ;;  %v5410_v12 = vadd.f32 %v5409_v45, %v5371_v53  ;;  %v5714_v1 = vadd.f32 -1.0, %v6593_v60  ;;  %6600 = vpow2.f32 %v5187_v57  ;;  %v5128_v10 = vmin.f32 %v7588_v59, 0.0 }
0x6968   :  { %v4996_v0 = vpop.f32.mrb[69].mxu0  ;;  %v6595_v6 = vpop.eup %6594  ;;  %6602 = vpow2.f32 %v5181_v54  ;;  %v5327_v38 = vmul.f32 %v7464_v27, %v5280_v48  ;;  %v7602_v14 = vadd.f32 %v7428_v51, %v4986_v50  ;;  %v5127_v20 = vmin.f32 %v7592_v29, 0.0 }
0x6969   :  { %v5411_v23 = vadd.f32 %v5410_v12, %v5372_v3  ;;  %v5279_v11 = vsel %vm5079_vm4, %v7539_v55, %v5714_v1  ;;  %6604 = vpow2.f32 %v5185_v9  ;;  %v5717_v19 = vadd.f32 -1.0, %v6595_v6 }
0x696a   :  { %v6597_v17 = vpop.eup %6596  ;;  %v5326_v18 = vmul.f32 %v7464_v27, %v5279_v11  ;;  %v5191_v2 = vmul.f32 1.442695, %v5128_v10  ;;  %vm5082_vm5 = vcmp.gt.f32.partialorder %v7542_v56, 0.0  ;;  %v5130_v26 = vmin.f32 %v7595_v61, 0.0 }
0x696b   :  { %v6219_v15 = vpop.f32.mrb[70].mxu0  ;;  %v5716_v21 = vadd.f32 -1.0, %v6597_v17  ;;  %vm5081_vm6 = vcmp.gt.f32.partialorder %v7549_v62, 0.0  ;;  %v5189_v28 = vmul.f32 1.442695, %v5127_v20  ;;  %v5129_v7 = vmin.f32 %v7602_v14, 0.0 }
0x696c   :  { %v5006_v40 = vpop.f32.mrb[71].mxu0  ;;  %v5373_v55 = vadd.f32 %v7474_v33, %v5326_v18  ;;  %6606 = vpow2.f32 %v5191_v2  ;;  %v5195_v30 = vmul.f32 1.442695, %v5130_v26  ;;  %v7613_v31 = vadd.f32 %v6216_v22, %v7428_v51 }
0x696d   :  { %v5281_v46 = vsel %vm5081_vm6, %v7549_v62, %v5716_v21  ;;  %v5374_v34 = vadd.f32 %v7474_v33, %v5327_v38  ;;  %v5282_v36 = vsel %vm5082_vm5, %v7542_v56, %v5717_v19  ;;  %vm5084_vm7 = vcmp.gt.f32.partialorder %v7562_v24, 0.0 }
0x696e   :  { %v5412_v35 = vadd.f32 %v5411_v23, %v5373_v55  ;;  %v5328_v37 = vmul.f32 %v7464_v27, %v5281_v46  ;;  %6608 = vpow2.f32 %v5189_v28  ;;  %v5193_v41 = vmul.f32 1.442695, %v5129_v7 }
0x696f   :  { %v6222_v32 = vpop.f32.mrb[72].mxu0  ;;  %v6599_v62 = vpop.eup %6598  ;;  %vm5086_vm8 = vcmp.gt.f32.partialorder %v7576_v43, 0.0  ;;  %6610 = vpow2.f32 %v5195_v30  ;;  %v5329_v45 = vmul.f32 %v7464_v27, %v5282_v36  ;;  %vm5085_vm9 = vcmp.gt.f32.partialorder %v7580_v47, 0.0 }
0x6970   :  { %v5016_v39 = vpop.f32.mrb[73].mxu0  ;;  %v5375_v42 = vadd.f32 %v7474_v33, %v5328_v37  ;;  %v5413_v44 = vadd.f32 %v5412_v35, %v5374_v34  ;;  %6612 = vpow2.f32 %v5193_v41  ;;  %v5132_v56 = vmin.f32 %v7613_v31, 0.0 }
0x6971   :  { %v6601_v13 = vpop.eup %6600  ;;  %vm5088_vm10 = vcmp.gt.f32.partialorder %v7588_v59, 0.0  ;;  %v7628_v53 = vadd.f32 %v7428_v51, %v4996_v0  ;;  %vm5087_vm11 = vcmp.gt.f32.partialorder %v7592_v29, 0.0  ;;  %v7634_v57 = vadd.f32 %v6219_v15, %v7428_v51 }
0x6972   :  { %v6603_v50 = vpop.eup %6602  ;;  %v7624_v4 = vadd.f32 %v5413_v44, %v5375_v42  ;;  %v5721_v52 = vadd.f32 -1.0, %v6601_v13  ;;  %v5199_v3 = vmul.f32 1.442695, %v5132_v56  ;;  %v7637_v58 = vadd.f32 %v7428_v51, %v5006_v40 }
0x6973   :  { %v6225_v16 = vpop.f32.mrb[74].mxu0  ;;  %v6605_v54 = vpop.eup %6604  ;;  %v5719_v22 = vadd.f32 -1.0, %v6599_v62  ;;  %vm5090_vm12 = vcmp.gt.f32.partialorder %v7595_v61, 0.0  ;;  %v7644_v48 = vadd.f32 %v7474_v33, %v5329_v45  ;;  %vm5083_vm13 = vcmp.gt.f32.partialorder %v7565_v25, 0.0 }
0x6974   :  { %v7630_v8 = vpop.f32.mrb[75].mxu0  ;;  %v5286_v60 = vsel %vm5086_vm8, %v7576_v43, %v5721_v52  ;;  %v5720_v12 = vadd.f32 -1.0, %v6605_v54  ;;  %vm5089_vm14 = vcmp.gt.f32.partialorder %v7602_v14, 0.0  ;;  %6614 = vpow2.f32 %v5199_v3 }
0x6975   :  { %v5333_v0 = vmul.f32 %v7464_v27, %v5286_v60  ;;  %v5131_v1 = vmin.f32 %v7628_v53, 0.0  ;;  %v5718_v23 = vadd.f32 -1.0, %v6603_v50  ;;  %v5134_v10 = vmin.f32 %v7634_v57, 0.0 }
0x6976   :  { %v6607_v6 = vpop.eup %6606  ;;  %v5285_v43 = vsel %vm5085_vm9, %v7580_v47, %v5720_v12  ;;  %v5133_v38 = vmin.f32 %v7637_v58, 0.0  ;;  %v5284_v2 = vsel %vm5084_vm7, %v7562_v24, %v5719_v22  ;;  %v7663_v47 = vadd.f32 %v6222_v32, %v7428_v51 }
0x6977   :  { %v6228_v9 = vpop.f32.mrb[76].mxu0  ;;  %v5380_v15 = vadd.f32 %v7474_v33, %v5333_v0  ;;  %v5332_v17 = vmul.f32 %v7464_v27, %v5285_v43  ;;  %v5723_v18 = vadd.f32 -1.0, %v6607_v6  ;;  %v5197_v19 = vmul.f32 1.442695, %v5131_v1 }
0x6978   :  { %v7655_v11 = vpop.f32.mrb[77].mxu0  ;;  %v5203_v20 = vmul.f32 1.442695, %v5134_v10  ;;  %v5201_v40 = vmul.f32 1.442695, %v5133_v38  ;;  %v6609_v21 = vpop.eup %6608  ;;  %v7670_v28 = vadd.f32 %v7428_v51, %v5016_v39  ;;  %v7674_v32 = vadd.f32 %v6225_v16, %v7428_v51 }
0x6979   :  { %v5379_v26 = vadd.f32 %v7474_v33, %v5332_v17  ;;  %v5288_v55 = vsel %vm5088_vm10, %v7588_v59, %v5723_v18  ;;  %6616 = vpow2.f32 %v5197_v19  ;;  %v6611_v30 = vpop.eup %6610  ;;  %v5722_v7 = vadd.f32 -1.0, %v6609_v21 }
0x697a   :  { %v5335_v24 = vmul.f32 %v7464_v27, %v5288_v55  ;;  %6618 = vpow2.f32 %v5203_v20  ;;  %v6613_v35 = vpop.eup %6612  ;;  %v5725_v37 = vadd.f32 -1.0, %v6611_v30  ;;  %v5136_v59 = vmin.f32 %v7663_v47, 0.0 }
0x697b   :  { %v6231_v46 = vpop.f32.mrb[78].mxu0  ;;  %v5419_v36 = vadd.f32 %v5380_v15, %v5379_v26  ;;  %6620 = vpow2.f32 %v5201_v40  ;;  %v7680_v39 = vmul.f32 %v7464_v27, %v5284_v2  ;;  %v5287_v41 = vsel %vm5087_vm11, %v7592_v29, %v5722_v7 }
0x697c   :  { %v7676_v34 = vpop.f32.mrb[79].mxu0  ;;  %v5724_v62 = vadd.f32 -1.0, %v6613_v35  ;;  %vm5092_vm15 = vcmp.gt.f32.partialorder %v7613_v31, 0.0  ;;  %v5334_v42 = vmul.f32 %v7464_v27, %v5287_v41  ;;  %v5290_v44 = vsel %vm5090_vm12, %v7595_v61, %v5725_v37 }
0x697d   :  { %v5207_v13 = vmul.f32 1.442695, %v5136_v59  ;;  %v5135_v45 = vmin.f32 %v7670_v28, 0.0  ;;  %v5283_v56 = vsel %vm5083_vm13, %v7565_v25, %v5718_v23  ;;  %v5382_v16 = vadd.f32 %v7474_v33, %v5335_v24 }
0x697e   :  { %v5289_v29 = vsel %vm5089_vm14, %v7602_v14, %v5724_v62  ;;  %v5138_v50 = vmin.f32 %v7674_v32, 0.0  ;;  %v6615_v52 = vpop.eup %6614  ;;  %v5381_v54 = vadd.f32 %v7474_v33, %v5334_v42  ;;  %v5337_v22 = vmul.f32 %v7464_v27, %v5290_v44 }
0x697f   :  { %v5336_v61 = vmul.f32 %v7464_v27, %v5289_v29  ;;  %6622 = vpow2.f32 %v5207_v13  ;;  %v5205_v3 = vmul.f32 1.442695, %v5135_v45  ;;  %v5727_v60 = vadd.f32 -1.0, %v6615_v52 }
0x6980   :  { %v5211_v12 = vmul.f32 1.442695, %v5138_v50  ;;  %v7704_v25 = vadd.f32 %v7428_v51, %v7630_v8  ;;  %v5420_v0 = vadd.f32 %v5419_v36, %v5381_v54  ;;  %v7708_v1 = vadd.f32 %v6228_v9, %v7428_v51 }
0x6981   :  { %v5383_v14 = vadd.f32 %v7474_v33, %v5336_v61  ;;  %6624 = vpow2.f32 %v5205_v3  ;;  %v5330_v6 = vmul.f32 %v7464_v27, %v5283_v56  ;;  %vm5091_vm2 = vcmp.gt.f32.partialorder %v7628_v53, 0.0 }
0x6982   :  { %6626 = vpow2.f32 %v5211_v12  ;;  %v5137_v23 = vmin.f32 %v7704_v25, 0.0  ;;  %v5421_v10 = vadd.f32 %v5420_v0, %v5382_v16  ;;  %v5292_v8 = vsel %vm5092_vm15, %v7613_v31, %v5727_v60 }
0x6983   :  { %v6617_v43 = vpop.eup %6616  ;;  %vm5094_vm3 = vcmp.gt.f32.partialorder %v7634_v57, 0.0  ;;  %v5140_v38 = vmin.f32 %v7708_v1, 0.0  ;;  %v5384_v9 = vadd.f32 %v7474_v33, %v5337_v22  ;;  %v7721_v19 = vadd.f32 %v7428_v51, %v7655_v11 }
0x6984   :  { %v6619_v15 = vpop.eup %6618  ;;  %v5726_v17 = vadd.f32 -1.0, %v6617_v43  ;;  %v5209_v18 = vmul.f32 1.442695, %v5137_v23  ;;  %v5422_v20 = vadd.f32 %v5421_v10, %v5383_v14  ;;  %v7724_v26 = vadd.f32 %v6231_v46, %v7428_v51 }
0x6985   :  { %v6621_v2 = vpop.eup %6620  ;;  %v5729_v40 = vadd.f32 -1.0, %v6619_v15  ;;  %v5215_v21 = vmul.f32 1.442695, %v5140_v38  ;;  %v5339_v31 = vmul.f32 %v7464_v27, %v5292_v8  ;;  %vm5093_vm4 = vcmp.gt.f32.partialorder %v7637_v58, 0.0 }
0x6986   :  { %v5291_v55 = vsel %vm5091_vm2, %v7628_v53, %v5726_v17  ;;  %v5728_v30 = vadd.f32 -1.0, %v6621_v2  ;;  %6628 = vpow2.f32 %v5209_v18  ;;  %v5423_v7 = vadd.f32 %v5422_v20, %v5384_v9 }
0x6987   :  { %v5338_v24 = vmul.f32 %v7464_v27, %v5291_v55  ;;  %6630 = vpow2.f32 %v5215_v21  ;;  %v5377_v11 = vadd.f32 %v7474_v33, %v5330_v6  ;;  %v5294_v46 = vsel %vm5094_vm3, %v7634_v57, %v5729_v40 }
0x6988   :  { %v5293_v35 = vsel %vm5093_vm4, %v7637_v58, %v5728_v30  ;;  %v5139_v36 = vmin.f32 %v7721_v19, 0.0  ;;  %v5142_v41 = vmin.f32 %v7724_v26, 0.0  ;;  %v7743_v62 = vadd.f32 %v7428_v51, %v7676_v34 }
0x6989   :  { %v6623_v37 = vpop.eup %6622  ;;  %v5385_v53 = vadd.f32 %v7474_v33, %v5338_v24  ;;  %v5340_v59 = vmul.f32 %v7464_v27, %v5293_v35  ;;  %v5386_v42 = vadd.f32 %v7474_v33, %v5339_v31  ;;  %vm5096_vm5 = vcmp.gt.f32.partialorder %v7663_v47, 0.0 }
0x698a   :  { %v5731_v57 = vadd.f32 -1.0, %v6623_v37  ;;  %v5213_v44 = vmul.f32 1.442695, %v5139_v36  ;;  %v5341_v45 = vmul.f32 %v7464_v27, %v5294_v46  ;;  %v5219_v16 = vmul.f32 1.442695, %v5142_v41 }
0x698b   :  { %v6625_v58 = vpop.eup %6624  ;;  %v5424_v13 = vadd.f32 %v5423_v7, %v5385_v53  ;;  %v5387_v56 = vadd.f32 %v7474_v33, %v5340_v59  ;;  %v5141_v51 = vmin.f32 %v7743_v62, 0.0  ;;  %vm5095_vm6 = vcmp.gt.f32.partialorder %v7670_v28, 0.0 }
0x698c   :  { %v6627_v29 = vpop.eup %6626  ;;  %v5296_v50 = vsel %vm5096_vm5, %v7663_v47, %v5731_v57  ;;  %v5730_v52 = vadd.f32 -1.0, %v6625_v58  ;;  %6632 = vpow2.f32 %v5213_v44  ;;  %v5656_v61 = vmul.f32 -1.442695, %v7423_v49 }
0x698d   :  { %v5425_v34 = vadd.f32 %v5424_v13, %v5386_v42  ;;  %v5733_v54 = vadd.f32 -1.0, %v6627_v29  ;;  %6634 = vpow2.f32 %v5219_v16  ;;  %v5217_v22 = vmul.f32 1.442695, %v5141_v51 }
0x698e   :  { %v5295_v3 = vsel %vm5095_vm6, %v7670_v28, %v5730_v52  ;;  %v5415_v60 = vadd.f32 %v7624_v4, %v7644_v48  ;;  %v5388_v12 = vadd.f32 %v7474_v33, %v5341_v45  ;;  %v5343_v0 = vmul.f32 %v7464_v27, %v5296_v50 }
0x698f   :  { %v5426_v47 = vadd.f32 %v5425_v34, %v5387_v56  ;;  %v5342_v14 = vmul.f32 %v7464_v27, %v5295_v3  ;;  %v5378_v23 = vadd.f32 %v7474_v33, %v7680_v39  ;;  %vm5098_vm7 = vcmp.gt.f32.partialorder %v7674_v32, 0.0 }
0x6990   :  { %v6629_v6 = vpop.eup %6628  ;;  %6636 = vpow2.f32 %v5217_v22  ;;  %v5416_v49 = vadd.f32 %v5415_v60, %v5377_v11  ;;  %v5298_v4 = vsel %vm5098_vm7, %v7674_v32, %v5733_v54  ;;  %vm5097_vm8 = vcmp.gt.f32.partialorder %v7704_v25, 0.0 }
0x6991   :  { %v6631_v28 = vpop.eup %6630  ;;  %v5389_v43 = vadd.f32 %v7474_v33, %v5342_v14  ;;  %v5427_v10 = vadd.f32 %v5426_v47, %v5388_v12  ;;  %v5732_v48 = vadd.f32 -1.0, %v6629_v6  ;;  %6638 = vpow2.f32 %v5656_v61 }
0x6992   :  { %v7765_v8 = vadd.f32 %v5416_v49, %v5378_v23  ;;  %v5390_v38 = vadd.f32 %v7474_v33, %v5343_v0  ;;  %v5735_v9 = vadd.f32 -1.0, %v6631_v28  ;;  %v5345_v17 = vmul.f32 %v7464_v27, %v5298_v4 }
0x6993   :  { %v5428_v15 = vadd.f32 %v5427_v10, %v5389_v43  ;;  %v5297_v39 = vsel %vm5097_vm8, %v7704_v25, %v5732_v48  ;;  %vm5100_vm9 = vcmp.gt.f32.partialorder %v7708_v1, 0.0  ;;  %vm5099_vm10 = vcmp.gt.f32.partialorder %v7721_v19, 0.0 }
0x6994   :  { %v5344_v18 = vmul.f32 %v7464_v27, %v5297_v39  ;;  %v5300_v21 = vsel %vm5100_vm9, %v7708_v1, %v5735_v9  ;;  %v5392_v55 = vadd.f32 %v7474_v33, %v5345_v17  ;;  %vm5102_vm11 = vcmp.gt.f32.partialorder %v7724_v26, 0.0 }
0x6995   :  { %v5429_v2 = vadd.f32 %v5428_v15, %v5390_v38  ;;  %v5347_v11 = vmul.f32 %v7464_v27, %v5300_v21  ;;  %vm5101_vm12 = vcmp.gt.f32.partialorder %v7743_v62, 0.0  ;;  %v6659_v21 = vld [vmem:[%s7836_s5] ss:$0 sm:$0xff]  ;;  %s6666_s5 = smov 10   ;;  %vm5443_vm14 = vcmask 80896  }
0x6996   :  { %v6633_v20 = vpop.eup %6632  ;;  %v5391_v32 = vadd.f32 %v7474_v33, %v5344_v18  ;;  %v6665_v18 = vmov 0.0|0.0   ;;  %vm5455_vm15 = vcmask 162816   ;;  %vm5533_vm2 = vcmask 31744  }
0x6997   :  { %v6635_v40 = vpop.eup %6634  ;;  %v5734_v31 = vadd.f32 -1.0, %v6633_v20  ;;  %6244 = vmatprep.subr.bf16.mxu1 %v6665_v18  ;;  %v5446_v20 = vld [vmem:[%s7839_s8 + $0x8] sm:$0xff] }
0x6998   :  { %v5430_v30 = vadd.f32 %v5429_v2, %v5391_v32  ;;  %v5737_v25 = vadd.f32 -1.0, %v6635_v40  ;;  %v5445_v2 = vld [vmem:[%s7839_s8] sm:$0xff] }
0x6999   :  { %v5299_v24 = vsel %vm5099_vm10, %v7721_v19, %v5734_v31  ;;  %v5394_v19 = vadd.f32 %v7474_v33, %v5347_v11  ;;  %v6245_v32 = vpack.c.bf16 %v5446_v20, %v5445_v2 }
0x699a   :  { %v6637_v7 = vpop.eup %6636  ;;  %v5346_v46 = vmul.f32 %v7464_v27, %v5299_v24  ;;  %v5431_v35 = vadd.f32 %v5430_v30, %v5392_v55  ;;  %v5302_v36 = vsel %vm5102_vm11, %v7724_v26, %v5737_v25 }
0x699b   :  { %v5736_v1 = vadd.f32 -1.0, %v6637_v7  ;;  %v6639_v37 = vpop.eup %6638  ;;  %v5349_v42 = vmul.f32 %v7464_v27, %v5302_v36 }
0x699c   :  { %v5393_v53 = vadd.f32 %v7474_v33, %v5346_v46  ;;  %v4503_v44 = vadd.f32 1.0, %v6639_v37 }
0x699d   :  { %v5301_v59 = vsel %vm5101_vm12, %v7743_v62, %v5736_v1  ;;  %v5396_v26 = vadd.f32 %v7474_v33, %v5349_v42 }
0x699e   :  { %v5432_v41 = vadd.f32 %v5431_v35, %v5393_v53  ;;  %v5348_v57 = vmul.f32 %v7464_v27, %v5301_v59  ;;  %6640 = vrcp.f32 %v4503_v44 }
0x69a0   :  { %v5395_v58 = vadd.f32 %v7474_v33, %v5348_v57  ;;  %v5433_v13 = vadd.f32 %v5432_v41, %v5394_v19 }
0x69a2   :  { %v5434_v45 = vadd.f32 %v5433_v13, %v5395_v58  ;;  %v5418_v13 = vmul.f32 0.05, %v7765_v8 }
0x69a4   :  { %v7789_v56 = vadd.f32 %v5434_v45, %v5396_v26 }
0x69a8   :  { %v6641_v16 = vpop.eup %6640 }
0x69a9   :  { %v4507_v50 = vmul.f32 %v6641_v16, %v7375_v63  ;;  %v4529_v63 = vld [vmem:[#allocation2 + $0x138] sm:$0xff] }
0x69af   :  { %v4510_v29 = vpop.permute.xlu0 %4509 }
0x69b0   :  { %v4512_v62 = vmul.f32 %v6641_v16, %v4510_v29 }
0x69b2   :  { %4514 = vrot.lane.b32.xlu1 %v4512_v62, %s6663_s18 }
0x6a24   :  { %v4515_v52 = vpop.permute.xlu1 %4514 }
0x6a25   :  { %v4517_v51 = vadd.f32 %v4515_v52, %v4507_v50 }
0x6a27   :  { %6642 = vtanh.f32 %v4517_v51 }
0x6a31   :  { %v6643_v34 = vpop.eup %6642 }
0x6a32   :  { %4520 = vrot.lane.b32.xlu0 %v6643_v34, %s6663_s18 }
0x6aa4   :  { %v4521_v54 = vpop.permute.xlu0 %4520 }
0x6aa5   :  { %v4523_v61 = vmul.f32 %v6641_v16, %v4521_v54 }
0x6aa7   :  { %4525 = vrot.lane.b32.xlu1 %v4523_v61, %s6664_s19 }
0x6b19   :  { %v4526_v3 = vpop.permute.xlu1 %4525 }
0x6b1a   :  { %4528 = vst.msk [vmem:[#allocation3 + $0x130] sm:$0xff] %vm83_vm0, %v4526_v3  ;;  %6171 = vmatmul.mubr.msk.f32.vlgmr.msra.gmra.mrb[76].mxu1 %vm83_vm0, %v4526_v3 }
0x6b1b   :  { %6241 = vmatprep.mubr.msk.f32.mxu1 %vm6661_vm1, %v6660_v5  ;;  %6246 = vmatpush3.bf16.msra.mxu1 %v6245_v32  ;;  %vm5459_vm1 = vcmask 1043456  }
0x6b1c   :  { %6239 = vmatprep.subr.mxu1 %v6660_v5  ;;  %v5447_v5 = vld [vmem:[%s7839_s8 + $0x10] sm:$0xf] }
0x6b1f   :  { %6240 = vmatpush3.msk.msra.mxu1 %vm5459_vm1, %v5447_v5 }
0x6b21   :  { %v4670_v22 = vld [vmem:[#allocation3 + $0x130] sm:$0xff] }
0x6b22   :  { %6232 = vmatprep.mubr.msk.f32.mxu0 %vm83_vm0, %v4670_v22 }
0x6bed   :  { %v4598_v60 = vpop.f32.mrb[76].mxu1 }
0x6bee   :  { %v4602_v12 = vadd.f32 %v4598_v60, %v4529_v63  ;;  %v6172_v47 = vpop.f32.mrb[77].mxu1 }
0x6bf0   :  { %6644 = vtanh.f32 %v4602_v12  ;;  %v5658_v14 = vmul.f32 -1.442695, %v4602_v12 }
0x6bf2   :  { %6646 = vpow2.f32 %v5658_v14 }
0x6bfa   :  { %v6645_v0 = vpop.eup %6644 }
0x6bfb   :  { %4612 = vrot.lane.b32.xlu0 %v6645_v0, %s6662_s17 }
0x6bfc   :  { %v6647_v6 = vpop.eup %6646 }
0x6bfd   :  { %v4606_v23 = vadd.f32 1.0, %v6647_v6 }
0x6bff   :  { %6648 = vrcp.f32 %v4606_v23 }
0x6c09   :  { %v6649_v49 = vpop.eup %6648 }
0x6c0a   :  { %v4610_v10 = vmul.f32 %v6649_v49, %v4517_v51 }
0x6c6d   :  { %v4613_v28 = vpop.permute.xlu0 %4612 }
0x6c6e   :  { %v4615_v43 = vmul.f32 %v6649_v49, %v4613_v28 }
0x6c70   :  { %4617 = vrot.lane.b32.xlu1 %v4615_v43, %s6663_s18 }
0x6ce2   :  { %v4618_v4 = vpop.permute.xlu1 %4617 }
0x6ce3   :  { %v4620_v48 = vadd.f32 %v4618_v4, %v4610_v10 }
0x6ce5   :  { %6650 = vtanh.f32 %v4620_v48 }
0x6cef   :  { %v6651_v38 = vpop.eup %6650 }
0x6cf0   :  { %4623 = vrot.lane.b32.xlu0 %v6651_v38, %s6663_s18 }
0x6d62   :  { %v4624_v15 = vpop.permute.xlu0 %4623 }
0x6d63   :  { %v4626_v39 = vmul.f32 %v6649_v49, %v4624_v15 }
0x6d65   :  { %4628 = vrot.lane.b32.xlu1 %v4626_v39, %s6664_s19 }
0x6dd7   :  { %v4629_v9 = vpop.permute.xlu1 %4628 }
0x6dd8   :  { %4631 = vst.msk [vmem:[#allocation3 + $0x138] sm:$0xff] %vm83_vm0, %v4629_v9 }
0x6ddf   :  { %v4671_v17 = vld [vmem:[#allocation3 + $0x138] sm:$0xff] }
0x6de0   :  { %6233 = vmatmul.mubr.msk.f32.gmra.mrb[80].mxu0 %vm83_vm0, %v4671_v17 }
0x6eb3   :  { %v6234_v40 = vpop.f32.mrb[80].mxu0 }
0x6eb4   :  { %v5062_v31 = vadd.f32 %v6659_v21, %v6234_v40  ;;  %v5056_v55 = vpop.f32.mrb[81].mxu0 }
0x6eb5   :  { %v5057_v30 = vadd.f32 %v6659_v21, %v5056_v55 }
0x6eb6   :  { %v5144_v25 = vmin.f32 %v5062_v31, 0.0  ;;  %vm5104_vm0 = vcmp.gt.f32.partialorder %v5062_v31, 0.0 }
0x6eb7   :  { %v5143_v24 = vmin.f32 %v5057_v30, 0.0  ;;  %vm5103_vm13 = vcmp.gt.f32.partialorder %v5057_v30, 0.0 }
0x6eb8   :  { %v5223_v7 = vmul.f32 1.442695, %v5144_v25 }
0x6eb9   :  { %v5221_v11 = vmul.f32 1.442695, %v5143_v24 }
0x6eba   :  { %6652 = vpow2.f32 %v5223_v7 }
0x6ebb   :  { %6654 = vpow2.f32 %v5221_v11 }
0x6ec4   :  { %v6653_v46 = vpop.eup %6652 }
0x6ec5   :  { %v6655_v35 = vpop.eup %6654  ;;  %v5739_v36 = vadd.f32 -1.0, %v6653_v46 }
0x6ec6   :  { %v5738_v1 = vadd.f32 -1.0, %v6655_v35 }
0x6ec7   :  { %v5304_v37 = vsel %vm5104_vm0, %v5062_v31, %v5739_v36 }
0x6ec8   :  { %v5303_v53 = vsel %vm5103_vm13, %v5057_v30, %v5738_v1  ;;  %v5351_v59 = vmul.f32 %v7464_v27, %v5304_v37 }
0x6ec9   :  { %v5350_v19 = vmul.f32 %v7464_v27, %v5303_v53  ;;  %v5742_v27 = vld [vmem:[%s7840_s9] ss:$0 sm:$0xff] }
0x6eca   :  { %v5398_v42 = vadd.f32 %v7474_v33, %v5351_v59 }
0x6ecb   :  { %v5397_v41 = vadd.f32 %v7474_v33, %v5350_v19 }
0x6ecd   :  { %v5436_v57 = vadd.f32 %v7789_v56, %v5397_v41 }
0x6ecf   :  { %v5437_v44 = vadd.f32 %v5436_v57, %v5398_v42 }
0x6ed1   :  { %v5438_v58 = vmul.f32 0.05, %v5437_v44 }
0x6ed3   :  { %5440 = vrot.lane.b32.xlu0 %v5438_v58, %s6666_s5 }
0x6f45   :  { %v5441_v26 = vpop.permute.xlu0 %5440 }
0x6f46   :  { %v5444_v45 = vsel %vm5443_vm14, %v5418_v13, %v5441_v26 }
0x6f47   :  { %6242 = vmatmul.mubr.msk.f32.vlgmr.msra.gmra.mrb[78].mxu1 %vm5455_vm15, %v5444_v45 }
0x701a   :  { %v5529_v16 = vpop.f32.mrb[78].mxu1 }
0x701b   :  { %v5530_v33 = vadd.f32 %v5742_v27, %v5529_v16  ;;  %v6243_v29 = vpop.f32.mrb[79].mxu1 }
0x701d   :  { %5534 = vst.msk [vmem:[%s7841_s10] sm:$0xff] %vm5533_vm2, %v5530_v33 }

</bundles_post_ra>
